<compile_context>
chip_gen: v6e
topology: v6e:2x2x1
jax: 0.10.0
libtpu: 0.0.40
codegen_flags: <defaults>
</compile_context>

<pallas_src>
import numpy as np
import jax
import jax.numpy as jnp
from jax.experimental import pallas as pl
from jax.experimental.pallas import tpu as pltpu


def _round_up(x, m):
    return ((x + m - 1) // m) * m


def padded_head_width(n_actions):
    """Lane-dense width of the fused value+policy head: value in column 0,
    policy in columns 1..n_actions, zero padding up to a multiple of 128."""
    return _round_up(n_actions + 1, 128)


# ---------------------------------------------------------------------------
# Kernel
# ---------------------------------------------------------------------------
def _rxn_policy_kernel(obs_ref, w1_ref, b1_ref, wcat_ref, bcat_ref, mask_ref,
                       lv_ref, policy_ref):
    # dense1 + ReLU.  obs arrives in its HBM dtype (f32 or bf16) and is cast
    # to bf16 in-kernel (VPU cast — no extra wrapper HBM pass); f32 MXU accum.
    obs_bf = obs_ref[...].astype(jnp.bfloat16)
    h = jnp.dot(obs_bf, w1_ref[...], preferred_element_type=jnp.float32)
    h = jnp.maximum(h + b1_ref[...], 0.0)

    # Fused value+policy head: single lane-dense (n_hidden, 256) matmul.
    # Column 0 = dense_v, columns 1..n_actions = dense_p, rest zero padding.
    out = jnp.dot(h.astype(jnp.bfloat16), wcat_ref[...],
                  preferred_element_type=jnp.float32) + bcat_ref[...]

    # logits[~mask] = -inf.  int8 mask is 0 at column 0 (value) and at every
    # padded column, so both drop out of the softmax below.
    keep = mask_ref[...].astype(jnp.float32) > 0.0
    masked = jnp.where(keep, out, -jnp.inf)

    # Row-wise numerically stable softmax over the padded 256-wide block ==
    # softmax over the n_actions masked logits (masked-off columns add 0).
    # NOTE: a fully-masked row produces NaN, same as the PyTorch module.
    m = jnp.max(masked, axis=-1, keepdims=True)
    e = jnp.exp(masked - m)
    s = jnp.sum(e, axis=-1, keepdims=True)
    inv = pl.reciprocal(s, approx=True)        # EUP slot — nearly free
    inv = inv * (2.0 - s * inv)                # one Newton step -> ~f32 accuracy
    policy_ref[...] = e * inv

    # Fused logits+value output (no separate (bm, 1) masked-store stream):
    # column 0 carries the raw value, columns 1..n_actions the masked logits,
    # padded columns stay -inf.  The softmax above used the masked copy only.
    col = jax.lax.broadcasted_iota(jnp.int32, out.shape, dimension=1)
    lv_ref[...] = jnp.where(col == 0, out, masked)


# ---------------------------------------------------------------------------
# One-time parameter packing (do NOT call per forward)
# ---------------------------------------------------------------------------
def prepare_params(w1, b1, wp, bp, wv, bv):
    """Packs: W1 -> bf16; value head fused as column 0 of a lane-dense
    (n_hidden, padded_head_width) bf16 weight matrix (policy in cols
    1..n_actions, rest zero)."""
    n_hidden, n_actions = wp.shape
    w_pad = padded_head_width(n_actions)

    w_cat = jnp.zeros((n_hidden, w_pad), jnp.float32)
    w_cat = w_cat.at[:, 0].set(wv[:, 0]).at[:, 1:1 + n_actions].set(wp)
    w_cat = w_cat.astype(jnp.bfloat16)

    b_cat = jnp.zeros((1, w_pad), jnp.float32)
    b_cat = b_cat.at[:, 0:1].set(bv).at[:, 1:1 + n_actions].set(bp)

    return (w1.astype(jnp.bfloat16), b1.astype(jnp.float32),
            w_cat, b_cat, n_actions)


# ---------------------------------------------------------------------------
# Generation-aware batch tiling
# ---------------------------------------------------------------------------
def _select_tiling(B):
    try:
        kind = jax.devices()[0].device_kind.lower()
    except Exception:
        kind = ""
    is_v7 = "v7" in kind
    max_tile = 512                       # ~24 MB/step working set at 512 rows
    vmem_limit = (32 << 20) if is_v7 else (48 << 20)
    if is_v7 and B > 16:
        # Guarantee >= 2 parallel grid steps so both v7x TensorCores are fed.
        tile = min(max_tile, _round_up(pl.cdiv(B, 2), 8))
    elif B <= max_tile:
        tile = B                         # single full-extent block
    else:
        tile = max_tile
    return tile, pl.cdiv(B, tile), vmem_limit


# ---------------------------------------------------------------------------
# Forward
# ---------------------------------------------------------------------------
def rxn_policy_forward(obs, params, mask_padded):
    """obs: (B, n_obs) f32 (or bf16); mask_padded: (B, padded_head_width) int8
    with column 0 and all padding columns zero (see compute_action_mask).

    Returns padded, lane-dense blocks (no post-kernel slice copies):
      lv_pad:     (B, W) f32 — col 0 = value, cols 1..n_actions = masked logits
      policy_pad: (B, W) f32 — cols 1..n_actions = softmax policy
    Use unpack_outputs() for PyTorch-shaped (logits, policy, value) views.
    """
    w1_bf, b1, w_cat, b_cat, n_actions = params
    B, n_obs = obs.shape
    w_pad = w_cat.shape[1]
    assert mask_padded.shape == (B, w_pad) and mask_padded.dtype == jnp.int8

    bm, grid_m, vmem_limit = _select_tiling(B)
    n_hidden = w1_bf.shape[1]

    out_shape = (
        jax.ShapeDtypeStruct((B, w_pad), jnp.float32),   # value | masked logits
        jax.ShapeDtypeStruct((B, w_pad), jnp.float32),   # policy
    )

    batch = lambda i: (i, 0)
    fixed = lambda i: (0, 0)

    cost = pl.CostEstimate(
        flops=2 * B * n_obs * n_hidden + 2 * B * n_hidden * w_pad,
        transcendentals=B * w_pad,
        bytes_accessed=(obs.size * obs.dtype.itemsize
                        + w1_bf.size * 2 + b1.size * 4
                        + w_cat.size * 2 + b_cat.size * 4
                        + mask_padded.size
                        + 2 * B * w_pad * 4),
    )

    def call(single_buffer_weights):
        wkw = ({"pipeline_mode": pl.Buffered(1)} if single_buffer_weights
               else {})
        in_specs = [
            pl.BlockSpec((bm, n_obs), batch),           # obs tile (native dtype)
            pl.BlockSpec(w1_bf.shape, fixed, **wkw),    # W1 bf16, grid-invariant
            pl.BlockSpec(b1.shape, fixed, **wkw),
            pl.BlockSpec(w_cat.shape, fixed, **wkw),    # fused head weights
            pl.BlockSpec(b_cat.shape, fixed, **wkw),
            pl.BlockSpec((bm, w_pad), batch),           # int8 mask tile
        ]
        out_specs = (
            pl.BlockSpec((bm, w_pad), batch),
            pl.BlockSpec((bm, w_pad), batch),
        )
        return pl.pallas_call(
            _rxn_policy_kernel,
            out_shape=out_shape,
            grid=(grid_m,),
            in_specs=in_specs,
            out_specs=out_specs,
            compiler_params=pltpu.CompilerParams(
                dimension_semantics=("parallel",),
                vmem_limit_bytes=vmem_limit,
            ),
            cost_estimate=cost,
        )(obs, w1_bf, b1, w_cat, b_cat, mask_padded)

    try:
        # Single-buffer the grid-invariant weights (they are never re-fetched).
        return call(True)
    except Exception:
        # Fallback if this jax build rejects Buffered(1) on the auto-pipeline.
        return call(False)


def unpack_outputs(lv_pad, policy_pad, n_actions):
    """Views matching the PyTorch forward: (masked logits, policy, value)."""
    logits = lv_pad[:, 1:1 + n_actions]
    policy = policy_pad[:, 1:1 + n_actions]
    value = lv_pad[:, 0]
    return logits, policy, value


# ---------------------------------------------------------------------------
# Tensor-only core of RxnPolicy.action_mask (plain-JAX glue, not a kernel)
# ---------------------------------------------------------------------------
def compute_action_mask(obs, n_actions, padded_width=None):
    """With padded_width set, directly emits the (B, padded_width) int8 mask
    the kernel consumes (column 0 = value column and all padding columns are
    0), so the forward wrapper does no per-call pad/astype pass."""
    B = obs.shape[0]
    n_nodes = n_actions // 91
    rxns_mask = obs[:, -n_actions:].reshape(B, n_nodes, 91)
    node_empty = rxns_mask.sum(axis=-1, keepdims=True) == 0   # (B, n_nodes, 1)
    mask = jnp.tile(node_empty, (1, 1, 91)).reshape(B, n_actions)
    # TODO(synk): parent-based mask clearing and the Program-hash /
    # os.path.exists() refinement (filesystem + graph traversal) have no
    # Pallas/JAX equivalent; omitted.
    if padded_width is None:
        return mask
    out = jnp.zeros((B, padded_width), jnp.int8)
    return out.at[:, 1:1 + n_actions].set(mask.astype(jnp.int8))


if __name__ == "__main__":
    B = 2
    N_OBS = 4278          # the module asserts n_obs == 4278
    N_HIDDEN = 128
    N_ACTIONS = 2 * 91    # n_actions is a multiple of 91 (reactions per node)

    key = jax.random.PRNGKey(0)
    ks = jax.random.split(key, 7)

    def linear_init(kw, kb, fan_in, fan_out):
        # deterministic torch.nn.Linear-style init: U(-1/sqrt(fan_in), 1/sqrt(fan_in))
        bound = 1.0 / np.sqrt(fan_in)
        w = jax.random.uniform(kw, (fan_in, fan_out), jnp.float32, -bound, bound)
        b = jax.random.uniform(kb, (1, fan_out), jnp.float32, -bound, bound)
        return w, b

    w1, b1 = linear_init(ks[0], ks[1], N_OBS, N_HIDDEN)
    wp, bp = linear_init(ks[2], ks[3], N_HIDDEN, N_ACTIONS)
    wv, bv = linear_init(ks[4], ks[5], N_HIDDEN, 1)

    obs = jax.random.uniform(ks[6], (B, N_OBS), jnp.float32, 0.0, 1.0)
    # Structure the trailing reaction-slot block so the derived mask is
    # non-empty: rxn node 0 "filled" (reaction 3 chosen), node 1 empty.
    rxn_part = jnp.zeros((B, N_ACTIONS), jnp.float32).at[:, 3].set(1.0)
    obs = obs.at[:, -N_ACTIONS:].set(rxn_part)

    params = prepare_params(w1, b1, wp, bp, wv, bv)       # one-time packing
    w_pad = padded_head_width(N_ACTIONS)
    mask_bool = compute_action_mask(obs, N_ACTIONS)                     # reference
    mask_i8 = compute_action_mask(obs, N_ACTIONS, padded_width=w_pad)   # kernel

    lv_pad, policy_pad = rxn_policy_forward(obs, params, mask_i8)
    jax.block_until_ready((lv_pad, policy_pad))
    logits, policy, value = unpack_outputs(lv_pad, policy_pad, N_ACTIONS)

    # pure-JAX reference with the same numerics (bf16 MXU operands, f32 accum)
    h_ref = jnp.maximum(
        jnp.dot(obs.astype(jnp.bfloat16), w1.astype(jnp.bfloat16),
                preferred_element_type=jnp.float32) + b1, 0.0)
    h_bf = h_ref.astype(jnp.bfloat16)
    logits_raw = jnp.dot(h_bf, wp.astype(jnp.bfloat16),
                         preferred_element_type=jnp.float32) + bp
    logits_ref = jnp.where(mask_bool, logits_raw, -jnp.inf)
    policy_ref = jax.nn.softmax(logits_ref, axis=1)
    value_ref = (jnp.dot(h_bf, wv.astype(jnp.bfloat16),
                         preferred_element_type=jnp.float32) + bv).reshape(-1)

    assert np.allclose(np.asarray(logits), np.asarray(logits_ref), rtol=2e-3, atol=2e-3)
    assert np.allclose(np.asarray(policy), np.asarray(policy_ref), rtol=2e-3, atol=2e-3)
    assert np.allclose(np.asarray(value), np.asarray(value_ref), rtol=2e-3, atol=2e-3)

    print("KERNEL_OK")
</pallas_src>

<mosaic_0001>
module attributes {stable_mosaic.version = 11 : i64} {
  func.func @_rxn_policy_kernel(%arg0: i32, %arg1: memref<2x4278xf32, #tpu.memory_space<vmem>>, %arg2: memref<4278x128xbf16, #tpu.memory_space<vmem>>, %arg3: memref<1x128xf32, #tpu.memory_space<vmem>>, %arg4: memref<128x256xbf16, #tpu.memory_space<vmem>>, %arg5: memref<1x256xf32, #tpu.memory_space<vmem>>, %arg6: memref<2x256xi8, #tpu.memory_space<vmem>>, %arg7: memref<2x256xf32, #tpu.memory_space<vmem>>, %arg8: memref<2x256xf32, #tpu.memory_space<vmem>>) attributes {dimension_semantics = [#tpu.dimension_semantics<parallel>], iteration_bounds = array<i64: 1>, scalar_prefetch = 0 : i64, scratch_operands = 0 : i64, tpu.core_type = #tpu.core_type<tc>, window_params = [{transform_indices = @transform_0, window_bounds = array<i64: 2, 4278>}, {pipeline_mode = #tpu.pipeline_mode<synchronous>, transform_indices = @transform_1, window_bounds = array<i64: 4278, 128>}, {pipeline_mode = #tpu.pipeline_mode<synchronous>, transform_indices = @transform_2, window_bounds = array<i64: 1, 128>}, {pipeline_mode = #tpu.pipeline_mode<synchronous>, transform_indices = @transform_3, window_bounds = array<i64: 128, 256>}, {pipeline_mode = #tpu.pipeline_mode<synchronous>, transform_indices = @transform_4, window_bounds = array<i64: 1, 256>}, {transform_indices = @transform_5, window_bounds = array<i64: 2, 256>}, {transform_indices = @transform_6, window_bounds = array<i64: 2, 256>}, {transform_indices = @transform_7, window_bounds = array<i64: 2, 256>}]} {
    %c0 = arith.constant 0 : index
    %c0_0 = arith.constant 0 : index
    %0 = vector.load %arg1[%c0, %c0_0] : memref<2x4278xf32, #tpu.memory_space<vmem>>, vector<2x4278xf32>
    %1 = arith.truncf %0 : vector<2x4278xf32> to vector<2x4278xbf16>
    %c0_1 = arith.constant 0 : index
    %c0_2 = arith.constant 0 : index
    %2 = vector.load %arg2[%c0_1, %c0_2] : memref<4278x128xbf16, #tpu.memory_space<vmem>>, vector<4278x128xbf16>
    %cst = arith.constant dense<0.000000e+00> : vector<2x128xf32>
    %3 = tpu.matmul %1, %2, %cst {dimension_numbers = #tpu.dot_dimension_numbers<[1], [0], [0], [1], [0, 0, 1, 1], [], []>} : vector<2x4278xbf16>, vector<4278x128xbf16>, vector<2x128xf32> -> vector<2x128xf32>
    %c0_3 = arith.constant 0 : index
    %c0_4 = arith.constant 0 : index
    %4 = vector.load %arg3[%c0_3, %c0_4] : memref<1x128xf32, #tpu.memory_space<vmem>>, vector<1x128xf32>
    %5 = vector.broadcast %4 : vector<1x128xf32> to vector<2x128xf32>
    %6 = arith.addf %3, %5 : vector<2x128xf32>
    %cst_5 = arith.constant 0.000000e+00 : f32
    %7 = vector.broadcast %cst_5 : f32 to vector<2x128xf32>
    %8 = arith.maximumf %6, %7 : vector<2x128xf32>
    %9 = arith.truncf %8 : vector<2x128xf32> to vector<2x128xbf16>
    %c0_6 = arith.constant 0 : index
    %c0_7 = arith.constant 0 : index
    %10 = vector.load %arg4[%c0_6, %c0_7] : memref<128x256xbf16, #tpu.memory_space<vmem>>, vector<128x256xbf16>
    %cst_8 = arith.constant dense<0.000000e+00> : vector<2x256xf32>
    %11 = tpu.matmul %9, %10, %cst_8 {dimension_numbers = #tpu.dot_dimension_numbers<[1], [0], [0], [1], [0, 0, 1, 1], [], []>} : vector<2x128xbf16>, vector<128x256xbf16>, vector<2x256xf32> -> vector<2x256xf32>
    %c0_9 = arith.constant 0 : index
    %c0_10 = arith.constant 0 : index
    %12 = vector.load %arg5[%c0_9, %c0_10] : memref<1x256xf32, #tpu.memory_space<vmem>>, vector<1x256xf32>
    %13 = vector.broadcast %12 : vector<1x256xf32> to vector<2x256xf32>
    %14 = arith.addf %11, %13 : vector<2x256xf32>
    %c0_11 = arith.constant 0 : index
    %c0_12 = arith.constant 0 : index
    %15 = vector.load %arg6[%c0_11, %c0_12] : memref<2x256xi8, #tpu.memory_space<vmem>>, vector<2x256xi8>
    %16 = arith.sitofp %15 : vector<2x256xi8> to vector<2x256xf32>
    %cst_13 = arith.constant 0.000000e+00 : f32
    %17 = vector.broadcast %cst_13 : f32 to vector<2x256xf32>
    %18 = arith.cmpf ogt, %16, %17 : vector<2x256xf32>
    %cst_14 = arith.constant 0xFF800000 : f32
    %19 = vector.broadcast %cst_14 : f32 to vector<2x256xf32>
    %20 = arith.select %18, %14, %19 : vector<2x256xi1>, vector<2x256xf32>
    %cst_15 = arith.constant dense<0xFF800000> : vector<2xf32>
    %21 = vector.multi_reduction <maximumf>, %20, %cst_15 [1] : vector<2x256xf32> to vector<2xf32>
    %22 = vector.shape_cast %21 : vector<2xf32> to vector<2x1xf32>
    %23 = vector.broadcast %22 : vector<2x1xf32> to vector<2x256xf32>
    %24 = arith.subf %20, %23 : vector<2x256xf32>
    %25 = math.exp %24 : vector<2x256xf32>
    %cst_16 = arith.constant dense<0.000000e+00> : vector<2xf32>
    %26 = vector.multi_reduction <add>, %25, %cst_16 [1] : vector<2x256xf32> to vector<2xf32>
    %27 = vector.shape_cast %26 : vector<2xf32> to vector<2x1xf32>
    %28 = tpu.reciprocal %27 {approx = true} : vector<2x1xf32> -> vector<2x1xf32>
    %29 = arith.mulf %27, %28 : vector<2x1xf32>
    %cst_17 = arith.constant 2.000000e+00 : f32
    %30 = vector.broadcast %cst_17 : f32 to vector<2x1xf32>
    %31 = arith.subf %30, %29 : vector<2x1xf32>
    %32 = arith.mulf %28, %31 : vector<2x1xf32>
    %33 = vector.broadcast %32 : vector<2x1xf32> to vector<2x256xf32>
    %34 = arith.mulf %25, %33 : vector<2x256xf32>
    %c0_18 = arith.constant 0 : index
    %c0_19 = arith.constant 0 : index
    %35 = vector.load %arg8[%c0_18, %c0_19] : memref<2x256xf32, #tpu.memory_space<vmem>>, vector<2x256xf32>
    tpu.vector_store %arg8[%c0_18, %c0_19], %34 {strides = array<i32>} : memref<2x256xf32, #tpu.memory_space<vmem>>, vector<2x256xf32>,
    %36 = tpu.iota {dimensions = array<i32: 1>} : vector<2x256xi32>
    %c0_i32 = arith.constant 0 : i32
    %37 = vector.broadcast %c0_i32 : i32 to vector<2x256xi32>
    %38 = arith.cmpi eq, %36, %37 : vector<2x256xi32>
    %39 = arith.select %38, %14, %20 : vector<2x256xi1>, vector<2x256xf32>
    %c0_20 = arith.constant 0 : index
    %c0_21 = arith.constant 0 : index
    %40 = vector.load %arg7[%c0_20, %c0_21] : memref<2x256xf32, #tpu.memory_space<vmem>>, vector<2x256xf32>
    tpu.vector_store %arg7[%c0_20, %c0_21], %39 {strides = array<i32>} : memref<2x256xf32, #tpu.memory_space<vmem>>, vector<2x256xf32>,
    return
  }
  func.func @transform_0(%arg0: i32) -> (i32, i32) {
    %c0_i32 = arith.constant 0 : i32
    %c0_i32_0 = arith.constant 0 : i32
    return %arg0, %c0_i32 : i32, i32
  }
  func.func @transform_1(%arg0: i32) -> (i32, i32) {
    %c0_i32 = arith.constant 0 : i32
    %c0_i32_0 = arith.constant 0 : i32
    %c0_i32_1 = arith.constant 0 : i32
    return %c0_i32, %c0_i32_0 : i32, i32
  }
  func.func @transform_2(%arg0: i32) -> (i32, i32) {
    %c0_i32 = arith.constant 0 : i32
    %c0_i32_0 = arith.constant 0 : i32
    %c0_i32_1 = arith.constant 0 : i32
    return %c0_i32, %c0_i32_0 : i32, i32
  }
  func.func @transform_3(%arg0: i32) -> (i32, i32) {
    %c0_i32 = arith.constant 0 : i32
    %c0_i32_0 = arith.constant 0 : i32
    %c0_i32_1 = arith.constant 0 : i32
    return %c0_i32, %c0_i32_0 : i32, i32
  }
  func.func @transform_4(%arg0: i32) -> (i32, i32) {
    %c0_i32 = arith.constant 0 : i32
    %c0_i32_0 = arith.constant 0 : i32
    %c0_i32_1 = arith.constant 0 : i32
    return %c0_i32, %c0_i32_0 : i32, i32
  }
  func.func @transform_5(%arg0: i32) -> (i32, i32) {
    %c0_i32 = arith.constant 0 : i32
    %c0_i32_0 = arith.constant 0 : i32
    return %arg0, %c0_i32 : i32, i32
  }
  func.func @transform_6(%arg0: i32) -> (i32, i32) {
    %c0_i32 = arith.constant 0 : i32
    %c0_i32_0 = arith.constant 0 : i32
    return %arg0, %c0_i32 : i32, i32
  }
  func.func @transform_7(%arg0: i32) -> (i32, i32) {
    %c0_i32 = arith.constant 0 : i32
    %c0_i32_0 = arith.constant 0 : i32
    return %arg0, %c0_i32 : i32, i32
  }
}

module attributes {stable_mosaic.version = 11 : i64} {
  func.func @_rxn_policy_kernel(%arg0: i32, %arg1: memref<2x4278xf32, #tpu.memory_space<vmem>>, %arg2: memref<4278x128xbf16, #tpu.memory_space<vmem>>, %arg3: memref<1x128xf32, #tpu.memory_space<vmem>>, %arg4: memref<128x256xbf16, #tpu.memory_space<vmem>>, %arg5: memref<1x256xf32, #tpu.memory_space<vmem>>, %arg6: memref<2x256xi8, #tpu.memory_space<vmem>>, %arg7: memref<2x256xf32, #tpu.memory_space<vmem>>, %arg8: memref<2x256xf32, #tpu.memory_space<vmem>>) attributes {dimension_semantics = [#tpu.dimension_semantics<parallel>], iteration_bounds = array<i64: 1>, scalar_prefetch = 0 : i64, scratch_operands = 0 : i64, tpu.core_type = #tpu.core_type<tc>, window_params = [{transform_indices = @transform_0, window_bounds = array<i64: 2, 4278>}, {pipeline_mode = #tpu.pipeline_mode<synchronous>, transform_indices = @transform_1, window_bounds = array<i64: 4278, 128>}, {pipeline_mode = #tpu.pipeline_mode<synchronous>, transform_indices = @transform_2, window_bounds = array<i64: 1, 128>}, {pipeline_mode = #tpu.pipeline_mode<synchronous>, transform_indices = @transform_3, window_bounds = array<i64: 128, 256>}, {pipeline_mode = #tpu.pipeline_mode<synchronous>, transform_indices = @transform_4, window_bounds = array<i64: 1, 256>}, {transform_indices = @transform_5, window_bounds = array<i64: 2, 256>}, {transform_indices = @transform_6, window_bounds = array<i64: 2, 256>}, {transform_indices = @transform_7, window_bounds = array<i64: 2, 256>}]} {
    %c0 = arith.constant 0 : index
    %c0_0 = arith.constant 0 : index
    %0 = vector.load %arg1[%c0, %c0_0] : memref<2x4278xf32, #tpu.memory_space<vmem>>, vector<2x4278xf32>
    %1 = arith.truncf %0 : vector<2x4278xf32> to vector<2x4278xbf16>
    %c0_1 = arith.constant 0 : index
    %c0_2 = arith.constant 0 : index
    %2 = vector.load %arg2[%c0_1, %c0_2] : memref<4278x128xbf16, #tpu.memory_space<vmem>>, vector<4278x128xbf16>
    %cst = arith.constant dense<0.000000e+00> : vector<2x128xf32>
    %3 = tpu.matmul %1, %2, %cst {dimension_numbers = #tpu.dot_dimension_numbers<[1], [0], [0], [1], [0, 0, 1, 1], [], []>} : vector<2x4278xbf16>, vector<4278x128xbf16>, vector<2x128xf32> -> vector<2x128xf32>
    %c0_3 = arith.constant 0 : index
    %c0_4 = arith.constant 0 : index
    %4 = vector.load %arg3[%c0_3, %c0_4] : memref<1x128xf32, #tpu.memory_space<vmem>>, vector<1x128xf32>
    %5 = vector.broadcast %4 : vector<1x128xf32> to vector<2x128xf32>
    %6 = arith.addf %3, %5 : vector<2x128xf32>
    %cst_5 = arith.constant 0.000000e+00 : f32
    %7 = vector.broadcast %cst_5 : f32 to vector<2x128xf32>
    %8 = arith.maximumf %6, %7 : vector<2x128xf32>
    %9 = arith.truncf %8 : vector<2x128xf32> to vector<2x128xbf16>
    %c0_6 = arith.constant 0 : index
    %c0_7 = arith.constant 0 : index
    %10 = vector.load %arg4[%c0_6, %c0_7] : memref<128x256xbf16, #tpu.memory_space<vmem>>, vector<128x256xbf16>
    %cst_8 = arith.constant dense<0.000000e+00> : vector<2x256xf32>
    %11 = tpu.matmul %9, %10, %cst_8 {dimension_numbers = #tpu.dot_dimension_numbers<[1], [0], [0], [1], [0, 0, 1, 1], [], []>} : vector<2x128xbf16>, vector<128x256xbf16>, vector<2x256xf32> -> vector<2x256xf32>
    %c0_9 = arith.constant 0 : index
    %c0_10 = arith.constant 0 : index
    %12 = vector.load %arg5[%c0_9, %c0_10] : memref<1x256xf32, #tpu.memory_space<vmem>>, vector<1x256xf32>
    %13 = vector.broadcast %12 : vector<1x256xf32> to vector<2x256xf32>
    %14 = arith.addf %11, %13 : vector<2x256xf32>
    %c0_11 = arith.constant 0 : index
    %c0_12 = arith.constant 0 : index
    %15 = vector.load %arg6[%c0_11, %c0_12] : memref<2x256xi8, #tpu.memory_space<vmem>>, vector<2x256xi8>
    %16 = arith.sitofp %15 : vector<2x256xi8> to vector<2x256xf32>
    %cst_13 = arith.constant 0.000000e+00 : f32
    %17 = vector.broadcast %cst_13 : f32 to vector<2x256xf32>
    %18 = arith.cmpf ogt, %16, %17 : vector<2x256xf32>
    %cst_14 = arith.constant 0xFF800000 : f32
    %19 = vector.broadcast %cst_14 : f32 to vector<2x256xf32>
    %20 = arith.select %18, %14, %19 : vector<2x256xi1>, vector<2x256xf32>
    %cst_15 = arith.constant dense<0xFF800000> : vector<2xf32>
    %21 = vector.multi_reduction <maximumf>, %20, %cst_15 [1] : vector<2x256xf32> to vector<2xf32>
    %22 = vector.shape_cast %21 : vector<2xf32> to vector<2x1xf32>
    %23 = vector.broadcast %22 : vector<2x1xf32> to vector<2x256xf32>
    %24 = arith.subf %20, %23 : vector<2x256xf32>
    %25 = math.exp %24 : vector<2x256xf32>
    %cst_16 = arith.constant dense<0.000000e+00> : vector<2xf32>
    %26 = vector.multi_reduction <add>, %25, %cst_16 [1] : vector<2x256xf32> to vector<2xf32>
    %27 = vector.shape_cast %26 : vector<2xf32> to vector<2x1xf32>
    %28 = tpu.reciprocal %27 {approx = true} : vector<2x1xf32> -> vector<2x1xf32>
    %29 = arith.mulf %27, %28 : vector<2x1xf32>
    %cst_17 = arith.constant 2.000000e+00 : f32
    %30 = vector.broadcast %cst_17 : f32 to vector<2x1xf32>
    %31 = arith.subf %30, %29 : vector<2x1xf32>
    %32 = arith.mulf %28, %31 : vector<2x1xf32>
    %33 = vector.broadcast %32 : vector<2x1xf32> to vector<2x256xf32>
    %34 = arith.mulf %25, %33 : vector<2x256xf32>
    %c0_18 = arith.constant 0 : index
    %c0_19 = arith.constant 0 : index
    %35 = vector.load %arg8[%c0_18, %c0_19] : memref<2x256xf32, #tpu.memory_space<vmem>>, vector<2x256xf32>
    tpu.vector_store %arg8[%c0_18, %c0_19], %34 {strides = array<i32>} : memref<2x256xf32, #tpu.memory_space<vmem>>, vector<2x256xf32>,
    %36 = tpu.iota {dimensions = array<i32: 1>} : vector<2x256xi32>
    %c0_i32 = arith.constant 0 : i32
    %37 = vector.broadcast %c0_i32 : i32 to vector<2x256xi32>
    %38 = arith.cmpi eq, %36, %37 : vector<2x256xi32>
    %39 = arith.select %38, %14, %20 : vector<2x256xi1>, vector<2x256xf32>
    %c0_20 = arith.constant 0 : index
    %c0_21 = arith.constant 0 : index
    %40 = vector.load %arg7[%c0_20, %c0_21] : memref<2x256xf32, #tpu.memory_space<vmem>>, vector<2x256xf32>
    tpu.vector_store %arg7[%c0_20, %c0_21], %39 {strides = array<i32>} : memref<2x256xf32, #tpu.memory_space<vmem>>, vector<2x256xf32>,
    return
  }
  func.func @transform_0(%arg0: i32) -> (i32, i32) {
    %c0_i32 = arith.constant 0 : i32
    %c0_i32_0 = arith.constant 0 : i32
    return %arg0, %c0_i32 : i32, i32
  }
  func.func @transform_1(%arg0: i32) -> (i32, i32) {
    %c0_i32 = arith.constant 0 : i32
    %c0_i32_0 = arith.constant 0 : i32
    %c0_i32_1 = arith.constant 0 : i32
    return %c0_i32, %c0_i32_0 : i32, i32
  }
  func.func @transform_2(%arg0: i32) -> (i32, i32) {
    %c0_i32 = arith.constant 0 : i32
    %c0_i32_0 = arith.constant 0 : i32
    %c0_i32_1 = arith.constant 0 : i32
    return %c0_i32, %c0_i32_0 : i32, i32
  }
  func.func @transform_3(%arg0: i32) -> (i32, i32) {
    %c0_i32 = arith.constant 0 : i32
    %c0_i32_0 = arith.constant 0 : i32
    %c0_i32_1 = arith.constant 0 : i32
    return %c0_i32, %c0_i32_0 : i32, i32
  }
  func.func @transform_4(%arg0: i32) -> (i32, i32) {
    %c0_i32 = arith.constant 0 : i32
    %c0_i32_0 = arith.constant 0 : i32
    %c0_i32_1 = arith.constant 0 : i32
    return %c0_i32, %c0_i32_0 : i32, i32
  }
  func.func @transform_5(%arg0: i32) -> (i32, i32) {
    %c0_i32 = arith.constant 0 : i32
    %c0_i32_0 = arith.constant 0 : i32
    return %arg0, %c0_i32 : i32, i32
  }
  func.func @transform_6(%arg0: i32) -> (i32, i32) {
    %c0_i32 = arith.constant 0 : i32
    %c0_i32_0 = arith.constant 0 : i32
    return %arg0, %c0_i32 : i32, i32
  }
  func.func @transform_7(%arg0: i32) -> (i32, i32) {
    %c0_i32 = arith.constant 0 : i32
    %c0_i32_0 = arith.constant 0 : i32
    return %arg0, %c0_i32 : i32, i32
  }
}

</mosaic_0001>

<bundles_post_ra>
// kernel: tpu_custom_call.1
= control target key start
LH: loop header
LB: loop body
LE: loop exit
PB: predicated region body
PF: predicated region fallthrough
CT: control target
= control target key end

     0   :  { %13 = vsyncpa [#allocation3], 0  ;;  %s4688_s0 = inlined_call_operand.hbm [shape: f32[2,4278], index: 0, kind: input, shape index: {}]   ;;  %s4689_s1 = inlined_call_operand.hbm [shape: bf16[4278,128], index: 1, kind: input, shape index: {}]   ;;  %s4690_s2 = inlined_call_operand.hbm [shape: f32[1,128], index: 2, kind: input, shape index: {}]   ;;  %s4691_s3 = inlined_call_operand.hbm [shape: bf16[128,256], index: 3, kind: input, shape index: {}]   ;;  %s4692_s4 = inlined_call_operand.hbm [shape: f32[1,256], index: 4, kind: input, shape index: {}]   ;;  %s4693_s5 = inlined_call_operand.hbm [shape: s8[2,256], index: 5, kind: input, shape index: {}]   ;;  %s4694_s6 = inlined_call_operand.hbm [shape: f32[2,256], index: 6, kind: output, shape index: {0}]   ;;  %s4695_s7 = inlined_call_operand.hbm [shape: f32[2,256], index: 7, kind: output, shape index: {1}]  }
   0x1   :  { %14 = vsyncpa [#allocation6], 0 }
   0x2   :  { %15 = vsyncpa [#allocation9], 0 }
   0x3   :  { %16 = vsyncpa [#allocation12], 0 }
   0x4   :  { %17 = vsyncpa [#allocation4], 0 }
   0x5   :  { %18 = vsyncpa [#allocation15], 0  ;;  %s4563_s24 = smov [#allocation5]  }
   0x6   :  { %s34_s25 = sshll.u32 %s4563_s24, 4  ;;  %s35_s25 = int_to_ptr.vmem [resolvable:$true] %s34_s25 }
   0x7   :  { %s4399_s26 = scalar_lea.vmem %s35_s25, 34240  ;;  %p4404_p1 = scmp.lt.s32.totalorder %s35_s25, %s35_s25 }
   0x8   :  { %p4400_p0 = scmp.ne.s32.totalorder %s35_s25, %s4399_s26  ;;  %p4405_p2 = scmp.lt.s32.totalorder %s4399_s26, %s4399_s26 }
   0xa   :  { %p4406_p3 = por %p4405_p2, %p4404_p1 }
   0xc   :  { %p4407_p4 = pnand %p4406_p3, %p4400_p0 }
   0xe   :  { %4410 = shalt.err (!%p4407_p4)
}
   0xf   :  { %s4564_s27 = smov 64   ;;  %s4565_s28 = smov 4  }
  0x10   :  { %40 = dma.hbm_to_vmem [thread:$0]  %s4689_s1, 34240, %s35_s25, [#allocation6], %s4564_s27, %s4564_s27, %s4565_s28  }
  0x11   :  { %s4566_s8 = smov [#allocation8]  }
  0x12   :  { %s56_s9 = sshll.u32 %s4566_s8, 4  ;;  %s57_s9 = int_to_ptr.vmem [resolvable:$true] %s56_s9 }
  0x13   :  { %s4419_s10 = scalar_lea.vmem %s57_s9, 2048  ;;  %p4424_p6 = scmp.lt.s32.totalorder %s57_s9, %s57_s9 }
  0x14   :  { %p4420_p5 = scmp.ne.s32.totalorder %s57_s9, %s4419_s10  ;;  %p4425_p7 = scmp.lt.s32.totalorder %s4419_s10, %s4419_s10 }
  0x16   :  { %p4426_p8 = por %p4425_p7, %p4424_p6 }
  0x18   :  { %p4427_p9 = pnand %p4426_p8, %p4420_p5 }
  0x1a   :  { %4430 = shalt.err (!%p4427_p9)
}
  0x1b   :  { %s4567_s11 = smov 128   ;;  %s4568_s12 = smov 8  }
  0x1c   :  { %62 = dma.hbm_to_vmem [thread:$0]  %s4691_s3, 2048, %s57_s9, [#allocation9], %s4567_s11, %s4567_s11, %s4568_s12  }
  0x1d   :  { %s4569_s15 = smov [#allocation2]   ;;  %s4570_s17 = smov [#allocation7]  }
  0x1e   :  { %s25_s16 = sshll.u32 %s4569_s15, 4  ;;  %s47_s1 = sshll.u32 %s4570_s17, 4  ;;  %s26_s16 = int_to_ptr.vmem [resolvable:$true] %s25_s16  ;;  %s48_s1 = int_to_ptr.vmem [resolvable:$true] %s47_s1 }
  0x1f   :  { %s4439_s18 = scalar_lea.vmem %s26_s16, 1088  ;;  %p4444_p11 = scmp.lt.s32.totalorder %s26_s16, %s26_s16 }
  0x20   :  { %p4440_p10 = scmp.ne.s32.totalorder %s26_s16, %s4439_s18  ;;  %p4445_p12 = scmp.lt.s32.totalorder %s4439_s18, %s4439_s18 }
  0x22   :  { %p4446_p13 = por %p4445_p12, %p4444_p11 }
  0x24   :  { %p4447_p0 = pnand %p4446_p13, %p4440_p10 }
  0x26   :  { %4450 = shalt.err (!%p4447_p0)
}
  0x27   :  { %28 = dma.hbm_to_vmem [thread:$0]  %s4688_s0, 1088, %s26_s16, [#allocation3]  }
  0x28   :  { %s4459_s21 = scalar_lea.vmem %s48_s1, 16  ;;  %s4463_s3 = scalar_lea.vmem %s48_s1, 32 }
  0x29   :  { %p4460_p1 = scmp.ne.s32.totalorder %s48_s1, %s4459_s21  ;;  %p4464_p2 = scmp.lt.s32.totalorder %s48_s1, %s48_s1 }
  0x2a   :  { %p4465_p3 = scmp.lt.s32.totalorder %s4463_s3, %s4459_s21 }
  0x2c   :  { %p4466_p4 = por %p4465_p3, %p4464_p2 }
  0x2e   :  { %p4467_p5 = pnand %p4466_p4, %p4460_p1 }
  0x30   :  { %4470 = shalt.err (!%p4467_p5)
}
  0x31   :  { %50 = dma.hbm_to_vmem [thread:$0]  %s4690_s2, 16, %s48_s1, [#allocation6]  }
  0x32   :  { %s4571_s24 = smov [#allocation10]   ;;  %s4572_s26 = smov [#allocation11]  }
  0x33   :  { %s69_s25 = sshll.u32 %s4571_s24, 4  ;;  %s79_s27 = sshll.u32 %s4572_s26, 4  ;;  %s70_s25 = int_to_ptr.vmem [resolvable:$true] %s69_s25  ;;  %s80_s27 = int_to_ptr.vmem [resolvable:$true] %s79_s27 }
  0x34   :  { %s4479_s28 = scalar_lea.vmem %s70_s25, 32  ;;  %p4484_p7 = scmp.lt.s32.totalorder %s70_s25, %s70_s25 }
  0x35   :  { %p4480_p6 = scmp.ne.s32.totalorder %s70_s25, %s4479_s28  ;;  %p4485_p8 = scmp.lt.s32.totalorder %s4479_s28, %s4479_s28 }
  0x37   :  { %p4486_p9 = por %p4485_p8, %p4484_p7 }
  0x39   :  { %p4487_p10 = pnand %p4486_p9, %p4480_p6 }
  0x3b   :  { %4490 = shalt.err (!%p4487_p10)
}
  0x3c   :  { %72 = dma.hbm_to_vmem [thread:$0]  %s4692_s4, 32, %s70_s25, [#allocation9]  }
  0x3d   :  { %s4499_s30 = scalar_lea.vmem %s80_s27, 32  ;;  %p4504_p12 = scmp.lt.s32.totalorder %s80_s27, %s80_s27 }
  0x3e   :  { %p4500_p11 = scmp.ne.s32.totalorder %s80_s27, %s4499_s30  ;;  %p4505_p13 = scmp.lt.s32.totalorder %s4499_s30, %s4499_s30 }
  0x40   :  { %p4506_p0 = por %p4505_p13, %p4504_p12 }
  0x42   :  { %p4507_p1 = pnand %p4506_p0, %p4500_p11 }
  0x44   :  { %4510 = shalt.err (!%p4507_p1)
}
  0x45   :  { %82 = dma.hbm_to_vmem [thread:$0]  %s4693_s5, 32, %s80_s27, [#allocation12]  }
  0x46   :  { %4551 = dma.done.wait [#allocation3], 1088  }
  0x47   :  { %4552 = vsyncadd [#allocation3], 4294966208 }
  0x48   :  { %4553 = dma.done.wait [#allocation6], 34256  }
  0x49   :  { %4554 = vsyncadd [#allocation6], 4294933040 }
  0x4a   :  { %4555 = dma.done.wait [#allocation9], 2080  }
  0x4b   :  { %4556 = vsyncadd [#allocation9], 4294965216 }
  0x4c   :  { %4557 = dma.done.wait [#allocation12], 32  }
  0x4d   :  { %4558 = vsyncadd [#allocation12], 4294967264  ;;  %v4087_v0 = vld [vmem:[#allocation5 + $0x78] sm:$0xff]   ;;  %v4091_v4 = vld [vmem:[#allocation5 + $0x70] sm:$0xff]   ;;  %v4573_v21 = vmov 1983009808   ;;  %v124_v23 = vlaneseq }
  0x4e   :  { %v4088_v1 = vld [vmem:[#allocation5 + $0x38] sm:$0xff]   ;;  %3720 = vmatprep.subr.bf16.mxu0 %v4087_v0  ;;  %v4092_v5 = vld [vmem:[#allocation5 + $0x30] sm:$0xff]   ;;  %v4095_v8 = vld [vmem:[#allocation5 + $0x68] sm:$0xff]   ;;  %v122_v22 = vunpack.c.l.s4 %v4573_v21  ;;  %vm2479_vm0 = vcmask 441344   ;;  %vm2483_vm1 = vcmask 1042432   ;;  %vm3330_vm4 = vcmask 1041408  }
  0x4f   :  { %v4089_v2 = vld [vmem:[#allocation5 + $0xf8] sm:$0xff]   ;;  %3721 = vmatpush3.bf16.msra.mxu0 %v4088_v1  ;;  %v4093_v6 = vld [vmem:[#allocation5 + $0xf0] sm:$0xff]   ;;  %v4096_v9 = vld [vmem:[#allocation5 + $0x28] sm:$0xff]   ;;  %v4637_v29 = vshrl.u32 %v124_v23, 7  ;;  %s4576_s4 = smov [#allocation13]  }
  0x50   :  { %v4090_v3 = vld [vmem:[#allocation5 + $0xb8] sm:$0xff]   ;;  %3742 = vmatprep.subr.bf16.mxu1 %v4089_v2  ;;  %3722 = vmatprep.subr.bf16.mxu0 %v4091_v4  ;;  %v4094_v7 = vld [vmem:[#allocation5 + $0xb0] sm:$0xff]   ;;  %v4097_v10 = vld [vmem:[#allocation5 + $0xe8] sm:$0xff]   ;;  %v123_v28 = vunpack.c.0.s8 %v122_v22  ;;  %s3405_s5 = sshll.u32 %s4576_s4, 4  ;;  %s3406_s5 = int_to_ptr.vmem [resolvable:$true] %s3405_s5 }
  0x51   :  { %3743 = vmatpush3.bf16.msra.mxu1 %v4090_v3  ;;  %v4098_v11 = vld [vmem:[#allocation5 + $0xa8] sm:$0xff]   ;;  %v4099_v12 = vld [vmem:[#allocation5 + $0x60] sm:$0xff]   ;;  %v4103_v16 = vld [vmem:[#allocation5 + $0x58] sm:$0xff]   ;;  %s4511_s9 = scalar_lea.vmem %s3406_s5, 64  ;;  %p4516_p3 = scmp.lt.s32.totalorder %s3406_s5, %s3406_s5 }
  0x52   :  { %3744 = vmatprep.subr.bf16.mxu1 %v4093_v6  ;;  %v4100_v13 = vld [vmem:[#allocation5 + $0x20] sm:$0xff]   ;;  %v4104_v17 = vld [vmem:[#allocation5 + $0x18] sm:$0xff]   ;;  %v4107_v20 = vld [vmem:[#allocation5 + $0x50] sm:$0xff]   ;;  %v4640_v34 = vsub.s32 %v123_v28, %v4637_v29  ;;  %p4512_p2 = scmp.ne.s32.totalorder %s3406_s5, %s4511_s9  ;;  %p4517_p4 = scmp.lt.s32.totalorder %s4511_s9, %s4511_s9 }
  0x53   :  { %3723 = vmatpush3.bf16.msra.mxu0 %v4092_v5  ;;  %v4101_v14 = vld [vmem:[#allocation5 + $0xe0] sm:$0xff]   ;;  %v4105_v18 = vld [vmem:[#allocation5 + $0xd8] sm:$0xff]   ;;  %v4108_v24 = vld [vmem:[#allocation5 + $0x10] sm:$0xff]  }
  0x54   :  { %3724 = vmatprep.subr.bf16.mxu0 %v4095_v8  ;;  %v4102_v15 = vld [vmem:[#allocation5 + $0xa0] sm:$0xff]   ;;  %v4106_v19 = vld [vmem:[#allocation5 + $0x98] sm:$0xff]   ;;  %v4109_v25 = vld [vmem:[#allocation5 + $0xd0] sm:$0xff]   ;;  %p4518_p5 = por %p4517_p4, %p4516_p3 }
  0x55   :  { %3745 = vmatpush3.bf16.msra.mxu1 %v4094_v7  ;;  %v4110_v26 = vld [vmem:[#allocation5 + $0x90] sm:$0xff]   ;;  %v4111_v27 = vld [vmem:[#allocation5 + $0x48] sm:$0xff]   ;;  %v4115_v33 = vld [vmem:[#allocation5 + $0x40] sm:$0xff]  }
  0x56   :  { %3746 = vmatprep.subr.bf16.mxu1 %v4097_v10  ;;  %v4112_v30 = vld [vmem:[#allocation5 + $0x8] sm:$0xff]   ;;  %v4116_v35 = vld [vmem:[#allocation5] sm:$0xff]   ;;  %v4119_v41 = vld [vmem:[#allocation5 + $0x178] sm:$0xff]   ;;  %p4519_p6 = pnand %p4518_p5, %p4512_p2 }
  0x57   :  { %3725 = vmatpush3.bf16.msra.mxu0 %v4096_v9  ;;  %v4113_v31 = vld [vmem:[#allocation5 + $0xc8] sm:$0xff]   ;;  %v4117_v36 = vld [vmem:[#allocation5 + $0xc0] sm:$0xff]   ;;  %v4121_v44 = vld [vmem:[#allocation5 + $0x138] sm:$0xff]  }
  0x58   :  { %3726 = vmatprep.subr.bf16.mxu0 %v4099_v12  ;;  %v4114_v32 = vld [vmem:[#allocation5 + $0x88] sm:$0xff]   ;;  %v102_v37 = vld [vmem:[#allocation2] sm:$0xff]  ;;  %v4124_v51 = vld [vmem:[#allocation5 + $0x170] sm:$0xff]  }
  0x59   :  { %3747 = vmatpush3.bf16.msra.mxu1 %v4098_v11  ;;  %v127_v38 = vrot.slane %v102_v37, %v4640_v34  ;;  %v4118_v39 = vld [vmem:[#allocation5 + $0x80] sm:$0xff]   ;;  %v120_v40 = vcombine.high %v102_v37, %v102_v37  ;;  %v4122_v46 = vld [vmem:[#allocation5 + $0x1f8] sm:$0xff]   ;;  %v4125_v53 = vld [vmem:[#allocation5 + $0x130] sm:$0xff]  }
  0x5a   :  { %3748 = vmatprep.subr.bf16.mxu1 %v4101_v14  ;;  %v4123_v49 = vld [vmem:[#allocation5 + $0x1b8] sm:$0xff]   ;;  %v4126_v54 = vld [vmem:[#allocation5 + $0x1f0] sm:$0xff]   ;;  %v4128_v56 = vld [vmem:[#allocation5 + $0x168] sm:$0xff]  }
  0x5b   :  { %3727 = vmatpush3.bf16.msra.mxu0 %v4100_v13  ;;  %v135_v42 = vcombine.high %v127_v38, %v127_v38  ;;  %v134_v43 = vrot.slane %v120_v40, %v4640_v34  ;;  %v298_v45 = vpack.c.bf16 %v127_v38, %v127_v38  ;;  %v4127_v55 = vld [vmem:[#allocation5 + $0x1b0] sm:$0xff]   ;;  %v4129_v57 = vld [vmem:[#allocation5 + $0x128] sm:$0xff]   ;;  %v4132_v60 = vld [vmem:[#allocation5 + $0x160] sm:$0xff]  }
  0x5c   :  { %3728 = vmatprep.subr.bf16.mxu0 %v4103_v16  ;;  %v4130_v58 = vld [vmem:[#allocation5 + $0x1e8] sm:$0xff]   ;;  %v4133_v61 = vld [vmem:[#allocation5 + $0x120] sm:$0xff]   ;;  %v4136_v0 = vld [vmem:[#allocation5 + $0x158] sm:$0xff]  }
  0x5d   :  { %3749 = vmatpush3.bf16.msra.mxu1 %v4102_v15  ;;  %v299_v47 = vpack.c.bf16 %v135_v42, %v135_v42  ;;  %v136_v48 = vcombine.high %v134_v43, %v134_v43  ;;  %v300_v50 = vpack.c.bf16 %v134_v43, %v134_v43  ;;  %v4131_v59 = vld [vmem:[#allocation5 + $0x1a8] sm:$0xff]   ;;  %v4134_v62 = vld [vmem:[#allocation5 + $0x1e0] sm:$0xff]   ;;  %v4137_v1 = vld [vmem:[#allocation5 + $0x118] sm:$0xff]  }
  0x5e   :  { %3750 = vmatprep.subr.bf16.mxu1 %v4105_v18  ;;  %v4135_v63 = vld [vmem:[#allocation5 + $0x1a0] sm:$0xff]   ;;  %v4138_v2 = vld [vmem:[#allocation5 + $0x1d8] sm:$0xff]   ;;  %v4140_v4 = vld [vmem:[#allocation5 + $0x150] sm:$0xff]  }
  0x5f   :  { %3729 = vmatpush3.bf16.msra.mxu0 %v4104_v17  ;;  %2519 = vmatprep.mubr.bf16.mxu0 %v299_v47  ;;  %v301_v52 = vpack.c.bf16 %v136_v48, %v136_v48  ;;  %v4139_v3 = vld [vmem:[#allocation5 + $0x198] sm:$0xff]   ;;  %v4141_v5 = vld [vmem:[#allocation5 + $0x110] sm:$0xff]   ;;  %v4144_v8 = vld [vmem:[#allocation5 + $0x148] sm:$0xff]  }
  0x60   :  { %3730 = vmatprep.subr.bf16.mxu0 %v4107_v20  ;;  %v4142_v6 = vld [vmem:[#allocation5 + $0x1d0] sm:$0xff]   ;;  %v4145_v9 = vld [vmem:[#allocation5 + $0x108] sm:$0xff]   ;;  %v4148_v12 = vld [vmem:[#allocation5 + $0x140] sm:$0xff]  }
  0x61   :  { %3751 = vmatpush3.bf16.msra.mxu1 %v4106_v19  ;;  %2559 = vmatprep.mubr.bf16.mxu1 %v301_v52  ;;  %v4143_v7 = vld [vmem:[#allocation5 + $0x190] sm:$0xff]   ;;  %v4146_v10 = vld [vmem:[#allocation5 + $0x1c8] sm:$0xff]   ;;  %v4149_v13 = vld [vmem:[#allocation5 + $0x100] sm:$0xff]  }
  0x62   :  { %3752 = vmatprep.subr.bf16.mxu1 %v4109_v25  ;;  %v4147_v11 = vld [vmem:[#allocation5 + $0x188] sm:$0xff]   ;;  %v4150_v14 = vld [vmem:[#allocation5 + $0x1c0] sm:$0xff]   ;;  %v4152_v19 = vld [vmem:[#allocation5 + $0x278] sm:$0xff]  }
  0x63   :  { %3731 = vmatpush3.bf16.msra.mxu0 %v4108_v24  ;;  %v103_v15 = vld [vmem:[#allocation2 + $0x8] sm:$0xff]  ;;  %v4154_v22 = vld [vmem:[#allocation5 + $0x238] sm:$0xff]   ;;  %v4176_v52 = vld [vmem:[#allocation5 + $0x290] sm:$0xff]  }
  0x64   :  { %3732 = vmatprep.subr.bf16.mxu0 %v4111_v27  ;;  %v144_v16 = vrot.slane %v103_v15, %v4640_v34  ;;  %v4151_v17 = vld [vmem:[#allocation5 + $0x180] sm:$0xff]   ;;  %v137_v18 = vcombine.high %v103_v15, %v103_v15  ;;  %v4155_v25 = vld [vmem:[#allocation5 + $0x2f8] sm:$0xff]   ;;  %v4161_v37 = vld [vmem:[#allocation5 + $0x268] sm:$0xff]  }
  0x65   :  { %3753 = vmatpush3.bf16.msra.mxu1 %v4110_v26  ;;  %v4156_v28 = vld [vmem:[#allocation5 + $0x2b8] sm:$0xff]   ;;  %v4162_v38 = vld [vmem:[#allocation5 + $0x228] sm:$0xff]   ;;  %v4166_v42 = vld [vmem:[#allocation5 + $0x220] sm:$0xff]  }
  0x66   :  { %3754 = vmatprep.subr.bf16.mxu1 %v4113_v31  ;;  %v152_v20 = vcombine.high %v144_v16, %v144_v16  ;;  %v151_v21 = vrot.slane %v137_v18, %v4640_v34  ;;  %v302_v24 = vpack.c.bf16 %v144_v16, %v144_v16  ;;  %v4157_v31 = vld [vmem:[#allocation5 + $0x270] sm:$0xff]   ;;  %v4164_v40 = vld [vmem:[#allocation5 + $0x2a8] sm:$0xff]   ;;  %v4167_v43 = vld [vmem:[#allocation5 + $0x2e0] sm:$0xff]  }
  0x67   :  { %3733 = vmatpush3.bf16.msra.mxu0 %v4112_v30  ;;  %v4171_v47 = vld [vmem:[#allocation5 + $0x2d8] sm:$0xff]   ;;  %v4194_v15 = vld [vmem:[#allocation5 + $0x368] sm:$0xff]  }
  0x68   :  { %3734 = vmatprep.subr.bf16.mxu0 %v4115_v33  ;;  %v303_v26 = vpack.c.bf16 %v152_v20, %v152_v20  ;;  %v153_v27 = vcombine.high %v151_v21, %v151_v21  ;;  %v304_v30 = vpack.c.bf16 %v151_v21, %v151_v21  ;;  %v4158_v33 = vld [vmem:[#allocation5 + $0x230] sm:$0xff]   ;;  %v4172_v48 = vld [vmem:[#allocation5 + $0x298] sm:$0xff]   ;;  %v4195_v16 = vld [vmem:[#allocation5 + $0x328] sm:$0xff]  }
  0x69   :  { %3755 = vmatpush3.bf16.msra.mxu1 %v4114_v32  ;;  %v4197_v18 = vld [vmem:[#allocation5 + $0x3a8] sm:$0xff]   ;;  %v4199_v20 = vld [vmem:[#allocation5 + $0x320] sm:$0xff]  }
  0x6a   :  { %3756 = vmatprep.subr.bf16.mxu1 %v4117_v36  ;;  %v305_v32 = vpack.c.bf16 %v153_v27, %v153_v27  ;;  %v4160_v36 = vld [vmem:[#allocation5 + $0x2b0] sm:$0xff]   ;;  %v4200_v21 = vld [vmem:[#allocation5 + $0x3e0] sm:$0xff]   ;;  %v4205_v27 = vld [vmem:[#allocation5 + $0x398] sm:$0xff]  }
  0x6b   :  { %3735 = vmatpush3.bf16.msra.mxu0 %v4116_v35  ;;  %v4159_v35 = vld [vmem:[#allocation5 + $0x2f0] sm:$0xff]  }
  0x6c   :  { %3764 = vmatprep.subr.bf16.mxu0 %v4119_v41  ;;  %v4165_v41 = vld [vmem:[#allocation5 + $0x260] sm:$0xff]  }
  0x6d   :  { %3757 = vmatpush3.bf16.msra.mxu1 %v4118_v39  ;;  %v4163_v39 = vld [vmem:[#allocation5 + $0x2e8] sm:$0xff]  }
  0x6e   :  { %3786 = vmatprep.subr.bf16.mxu1 %v4122_v46  ;;  %2520 = vmatmul.mubr.bf16.vlgmr.msra.gmra.mxu0 %v298_v45  ;;  %v4169_v45 = vld [vmem:[#allocation5 + $0x258] sm:$0xff]  }
  0x6f   :  { %3765 = vmatpush3.bf16.msra.mxu0 %v4121_v44  ;;  %2599 = vmatprep.mubr.bf16.mxu0 %v303_v26  ;;  %v4168_v44 = vld [vmem:[#allocation5 + $0x2a0] sm:$0xff]   ;;  %v4170_v46 = vld [vmem:[#allocation5 + $0x218] sm:$0xff]  }
  0x70   :  { %2560 = vmatmul.mubr.bf16.vlgmr.msra.gmra.mxu1 %v300_v50  ;;  %3766 = vmatprep.subr.bf16.mxu0 %v4124_v51  ;;  %v4174_v50 = vld [vmem:[#allocation5 + $0x210] sm:$0xff]   ;;  %v4204_v26 = vld [vmem:[#allocation5 + $0x3d8] sm:$0xff]  }
  0x71   :  { %3787 = vmatpush3.bf16.msra.mxu1 %v4123_v49  ;;  %2639 = vmatprep.mubr.bf16.mxu1 %v305_v32  ;;  %v4173_v49 = vld [vmem:[#allocation5 + $0x250] sm:$0xff]  }
  0x72   :  { %3788 = vmatprep.subr.bf16.mxu1 %v4126_v54  ;;  %v4175_v51 = vld [vmem:[#allocation5 + $0x2d0] sm:$0xff]   ;;  %v4178_v54 = vld [vmem:[#allocation5 + $0x208] sm:$0xff]  }
  0x73   :  { %3767 = vmatpush3.bf16.msra.mxu0 %v4125_v53  ;;  %v4177_v53 = vld [vmem:[#allocation5 + $0x248] sm:$0xff]   ;;  %v4209_v32 = vld [vmem:[#allocation5 + $0x390] sm:$0xff]  }
  0x74   :  { %3768 = vmatprep.subr.bf16.mxu0 %v4128_v56  ;;  %v4180_v56 = vld [vmem:[#allocation5 + $0x288] sm:$0xff]  }
  0x75   :  { %3789 = vmatpush3.bf16.msra.mxu1 %v4127_v55  ;;  %v4179_v55 = vld [vmem:[#allocation5 + $0x2c8] sm:$0xff]  }
  0x76   :  { %3790 = vmatprep.subr.bf16.mxu1 %v4130_v58  ;;  %v4182_v58 = vld [vmem:[#allocation5 + $0x200] sm:$0xff]  }
  0x77   :  { %3769 = vmatpush3.bf16.msra.mxu0 %v4129_v57  ;;  %v4181_v57 = vld [vmem:[#allocation5 + $0x240] sm:$0xff]  }
  0x78   :  { %3770 = vmatprep.subr.bf16.mxu0 %v4132_v60  ;;  %v104_v60 = vld [vmem:[#allocation2 + $0x10] sm:$0xff] }
  0x79   :  { %3791 = vmatpush3.bf16.msra.mxu1 %v4131_v59  ;;  %v4183_v59 = vld [vmem:[#allocation5 + $0x2c0] sm:$0xff]  }
  0x7a   :  { %3792 = vmatprep.subr.bf16.mxu1 %v4134_v62  ;;  %v4184_v62 = vld [vmem:[#allocation5 + $0x280] sm:$0xff]  }
  0x7b   :  { %3771 = vmatpush3.bf16.msra.mxu0 %v4133_v61  ;;  %v161_v61 = vrot.slane %v104_v60, %v4640_v34 }
  0x7c   :  { %3772 = vmatprep.subr.bf16.mxu0 %v4136_v0  ;;  %v4185_v0 = vld [vmem:[#allocation5 + $0x378] sm:$0xff]  }
  0x7d   :  { %3793 = vmatpush3.bf16.msra.mxu1 %v4135_v63  ;;  %v154_v63 = vcombine.high %v104_v60, %v104_v60  ;;  %v4227_v60 = vld [vmem:[#allocation5 + $0x468] sm:$0xff]  }
  0x7e   :  { %3794 = vmatprep.subr.bf16.mxu1 %v4138_v2 }
  0x7f   :  { %3773 = vmatpush3.bf16.msra.mxu0 %v4137_v1  ;;  %v169_v1 = vcombine.high %v161_v61, %v161_v61  ;;  %v168_v2 = vrot.slane %v154_v63, %v4640_v34  ;;  %v4230_v63 = vld [vmem:[#allocation5 + $0x4a8] sm:$0xff]  }
  0x80   :  { %3774 = vmatprep.subr.bf16.mxu0 %v4140_v4  ;;  %v306_v4 = vpack.c.bf16 %v161_v61, %v161_v61  ;;  %v4228_v61 = vld [vmem:[#allocation5 + $0x428] sm:$0xff]  }
  0x81   :  { %3795 = vmatpush3.bf16.msra.mxu1 %v4139_v3  ;;  %v4187_v3 = vld [vmem:[#allocation5 + $0x338] sm:$0xff]  }
  0x82   :  { %3796 = vmatprep.subr.bf16.mxu1 %v4142_v6  ;;  %v307_v6 = vpack.c.bf16 %v169_v1, %v169_v1  ;;  %v4232_v1 = vld [vmem:[#allocation5 + $0x420] sm:$0xff]  }
  0x83   :  { %3775 = vmatpush3.bf16.msra.mxu0 %v4141_v5  ;;  %v4188_v5 = vld [vmem:[#allocation5 + $0x3f8] sm:$0xff]  }
  0x84   :  { %3776 = vmatprep.subr.bf16.mxu0 %v4144_v8  ;;  %v4189_v8 = vld [vmem:[#allocation5 + $0x3b8] sm:$0xff]  }
  0x85   :  { %3797 = vmatpush3.bf16.msra.mxu1 %v4143_v7  ;;  %v170_v7 = vcombine.high %v168_v2, %v168_v2 }
  0x86   :  { %3798 = vmatprep.subr.bf16.mxu1 %v4146_v10  ;;  %v4190_v10 = vld [vmem:[#allocation5 + $0x370] sm:$0xff]  }
  0x87   :  { %3777 = vmatpush3.bf16.msra.mxu0 %v4145_v9  ;;  %v308_v9 = vpack.c.bf16 %v168_v2, %v168_v2  ;;  %v4233_v2 = vld [vmem:[#allocation5 + $0x4e0] sm:$0xff]  }
  0x88   :  { %3778 = vmatprep.subr.bf16.mxu0 %v4148_v12  ;;  %v4191_v12 = vld [vmem:[#allocation5 + $0x330] sm:$0xff]  }
  0x89   :  { %3799 = vmatpush3.bf16.msra.mxu1 %v4147_v11  ;;  %v309_v11 = vpack.c.bf16 %v170_v7, %v170_v7  ;;  %v4238_v7 = vld [vmem:[#allocation5 + $0x498] sm:$0xff]  }
  0x8a   :  { %3800 = vmatprep.subr.bf16.mxu1 %v4150_v14  ;;  %v4193_v14 = vld [vmem:[#allocation5 + $0x3b0] sm:$0xff]  }
  0x8b   :  { %3779 = vmatpush3.bf16.msra.mxu0 %v4149_v13  ;;  %v4192_v13 = vld [vmem:[#allocation5 + $0x3f0] sm:$0xff]  }
  0x8c   :  { %3808 = vmatprep.subr.bf16.mxu0 %v4152_v19  ;;  %v4198_v19 = vld [vmem:[#allocation5 + $0x360] sm:$0xff]  }
  0x8d   :  { %3801 = vmatpush3.bf16.msra.mxu1 %v4151_v17  ;;  %v4196_v17 = vld [vmem:[#allocation5 + $0x3e8] sm:$0xff]  }
  0x8e   :  { %2600 = vmatmul.mubr.bf16.vlgmr.msra.gmra.mxu0 %v302_v24  ;;  %3830 = vmatprep.subr.bf16.mxu1 %v4155_v25  ;;  %v4202_v24 = vld [vmem:[#allocation5 + $0x358] sm:$0xff]  }
  0x8f   :  { %3809 = vmatpush3.bf16.msra.mxu0 %v4154_v22  ;;  %2679 = vmatprep.mubr.bf16.mxu0 %v307_v6  ;;  %v4201_v22 = vld [vmem:[#allocation5 + $0x3a0] sm:$0xff]   ;;  %v4203_v25 = vld [vmem:[#allocation5 + $0x318] sm:$0xff]  }
  0x90   :  { %2640 = vmatmul.mubr.bf16.vlgmr.msra.gmra.mxu1 %v304_v30  ;;  %3810 = vmatprep.subr.bf16.mxu0 %v4157_v31  ;;  %v4207_v30 = vld [vmem:[#allocation5 + $0x310] sm:$0xff]   ;;  %v4237_v6 = vld [vmem:[#allocation5 + $0x4d8] sm:$0xff]  }
  0x91   :  { %3831 = vmatpush3.bf16.msra.mxu1 %v4156_v28  ;;  %2719 = vmatprep.mubr.bf16.mxu1 %v309_v11  ;;  %v4206_v28 = vld [vmem:[#allocation5 + $0x350] sm:$0xff]  }
  0x92   :  { %3832 = vmatprep.subr.bf16.mxu1 %v4159_v35  ;;  %v4208_v31 = vld [vmem:[#allocation5 + $0x3d0] sm:$0xff]   ;;  %v4211_v35 = vld [vmem:[#allocation5 + $0x308] sm:$0xff]  }
  0x93   :  { %3811 = vmatpush3.bf16.msra.mxu0 %v4158_v33  ;;  %v4210_v33 = vld [vmem:[#allocation5 + $0x348] sm:$0xff]   ;;  %v4242_v11 = vld [vmem:[#allocation5 + $0x490] sm:$0xff]  }
  0x94   :  { %3812 = vmatprep.subr.bf16.mxu0 %v4161_v37  ;;  %v4213_v37 = vld [vmem:[#allocation5 + $0x388] sm:$0xff]  }
  0x95   :  { %3833 = vmatpush3.bf16.msra.mxu1 %v4160_v36  ;;  %v4212_v36 = vld [vmem:[#allocation5 + $0x3c8] sm:$0xff]  }
  0x96   :  { %3834 = vmatprep.subr.bf16.mxu1 %v4163_v39  ;;  %v4215_v39 = vld [vmem:[#allocation5 + $0x300] sm:$0xff]  }
  0x97   :  { %3813 = vmatpush3.bf16.msra.mxu0 %v4162_v38  ;;  %v4214_v38 = vld [vmem:[#allocation5 + $0x340] sm:$0xff]  }
  0x98   :  { %3814 = vmatprep.subr.bf16.mxu0 %v4165_v41  ;;  %v105_v41 = vld [vmem:[#allocation2 + $0x18] sm:$0xff] }
  0x99   :  { %3835 = vmatpush3.bf16.msra.mxu1 %v4164_v40  ;;  %v4216_v40 = vld [vmem:[#allocation5 + $0x3c0] sm:$0xff]  }
  0x9a   :  { %3836 = vmatprep.subr.bf16.mxu1 %v4167_v43  ;;  %v4217_v43 = vld [vmem:[#allocation5 + $0x380] sm:$0xff]  }
  0x9b   :  { %3815 = vmatpush3.bf16.msra.mxu0 %v4166_v42  ;;  %v178_v42 = vrot.slane %v105_v41, %v4640_v34 }
  0x9c   :  { %3816 = vmatprep.subr.bf16.mxu0 %v4169_v45  ;;  %v4218_v45 = vld [vmem:[#allocation5 + $0x478] sm:$0xff]  }
  0x9d   :  { %3837 = vmatpush3.bf16.msra.mxu1 %v4168_v44  ;;  %v171_v44 = vcombine.high %v105_v41, %v105_v41  ;;  %v4260_v41 = vld [vmem:[#allocation5 + $0x568] sm:$0xff]  }
  0x9e   :  { %3838 = vmatprep.subr.bf16.mxu1 %v4171_v47 }
  0x9f   :  { %3817 = vmatpush3.bf16.msra.mxu0 %v4170_v46  ;;  %v186_v46 = vcombine.high %v178_v42, %v178_v42  ;;  %v185_v47 = vrot.slane %v171_v44, %v4640_v34  ;;  %v4263_v44 = vld [vmem:[#allocation5 + $0x5a8] sm:$0xff]  }
  0xa0   :  { %3818 = vmatprep.subr.bf16.mxu0 %v4173_v49  ;;  %v310_v49 = vpack.c.bf16 %v178_v42, %v178_v42  ;;  %v4261_v42 = vld [vmem:[#allocation5 + $0x528] sm:$0xff]  }
  0xa1   :  { %3839 = vmatpush3.bf16.msra.mxu1 %v4172_v48  ;;  %v4220_v48 = vld [vmem:[#allocation5 + $0x438] sm:$0xff]  }
  0xa2   :  { %3840 = vmatprep.subr.bf16.mxu1 %v4175_v51  ;;  %v311_v51 = vpack.c.bf16 %v186_v46, %v186_v46  ;;  %v4265_v46 = vld [vmem:[#allocation5 + $0x520] sm:$0xff]  }
  0xa3   :  { %3819 = vmatpush3.bf16.msra.mxu0 %v4174_v50  ;;  %v4221_v50 = vld [vmem:[#allocation5 + $0x4f8] sm:$0xff]  }
  0xa4   :  { %3820 = vmatprep.subr.bf16.mxu0 %v4177_v53  ;;  %v4222_v53 = vld [vmem:[#allocation5 + $0x4b8] sm:$0xff]  }
  0xa5   :  { %3841 = vmatpush3.bf16.msra.mxu1 %v4176_v52  ;;  %v187_v52 = vcombine.high %v185_v47, %v185_v47 }
  0xa6   :  { %3842 = vmatprep.subr.bf16.mxu1 %v4179_v55  ;;  %v4223_v55 = vld [vmem:[#allocation5 + $0x470] sm:$0xff]  }
  0xa7   :  { %3821 = vmatpush3.bf16.msra.mxu0 %v4178_v54  ;;  %v312_v54 = vpack.c.bf16 %v185_v47, %v185_v47  ;;  %v4266_v47 = vld [vmem:[#allocation5 + $0x5e0] sm:$0xff]  }
  0xa8   :  { %3822 = vmatprep.subr.bf16.mxu0 %v4181_v57  ;;  %v4224_v57 = vld [vmem:[#allocation5 + $0x430] sm:$0xff]  }
  0xa9   :  { %3843 = vmatpush3.bf16.msra.mxu1 %v4180_v56  ;;  %v313_v56 = vpack.c.bf16 %v187_v52, %v187_v52  ;;  %v4271_v52 = vld [vmem:[#allocation5 + $0x598] sm:$0xff]  }
  0xaa   :  { %3844 = vmatprep.subr.bf16.mxu1 %v4183_v59  ;;  %v4226_v59 = vld [vmem:[#allocation5 + $0x4b0] sm:$0xff]  }
  0xab   :  { %3823 = vmatpush3.bf16.msra.mxu0 %v4182_v58  ;;  %v4225_v58 = vld [vmem:[#allocation5 + $0x4f0] sm:$0xff]  }
  0xac   :  { %3852 = vmatprep.subr.bf16.mxu0 %v4185_v0  ;;  %v4231_v0 = vld [vmem:[#allocation5 + $0x460] sm:$0xff]  }
  0xad   :  { %3845 = vmatpush3.bf16.msra.mxu1 %v4184_v62  ;;  %v4229_v62 = vld [vmem:[#allocation5 + $0x4e8] sm:$0xff]  }
  0xae   :  { %2680 = vmatmul.mubr.bf16.vlgmr.msra.gmra.mxu0 %v306_v4  ;;  %3874 = vmatprep.subr.bf16.mxu1 %v4188_v5  ;;  %v4235_v4 = vld [vmem:[#allocation5 + $0x458] sm:$0xff]  }
  0xaf   :  { %3853 = vmatpush3.bf16.msra.mxu0 %v4187_v3  ;;  %2759 = vmatprep.mubr.bf16.mxu0 %v311_v51  ;;  %v4234_v3 = vld [vmem:[#allocation5 + $0x4a0] sm:$0xff]   ;;  %v4236_v5 = vld [vmem:[#allocation5 + $0x418] sm:$0xff]  }
  0xb0   :  { %2720 = vmatmul.mubr.bf16.vlgmr.msra.gmra.mxu1 %v308_v9  ;;  %3854 = vmatprep.subr.bf16.mxu0 %v4190_v10  ;;  %v4240_v9 = vld [vmem:[#allocation5 + $0x410] sm:$0xff]   ;;  %v4270_v51 = vld [vmem:[#allocation5 + $0x5d8] sm:$0xff]  }
  0xb1   :  { %3875 = vmatpush3.bf16.msra.mxu1 %v4189_v8  ;;  %2799 = vmatprep.mubr.bf16.mxu1 %v313_v56  ;;  %v4239_v8 = vld [vmem:[#allocation5 + $0x450] sm:$0xff]  }
  0xb2   :  { %3876 = vmatprep.subr.bf16.mxu1 %v4192_v13  ;;  %v4241_v10 = vld [vmem:[#allocation5 + $0x4d0] sm:$0xff]   ;;  %v4244_v13 = vld [vmem:[#allocation5 + $0x408] sm:$0xff]  }
  0xb3   :  { %3855 = vmatpush3.bf16.msra.mxu0 %v4191_v12  ;;  %v4243_v12 = vld [vmem:[#allocation5 + $0x448] sm:$0xff]   ;;  %v4275_v56 = vld [vmem:[#allocation5 + $0x590] sm:$0xff]  }
  0xb4   :  { %3856 = vmatprep.subr.bf16.mxu0 %v4194_v15  ;;  %v4246_v15 = vld [vmem:[#allocation5 + $0x488] sm:$0xff]  }
  0xb5   :  { %3877 = vmatpush3.bf16.msra.mxu1 %v4193_v14  ;;  %v4245_v14 = vld [vmem:[#allocation5 + $0x4c8] sm:$0xff]  }
  0xb6   :  { %3878 = vmatprep.subr.bf16.mxu1 %v4196_v17  ;;  %v4248_v17 = vld [vmem:[#allocation5 + $0x400] sm:$0xff]  }
  0xb7   :  { %3857 = vmatpush3.bf16.msra.mxu0 %v4195_v16  ;;  %v4247_v16 = vld [vmem:[#allocation5 + $0x440] sm:$0xff]  }
  0xb8   :  { %3858 = vmatprep.subr.bf16.mxu0 %v4198_v19  ;;  %v106_v19 = vld [vmem:[#allocation2 + $0x20] sm:$0xff] }
  0xb9   :  { %3879 = vmatpush3.bf16.msra.mxu1 %v4197_v18  ;;  %v4249_v18 = vld [vmem:[#allocation5 + $0x4c0] sm:$0xff]  }
  0xba   :  { %3880 = vmatprep.subr.bf16.mxu1 %v4200_v21  ;;  %v4250_v21 = vld [vmem:[#allocation5 + $0x480] sm:$0xff]  }
  0xbb   :  { %3859 = vmatpush3.bf16.msra.mxu0 %v4199_v20  ;;  %v195_v20 = vrot.slane %v106_v19, %v4640_v34 }
  0xbc   :  { %3860 = vmatprep.subr.bf16.mxu0 %v4202_v24  ;;  %v4251_v24 = vld [vmem:[#allocation5 + $0x578] sm:$0xff]  }
  0xbd   :  { %3881 = vmatpush3.bf16.msra.mxu1 %v4201_v22  ;;  %v188_v22 = vcombine.high %v106_v19, %v106_v19  ;;  %v4293_v19 = vld [vmem:[#allocation5 + $0x668] sm:$0xff]  }
  0xbe   :  { %3882 = vmatprep.subr.bf16.mxu1 %v4204_v26 }
  0xbf   :  { %3861 = vmatpush3.bf16.msra.mxu0 %v4203_v25  ;;  %v203_v25 = vcombine.high %v195_v20, %v195_v20  ;;  %v202_v26 = vrot.slane %v188_v22, %v4640_v34  ;;  %v4296_v22 = vld [vmem:[#allocation5 + $0x6a8] sm:$0xff]  }
  0xc0   :  { %3862 = vmatprep.subr.bf16.mxu0 %v4206_v28  ;;  %v314_v28 = vpack.c.bf16 %v195_v20, %v195_v20  ;;  %v4294_v20 = vld [vmem:[#allocation5 + $0x628] sm:$0xff]  }
  0xc1   :  { %3883 = vmatpush3.bf16.msra.mxu1 %v4205_v27  ;;  %v4253_v27 = vld [vmem:[#allocation5 + $0x538] sm:$0xff]  }
  0xc2   :  { %3884 = vmatprep.subr.bf16.mxu1 %v4208_v31  ;;  %v315_v31 = vpack.c.bf16 %v203_v25, %v203_v25  ;;  %v4298_v25 = vld [vmem:[#allocation5 + $0x620] sm:$0xff]  }
  0xc3   :  { %3863 = vmatpush3.bf16.msra.mxu0 %v4207_v30  ;;  %v4254_v30 = vld [vmem:[#allocation5 + $0x5f8] sm:$0xff]  }
  0xc4   :  { %3864 = vmatprep.subr.bf16.mxu0 %v4210_v33  ;;  %v4255_v33 = vld [vmem:[#allocation5 + $0x5b8] sm:$0xff]  }
  0xc5   :  { %3885 = vmatpush3.bf16.msra.mxu1 %v4209_v32  ;;  %v204_v32 = vcombine.high %v202_v26, %v202_v26 }
  0xc6   :  { %3886 = vmatprep.subr.bf16.mxu1 %v4212_v36  ;;  %v4256_v36 = vld [vmem:[#allocation5 + $0x570] sm:$0xff]  }
  0xc7   :  { %3865 = vmatpush3.bf16.msra.mxu0 %v4211_v35  ;;  %v316_v35 = vpack.c.bf16 %v202_v26, %v202_v26  ;;  %v4299_v26 = vld [vmem:[#allocation5 + $0x6e0] sm:$0xff]  }
  0xc8   :  { %3866 = vmatprep.subr.bf16.mxu0 %v4214_v38  ;;  %v4257_v38 = vld [vmem:[#allocation5 + $0x530] sm:$0xff]  }
  0xc9   :  { %3887 = vmatpush3.bf16.msra.mxu1 %v4213_v37  ;;  %v317_v37 = vpack.c.bf16 %v204_v32, %v204_v32  ;;  %v4304_v32 = vld [vmem:[#allocation5 + $0x698] sm:$0xff]  }
  0xca   :  { %3888 = vmatprep.subr.bf16.mxu1 %v4216_v40  ;;  %v4259_v40 = vld [vmem:[#allocation5 + $0x5b0] sm:$0xff]  }
  0xcb   :  { %3867 = vmatpush3.bf16.msra.mxu0 %v4215_v39  ;;  %v4258_v39 = vld [vmem:[#allocation5 + $0x5f0] sm:$0xff]  }
  0xcc   :  { %3896 = vmatprep.subr.bf16.mxu0 %v4218_v45  ;;  %v4264_v45 = vld [vmem:[#allocation5 + $0x560] sm:$0xff]  }
  0xcd   :  { %3889 = vmatpush3.bf16.msra.mxu1 %v4217_v43  ;;  %v4262_v43 = vld [vmem:[#allocation5 + $0x5e8] sm:$0xff]  }
  0xce   :  { %3918 = vmatprep.subr.bf16.mxu1 %v4221_v50  ;;  %2760 = vmatmul.mubr.bf16.vlgmr.msra.gmra.mxu0 %v310_v49  ;;  %v4268_v49 = vld [vmem:[#allocation5 + $0x558] sm:$0xff]  }
  0xcf   :  { %3897 = vmatpush3.bf16.msra.mxu0 %v4220_v48  ;;  %2839 = vmatprep.mubr.bf16.mxu0 %v315_v31  ;;  %v4267_v48 = vld [vmem:[#allocation5 + $0x5a0] sm:$0xff]   ;;  %v4269_v50 = vld [vmem:[#allocation5 + $0x518] sm:$0xff]  }
  0xd0   :  { %2800 = vmatmul.mubr.bf16.vlgmr.msra.gmra.mxu1 %v312_v54  ;;  %3898 = vmatprep.subr.bf16.mxu0 %v4223_v55  ;;  %v4273_v54 = vld [vmem:[#allocation5 + $0x510] sm:$0xff]   ;;  %v4303_v31 = vld [vmem:[#allocation5 + $0x6d8] sm:$0xff]  }
  0xd1   :  { %3919 = vmatpush3.bf16.msra.mxu1 %v4222_v53  ;;  %2879 = vmatprep.mubr.bf16.mxu1 %v317_v37  ;;  %v4272_v53 = vld [vmem:[#allocation5 + $0x550] sm:$0xff]  }
  0xd2   :  { %3920 = vmatprep.subr.bf16.mxu1 %v4225_v58  ;;  %v4274_v55 = vld [vmem:[#allocation5 + $0x5d0] sm:$0xff]   ;;  %v4277_v58 = vld [vmem:[#allocation5 + $0x508] sm:$0xff]  }
  0xd3   :  { %3899 = vmatpush3.bf16.msra.mxu0 %v4224_v57  ;;  %v4276_v57 = vld [vmem:[#allocation5 + $0x548] sm:$0xff]   ;;  %v4308_v37 = vld [vmem:[#allocation5 + $0x690] sm:$0xff]  }
  0xd4   :  { %3900 = vmatprep.subr.bf16.mxu0 %v4227_v60  ;;  %v4279_v60 = vld [vmem:[#allocation5 + $0x588] sm:$0xff]  }
  0xd5   :  { %3921 = vmatpush3.bf16.msra.mxu1 %v4226_v59  ;;  %v4278_v59 = vld [vmem:[#allocation5 + $0x5c8] sm:$0xff]  }
  0xd6   :  { %3922 = vmatprep.subr.bf16.mxu1 %v4229_v62  ;;  %v4281_v62 = vld [vmem:[#allocation5 + $0x500] sm:$0xff]  }
  0xd7   :  { %3901 = vmatpush3.bf16.msra.mxu0 %v4228_v61  ;;  %v4280_v61 = vld [vmem:[#allocation5 + $0x540] sm:$0xff]  }
  0xd8   :  { %3902 = vmatprep.subr.bf16.mxu0 %v4231_v0  ;;  %v107_v0 = vld [vmem:[#allocation2 + $0x28] sm:$0xff] }
  0xd9   :  { %3923 = vmatpush3.bf16.msra.mxu1 %v4230_v63  ;;  %v4282_v63 = vld [vmem:[#allocation5 + $0x5c0] sm:$0xff]  }
  0xda   :  { %3924 = vmatprep.subr.bf16.mxu1 %v4233_v2  ;;  %v4283_v2 = vld [vmem:[#allocation5 + $0x580] sm:$0xff]  }
  0xdb   :  { %3903 = vmatpush3.bf16.msra.mxu0 %v4232_v1  ;;  %v212_v1 = vrot.slane %v107_v0, %v4640_v34 }
  0xdc   :  { %3904 = vmatprep.subr.bf16.mxu0 %v4235_v4  ;;  %v4284_v4 = vld [vmem:[#allocation5 + $0x678] sm:$0xff]  }
  0xdd   :  { %3925 = vmatpush3.bf16.msra.mxu1 %v4234_v3  ;;  %v205_v3 = vcombine.high %v107_v0, %v107_v0 }
  0xde   :  { %3926 = vmatprep.subr.bf16.mxu1 %v4237_v6 }
  0xdf   :  { %3905 = vmatpush3.bf16.msra.mxu0 %v4236_v5  ;;  %v220_v5 = vcombine.high %v212_v1, %v212_v1  ;;  %v219_v6 = vrot.slane %v205_v3, %v4640_v34  ;;  %v4323_v3 = vld [vmem:[#allocation5 + $0x730] sm:$0xff]  }
  0xe0   :  { %3906 = vmatprep.subr.bf16.mxu0 %v4239_v8  ;;  %v318_v8 = vpack.c.bf16 %v212_v1, %v212_v1  ;;  %v4324_v1 = vld [vmem:[#allocation5 + $0x7f0] sm:$0xff]  }
  0xe1   :  { %3927 = vmatpush3.bf16.msra.mxu1 %v4238_v7  ;;  %v4286_v7 = vld [vmem:[#allocation5 + $0x638] sm:$0xff]  }
  0xe2   :  { %3928 = vmatprep.subr.bf16.mxu1 %v4241_v10  ;;  %v319_v10 = vpack.c.bf16 %v220_v5, %v220_v5 }
  0xe3   :  { %3907 = vmatpush3.bf16.msra.mxu0 %v4240_v9  ;;  %v4287_v9 = vld [vmem:[#allocation5 + $0x6f8] sm:$0xff]  }
  0xe4   :  { %3908 = vmatprep.subr.bf16.mxu0 %v4243_v12  ;;  %v4288_v12 = vld [vmem:[#allocation5 + $0x6b8] sm:$0xff]  }
  0xe5   :  { %3929 = vmatpush3.bf16.msra.mxu1 %v4242_v11  ;;  %v221_v11 = vcombine.high %v219_v6, %v219_v6 }
  0xe6   :  { %3930 = vmatprep.subr.bf16.mxu1 %v4245_v14  ;;  %v4289_v14 = vld [vmem:[#allocation5 + $0x670] sm:$0xff]  }
  0xe7   :  { %3909 = vmatpush3.bf16.msra.mxu0 %v4244_v13  ;;  %v320_v13 = vpack.c.bf16 %v219_v6, %v219_v6  ;;  %v4326_v6 = vld [vmem:[#allocation5 + $0x768] sm:$0xff]  }
  0xe8   :  { %3910 = vmatprep.subr.bf16.mxu0 %v4247_v16  ;;  %v4290_v16 = vld [vmem:[#allocation5 + $0x630] sm:$0xff]  }
  0xe9   :  { %3931 = vmatpush3.bf16.msra.mxu1 %v4246_v15  ;;  %v321_v15 = vpack.c.bf16 %v221_v11, %v221_v11  ;;  %v4328_v11 = vld [vmem:[#allocation5 + $0x7e8] sm:$0xff]  }
  0xea   :  { %3932 = vmatprep.subr.bf16.mxu1 %v4249_v18  ;;  %v4292_v18 = vld [vmem:[#allocation5 + $0x6b0] sm:$0xff]  }
  0xeb   :  { %3911 = vmatpush3.bf16.msra.mxu0 %v4248_v17  ;;  %v4291_v17 = vld [vmem:[#allocation5 + $0x6f0] sm:$0xff]  }
  0xec   :  { %3940 = vmatprep.subr.bf16.mxu0 %v4251_v24  ;;  %v4297_v24 = vld [vmem:[#allocation5 + $0x660] sm:$0xff]  }
  0xed   :  { %3933 = vmatpush3.bf16.msra.mxu1 %v4250_v21  ;;  %v4295_v21 = vld [vmem:[#allocation5 + $0x6e8] sm:$0xff]  }
  0xee   :  { %2840 = vmatmul.mubr.bf16.vlgmr.msra.gmra.mxu0 %v314_v28  ;;  %3962 = vmatprep.subr.bf16.mxu1 %v4254_v30  ;;  %v4301_v28 = vld [vmem:[#allocation5 + $0x658] sm:$0xff]  }
  0xef   :  { %3941 = vmatpush3.bf16.msra.mxu0 %v4253_v27  ;;  %2919 = vmatprep.mubr.bf16.mxu0 %v319_v10  ;;  %v4300_v27 = vld [vmem:[#allocation5 + $0x6a0] sm:$0xff]   ;;  %v4302_v30 = vld [vmem:[#allocation5 + $0x618] sm:$0xff]  }
  0xf0   :  { %2880 = vmatmul.mubr.bf16.vlgmr.msra.gmra.mxu1 %v316_v35  ;;  %3942 = vmatprep.subr.bf16.mxu0 %v4256_v36  ;;  %v4306_v35 = vld [vmem:[#allocation5 + $0x610] sm:$0xff]  }
  0xf1   :  { %3963 = vmatpush3.bf16.msra.mxu1 %v4255_v33  ;;  %2959 = vmatprep.mubr.bf16.mxu1 %v321_v15  ;;  %v4305_v33 = vld [vmem:[#allocation5 + $0x650] sm:$0xff]   ;;  %v4330_v15 = vld [vmem:[#allocation5 + $0x760] sm:$0xff]  }
  0xf2   :  { %3964 = vmatprep.subr.bf16.mxu1 %v4258_v39  ;;  %v4307_v36 = vld [vmem:[#allocation5 + $0x6d0] sm:$0xff]   ;;  %v4310_v39 = vld [vmem:[#allocation5 + $0x608] sm:$0xff]  }
  0xf3   :  { %3943 = vmatpush3.bf16.msra.mxu0 %v4257_v38  ;;  %v4309_v38 = vld [vmem:[#allocation5 + $0x648] sm:$0xff]  }
  0xf4   :  { %3944 = vmatprep.subr.bf16.mxu0 %v4260_v41  ;;  %v4312_v41 = vld [vmem:[#allocation5 + $0x688] sm:$0xff]  }
  0xf5   :  { %3965 = vmatpush3.bf16.msra.mxu1 %v4259_v40  ;;  %v4311_v40 = vld [vmem:[#allocation5 + $0x6c8] sm:$0xff]  }
  0xf6   :  { %3966 = vmatprep.subr.bf16.mxu1 %v4262_v43  ;;  %v4314_v43 = vld [vmem:[#allocation5 + $0x600] sm:$0xff]  }
  0xf7   :  { %3945 = vmatpush3.bf16.msra.mxu0 %v4261_v42  ;;  %v4313_v42 = vld [vmem:[#allocation5 + $0x640] sm:$0xff]  }
  0xf8   :  { %3946 = vmatprep.subr.bf16.mxu0 %v4264_v45  ;;  %v108_v45 = vld [vmem:[#allocation2 + $0x30] sm:$0xff] }
  0xf9   :  { %3967 = vmatpush3.bf16.msra.mxu1 %v4263_v44  ;;  %v4315_v44 = vld [vmem:[#allocation5 + $0x6c0] sm:$0xff]  }
  0xfa   :  { %3968 = vmatprep.subr.bf16.mxu1 %v4266_v47  ;;  %v4316_v47 = vld [vmem:[#allocation5 + $0x680] sm:$0xff]  }
  0xfb   :  { %3947 = vmatpush3.bf16.msra.mxu0 %v4265_v46  ;;  %v229_v46 = vrot.slane %v108_v45, %v4640_v34 }
  0xfc   :  { %3948 = vmatprep.subr.bf16.mxu0 %v4268_v49  ;;  %v4317_v49 = vld [vmem:[#allocation5 + $0x778] sm:$0xff]  }
  0xfd   :  { %3969 = vmatpush3.bf16.msra.mxu1 %v4267_v48  ;;  %v222_v48 = vcombine.high %v108_v45, %v108_v45 }
  0xfe   :  { %3970 = vmatprep.subr.bf16.mxu1 %v4270_v51 }
  0xff   :  { %3949 = vmatpush3.bf16.msra.mxu0 %v4269_v50  ;;  %v237_v50 = vcombine.high %v229_v46, %v229_v46  ;;  %v236_v51 = vrot.slane %v222_v48, %v4640_v34  ;;  %v4351_v48 = vld [vmem:[#allocation5 + $0x838] sm:$0xff]  }
 0x100   :  { %3950 = vmatprep.subr.bf16.mxu0 %v4272_v53  ;;  %v4320_v53 = vld [vmem:[#allocation5 + $0x7f8] sm:$0xff]  }
 0x101   :  { %3971 = vmatpush3.bf16.msra.mxu1 %v4271_v52  ;;  %v322_v52 = vpack.c.bf16 %v229_v46, %v229_v46 }
 0x102   :  { %3972 = vmatprep.subr.bf16.mxu1 %v4274_v55  ;;  %v238_v55 = vcombine.high %v236_v51, %v236_v51 }
 0x103   :  { %3951 = vmatpush3.bf16.msra.mxu0 %v4273_v54  ;;  %v323_v54 = vpack.c.bf16 %v237_v50, %v237_v50  ;;  %v4574_v50 = vmov 0  }
 0x104   :  { %3952 = vmatprep.subr.bf16.mxu0 %v4276_v57 }
 0x105   :  { %3973 = vmatpush3.bf16.msra.mxu1 %v4275_v56  ;;  %v4319_v56 = vld [vmem:[#allocation5 + $0x738] sm:$0xff]  }
 0x106   :  { %3974 = vmatprep.subr.bf16.mxu1 %v4278_v59  ;;  %v324_v59 = vpack.c.bf16 %v236_v51, %v236_v51 }
 0x107   :  { %3953 = vmatpush3.bf16.msra.mxu0 %v4277_v58  ;;  %v3432_v58 = vld [vmem:[#allocation7] ss:$0 sm:$0xff] }
 0x108   :  { %3954 = vmatprep.subr.bf16.mxu0 %v4280_v61  ;;  %v325_v61 = vpack.c.bf16 %v238_v55, %v238_v55  ;;  %v4352_v55 = vld [vmem:[#allocation5 + $0x830] sm:$0xff]  }
 0x109   :  { %3975 = vmatpush3.bf16.msra.mxu1 %v4279_v60  ;;  %v4322_v60 = vld [vmem:[#allocation5 + $0x770] sm:$0xff]  }
 0x10a   :  { %3976 = vmatprep.subr.bf16.mxu1 %v4282_v63 }
 0x10b   :  { %3955 = vmatpush3.bf16.msra.mxu0 %v4281_v62  ;;  %v4321_v62 = vld [vmem:[#allocation5 + $0x7b8] sm:$0xff]  }
 0x10c   :  { %3984 = vmatprep.subr.bf16.mxu0 %v4284_v4 }
 0x10d   :  { %3977 = vmatpush3.bf16.msra.mxu1 %v4283_v2 }
 0x10e   :  { %2920 = vmatmul.mubr.bf16.vlgmr.msra.gmra.mxu0 %v318_v8  ;;  %4006 = vmatprep.subr.bf16.mxu1 %v4287_v9  ;;  %v4325_v9 = vld [vmem:[#allocation5 + $0x7b0] sm:$0xff]  }
 0x10f   :  { %3985 = vmatpush3.bf16.msra.mxu0 %v4286_v7  ;;  %2999 = vmatprep.mubr.bf16.mxu0 %v323_v54 }
 0x110   :  { %2960 = vmatmul.mubr.bf16.vlgmr.msra.gmra.mxu1 %v320_v13  ;;  %3986 = vmatprep.subr.bf16.mxu0 %v4289_v14  ;;  %v4327_v14 = vld [vmem:[#allocation5 + $0x728] sm:$0xff]  }
 0x111   :  { %4007 = vmatpush3.bf16.msra.mxu1 %v4288_v12  ;;  %3039 = vmatprep.mubr.bf16.mxu1 %v325_v61 }
 0x112   :  { %4008 = vmatprep.subr.bf16.mxu1 %v4291_v17  ;;  %v4329_v17 = vld [vmem:[#allocation5 + $0x7a8] sm:$0xff]  }
 0x113   :  { %3987 = vmatpush3.bf16.msra.mxu0 %v4290_v16 }
 0x114   :  { %3988 = vmatprep.subr.bf16.mxu0 %v4293_v19  ;;  %v4331_v19 = vld [vmem:[#allocation5 + $0x720] sm:$0xff]  }
 0x115   :  { %4009 = vmatpush3.bf16.msra.mxu1 %v4292_v18  ;;  %v4332_v18 = vld [vmem:[#allocation5 + $0x7e0] sm:$0xff]  }
 0x116   :  { %4010 = vmatprep.subr.bf16.mxu1 %v4295_v21  ;;  %v4333_v21 = vld [vmem:[#allocation5 + $0x7a0] sm:$0xff]  }
 0x117   :  { %3989 = vmatpush3.bf16.msra.mxu0 %v4294_v20  ;;  %v4334_v20 = vld [vmem:[#allocation5 + $0x758] sm:$0xff]  }
 0x118   :  { %3990 = vmatprep.subr.bf16.mxu0 %v4297_v24  ;;  %v4335_v24 = vld [vmem:[#allocation5 + $0x718] sm:$0xff]  }
 0x119   :  { %4011 = vmatpush3.bf16.msra.mxu1 %v4296_v22  ;;  %v4336_v22 = vld [vmem:[#allocation5 + $0x7d8] sm:$0xff]  }
 0x11a   :  { %4012 = vmatprep.subr.bf16.mxu1 %v4299_v26  ;;  %v4337_v26 = vld [vmem:[#allocation5 + $0x798] sm:$0xff]  }
 0x11b   :  { %3991 = vmatpush3.bf16.msra.mxu0 %v4298_v25  ;;  %v4338_v25 = vld [vmem:[#allocation5 + $0x750] sm:$0xff]  }
 0x11c   :  { %3992 = vmatprep.subr.bf16.mxu0 %v4301_v28  ;;  %v4339_v28 = vld [vmem:[#allocation5 + $0x710] sm:$0xff]  }
 0x11d   :  { %4013 = vmatpush3.bf16.msra.mxu1 %v4300_v27  ;;  %v4340_v27 = vld [vmem:[#allocation5 + $0x7d0] sm:$0xff]  }
 0x11e   :  { %4014 = vmatprep.subr.bf16.mxu1 %v4303_v31  ;;  %v4341_v31 = vld [vmem:[#allocation5 + $0x790] sm:$0xff]  }
 0x11f   :  { %3993 = vmatpush3.bf16.msra.mxu0 %v4302_v30  ;;  %v4342_v30 = vld [vmem:[#allocation5 + $0x748] sm:$0xff]  }
 0x120   :  { %3994 = vmatprep.subr.bf16.mxu0 %v4305_v33  ;;  %v4343_v33 = vld [vmem:[#allocation5 + $0x708] sm:$0xff]  }
 0x121   :  { %4015 = vmatpush3.bf16.msra.mxu1 %v4304_v32  ;;  %v4344_v32 = vld [vmem:[#allocation5 + $0x7c8] sm:$0xff]  }
 0x122   :  { %4016 = vmatprep.subr.bf16.mxu1 %v4307_v36  ;;  %v4345_v36 = vld [vmem:[#allocation5 + $0x788] sm:$0xff]  }
 0x123   :  { %3995 = vmatpush3.bf16.msra.mxu0 %v4306_v35  ;;  %v4346_v35 = vld [vmem:[#allocation5 + $0x740] sm:$0xff]  }
 0x124   :  { %3996 = vmatprep.subr.bf16.mxu0 %v4309_v38  ;;  %v109_v38 = vld [vmem:[#allocation2 + $0x38] sm:$0xff] }
 0x125   :  { %4017 = vmatpush3.bf16.msra.mxu1 %v4308_v37  ;;  %v4348_v37 = vld [vmem:[#allocation5 + $0x7c0] sm:$0xff]  }
 0x126   :  { %4018 = vmatprep.subr.bf16.mxu1 %v4311_v40  ;;  %v246_v40 = vrot.slane %v109_v38, %v4640_v34 }
 0x127   :  { %3997 = vmatpush3.bf16.msra.mxu0 %v4310_v39  ;;  %v4347_v39 = vld [vmem:[#allocation5 + $0x700] sm:$0xff]  }
 0x128   :  { %3998 = vmatprep.subr.bf16.mxu0 %v4313_v42  ;;  %v254_v42 = vcombine.high %v246_v40, %v246_v40  ;;  %v326_v45 = vpack.c.bf16 %v246_v40, %v246_v40 }
 0x129   :  { %4019 = vmatpush3.bf16.msra.mxu1 %v4312_v41  ;;  %v239_v41 = vcombine.high %v109_v38, %v109_v38 }
 0x12a   :  { %4020 = vmatprep.subr.bf16.mxu1 %v4315_v44  ;;  %v327_v46 = vpack.c.bf16 %v254_v42, %v254_v42  ;;  %v4365_v42 = vld [vmem:[#allocation8 + $0x74] ss:$8 sps:$4 sm:$0xff]  }
 0x12b   :  { %3999 = vmatpush3.bf16.msra.mxu0 %v4314_v43  ;;  %v4349_v43 = vld [vmem:[#allocation5 + $0x780] sm:$0xff]   ;;  %v253_v44 = vrot.slane %v239_v41, %v4640_v34  ;;  %v4363_v41 = vld [vmem:[#allocation8 + $0x70] ss:$8 sps:$4 sm:$0xff]  }
 0x12c   :  { %4028 = vmatprep.subr.bf16.mxu0 %v4317_v49 }
 0x12d   :  { %4021 = vmatpush3.bf16.msra.mxu1 %v4316_v47  ;;  %v255_v47 = vcombine.high %v253_v44, %v253_v44  ;;  %v328_v51 = vpack.c.bf16 %v253_v44, %v253_v44  ;;  %v4368_v44 = vld [vmem:[#allocation8 + $0x64] ss:$8 sps:$4 sm:$0xff]  }
 0x12e   :  { %v3736_v57 = vpop.f32.mrf.mxu0  ;;  %4050 = vmatprep.subr.bf16.mxu1 %v4320_v53  ;;  %3000 = vmatmul.mubr.bf16.vlgmr.msra.gmra.mxu0 %v322_v52 }
 0x12f   :  { %4029 = vmatpush3.bf16.msra.mxu0 %v4319_v56  ;;  %3079 = vmatprep.mubr.bf16.mxu0 %v327_v46  ;;  %v329_v52 = vpack.c.bf16 %v255_v47, %v255_v47  ;;  %v4371_v46 = vld [vmem:[#allocation8 + $0x54] ss:$8 sps:$4 sm:$0xff]   ;;  %v4369_v47 = vld [vmem:[#allocation8 + $0x50] ss:$8 sps:$4 sm:$0xff]  }
 0x130   :  { %v3737_v63 = vpop.f32.mrf.mxu0  ;;  %v3758_v0 = vpop.f32.mrf.mxu1  ;;  %3040 = vmatmul.mubr.bf16.vlgmr.msra.gmra.mxu1 %v324_v59  ;;  %4030 = vmatprep.subr.bf16.mxu0 %v4322_v60 }
 0x131   :  { %v3738_v2 = vadd.f32 %v3737_v63, %v3736_v57  ;;  %4051 = vmatpush3.bf16.msra.mxu1 %v4321_v62  ;;  %3119 = vmatprep.mubr.bf16.mxu1 %v329_v52  ;;  %v4353_v63 = vld [vmem:[#allocation5 + $0x828] sm:$0xff]  }
 0x132   :  { %v3739_v4 = vpop.f32.mrf.mxu0  ;;  %v3759_v5 = vpop.f32.mrf.mxu1  ;;  %4052 = vmatprep.subr.bf16.mxu1 %v4324_v1  ;;  %v3431_v1 = vld.sshfl [vmem:[#allocation2 + $0x40] sm:$0x33 pattern:$0x76325410]  ;;  %v4380_v52 = vld [vmem:[#allocation8 + $0x24] ss:$8 sps:$4 sm:$0xff]  }
 0x133   :  { %v2522_v7 = vadd.f32 %v3738_v2, %v3432_v58  ;;  %v3760_v8 = vadd.f32 %v3759_v5, %v3758_v0  ;;  %4031 = vmatpush3.bf16.msra.mxu0 %v4323_v3  ;;  %v4354_v2 = vld [vmem:[#allocation5 + $0x820] sm:$0xff]   ;;  %v263_v3 = vcombine.high %v3431_v1, %v3431_v1  ;;  %v4355_v5 = vld [vmem:[#allocation5 + $0x818] sm:$0xff]  }
 0x134   :  { %v3740_v10 = vpop.f32.mrf.mxu0  ;;  %v3761_v12 = vpop.f32.mrf.mxu1  ;;  %4032 = vmatprep.subr.bf16.mxu0 %v4326_v6  ;;  %v4356_v6 = vld [vmem:[#allocation5 + $0x810] sm:$0xff]  }
 0x135   :  { %v4656_v13 = vadd.f32 %v3760_v8, %v2522_v7  ;;  %4053 = vmatpush3.bf16.msra.mxu1 %v4325_v9  ;;  %v331_v4 = vpack.c.bf16 %v263_v3, %v263_v3  ;;  %v4357_v7 = vld [vmem:[#allocation5 + $0x808] sm:$0xff]   ;;  %v4358_v8 = vld [vmem:[#allocation5 + $0x800] sm:$0xff]   ;;  %v4359_v9 = vld [vmem:[#allocation5 + $0x858] ss:$0 sps:$4 sm:$0x77]  }
 0x136   :  { %v3762_v16 = vpop.f32.mrf.mxu1  ;;  %4054 = vmatprep.subr.bf16.mxu1 %v4328_v11  ;;  %v2485_v11 = vsel %vm2483_vm1, %v4359_v9, 0  ;;  %v4386_v3 = vld [vmem:[#allocation8 + $0x4] ss:$8 sps:$4 sm:$0xff]  }
 0x137   :  { %4033 = vmatpush3.bf16.msra.mxu0 %v4327_v14 }
 0x138   :  { %4034 = vmatprep.subr.bf16.mxu0 %v4330_v15  ;;  %v4360_v15 = vld [vmem:[#allocation5 + $0x850] sm:$0xff]  }
 0x139   :  { %4055 = vmatpush3.bf16.msra.mxu1 %v4329_v17 }
 0x13a   :  { %4056 = vmatprep.subr.bf16.mxu1 %v4332_v18 }
 0x13b   :  { %4035 = vmatpush3.bf16.msra.mxu0 %v4331_v19 }
 0x13c   :  { %4036 = vmatprep.subr.bf16.mxu0 %v4334_v20 }
 0x13d   :  { %4057 = vmatpush3.bf16.msra.mxu1 %v4333_v21 }
 0x13e   :  { %4058 = vmatprep.subr.bf16.mxu1 %v4336_v22 }
 0x13f   :  { %4037 = vmatpush3.bf16.msra.mxu0 %v4335_v24  ;;  %v4361_v24 = vld [vmem:[#allocation5 + $0x848] sm:$0xff]  }
 0x140   :  { %4038 = vmatprep.subr.bf16.mxu0 %v4338_v25 }
 0x141   :  { %4059 = vmatpush3.bf16.msra.mxu1 %v4337_v26  ;;  %v4362_v26 = vld [vmem:[#allocation5 + $0x840] sm:$0xff]  }
 0x142   :  { %4060 = vmatprep.subr.bf16.mxu1 %v4340_v27  ;;  %v330_v27 = vpack.c.bf16 %v3431_v1, %v3431_v1 }
 0x143   :  { %4039 = vmatpush3.bf16.msra.mxu0 %v4339_v28 }
 0x144   :  { %4040 = vmatprep.subr.bf16.mxu0 %v4342_v30 }
 0x145   :  { %4061 = vmatpush3.bf16.msra.mxu1 %v4341_v31 }
 0x146   :  { %4062 = vmatprep.subr.bf16.mxu1 %v4344_v32 }
 0x147   :  { %4041 = vmatpush3.bf16.msra.mxu0 %v4343_v33 }
 0x148   :  { %4042 = vmatprep.subr.bf16.mxu0 %v4346_v35 }
 0x149   :  { %4063 = vmatpush3.bf16.msra.mxu1 %v4345_v36 }
 0x14a   :  { %4064 = vmatprep.subr.bf16.mxu1 %v4348_v37 }
 0x14b   :  { %4043 = vmatpush3.bf16.msra.mxu0 %v4347_v39 }
 0x14c   :  { %3127 = vmatprep.subr.bf16.mxu0 %v4574_v50 }
 0x14d   :  { %4065 = vmatpush3.bf16.msra.mxu1 %v4349_v43 }
 0x14e   :  { %v3780_v49 = vpop.f32.mrf.mxu0  ;;  %3080 = vmatmul.mubr.bf16.vlgmr.msra.gmra.mxu0 %v326_v45  ;;  %3277 = vmatprep.subr.bf16.mxu1 %v4365_v42  ;;  %v4366_v45 = vld [vmem:[#allocation8 + $0x60] ss:$8 sps:$4 sm:$0xff]  }
 0x14f   :  { %3128 = vmatpush1.bf16.msra.mxu0 %v4351_v48  ;;  %3701 = vmatprep.mubr.msk.bf16.mxu0 %vm2479_vm0, %v331_v4  ;;  %v4374_v48 = vld [vmem:[#allocation8 + $0x44] ss:$8 sps:$4 sm:$0xff]   ;;  %v4384_v4 = vld [vmem:[#allocation8] ss:$8 sps:$4 sm:$0xff]  }
 0x150   :  { %v3781_v53 = vpop.f32.mrf.mxu0  ;;  %v3802_v54 = vpop.f32.mrf.mxu1  ;;  %3120 = vmatmul.mubr.bf16.vlgmr.msra.gmra.mxu1 %v328_v51  ;;  %3129 = vmatprep.subr.bf16.mxu0 %v4574_v50  ;;  %v4375_v51 = vld [vmem:[#allocation8 + $0x30] ss:$8 sps:$4 sm:$0xff]  }
 0x151   :  { %v3782_v34 = vadd.f32 %v3781_v53, %v3780_v49  ;;  %3309 = vmatprep.mubr.bf16.mxu1 %v4574_v50  ;;  %3278 = vmatpush1.bf16.msra.mxu1 %v4363_v41  ;;  %v4372_v49 = vld [vmem:[#allocation8 + $0x40] ss:$8 sps:$4 sm:$0xff]  }
 0x152   :  { %v3783_v56 = vpop.f32.mrf.mxu0  ;;  %v3803_v57 = vpop.f32.mrf.mxu1  ;;  %3279 = vmatprep.subr.bf16.mxu1 %v4368_v44  ;;  %v4378_v53 = vld [vmem:[#allocation8 + $0x20] ss:$8 sps:$4 sm:$0xff]  }
 0x153   :  { %v2602_v58 = vadd.f32 %v3782_v34, %v4656_v13  ;;  %v3804_v59 = vadd.f32 %v3803_v57, %v3802_v54  ;;  %3130 = vmatpush1.bf16.msra.mxu0 %v4352_v55  ;;  %v4383_v54 = vld [vmem:[#allocation8 + $0x14] ss:$8 sps:$4 sm:$0xff]   ;;  %v4381_v34 = vld [vmem:[#allocation8 + $0x10] ss:$8 sps:$4 sm:$0xff]  }
 0x154   :  { %v3784_v60 = vpop.f32.mrf.mxu0  ;;  %v3805_v61 = vpop.f32.mrf.mxu1  ;;  %3131 = vmatprep.subr.bf16.mxu0 %v4574_v50 }
 0x155   :  { %v2642_v62 = vadd.f32 %v3804_v59, %v2602_v58  ;;  %3280 = vmatpush1.bf16.msra.mxu1 %v4366_v45 }
 0x156   :  { %v3806_v0 = vpop.f32.mrf.mxu1  ;;  %3281 = vmatprep.subr.bf16.mxu1 %v4371_v46 }
 0x157   :  { %3132 = vmatpush1.bf16.msra.mxu0 %v4353_v63 }
 0x158   :  { %3133 = vmatprep.subr.bf16.mxu0 %v4574_v50 }
 0x159   :  { %3282 = vmatpush1.bf16.msra.mxu1 %v4369_v47 }
 0x15a   :  { %3283 = vmatprep.subr.bf16.mxu1 %v4374_v48 }
 0x15b   :  { %3134 = vmatpush1.bf16.msra.mxu0 %v4354_v2 }
 0x15c   :  { %3135 = vmatprep.subr.bf16.mxu0 %v4574_v50 }
 0x15d   :  { %3284 = vmatpush1.bf16.msra.mxu1 %v4372_v49 }
 0x15f   :  { %3136 = vmatpush1.bf16.msra.mxu0 %v4355_v5 }
 0x160   :  { %3137 = vmatprep.subr.bf16.mxu0 %v4574_v50 }
 0x163   :  { %3138 = vmatpush1.bf16.msra.mxu0 %v4356_v6 }
 0x164   :  { %3139 = vmatprep.subr.bf16.mxu0 %v4574_v50 }
 0x167   :  { %3140 = vmatpush1.bf16.msra.mxu0 %v4357_v7 }
 0x168   :  { %3141 = vmatprep.subr.bf16.mxu0 %v4574_v50 }
 0x16b   :  { %3142 = vmatpush1.bf16.msra.mxu0 %v4358_v8 }
 0x16c   :  { %3151 = vmatprep.subr.bf16.mxu0 %v4574_v50 }
 0x16e   :  { %v3824_v10 = vpop.f32.mrf.mxu0 }
 0x16f   :  { %3152 = vmatpush2.bf16.msra.mxu0 %v2485_v11 }
 0x170   :  { %v3825_v12 = vpop.f32.mrf.mxu0  ;;  %v3846_v13 = vpop.f32.mrf.mxu1  ;;  %3153 = vmatprep.subr.bf16.mxu0 %v4574_v50 }
 0x171   :  { %v3826_v14 = vadd.f32 %v3825_v12, %v3824_v10 }
 0x172   :  { %v3827_v16 = vpop.f32.mrf.mxu0  ;;  %v3847_v17 = vpop.f32.mrf.mxu1 }
 0x173   :  { %v2682_v18 = vadd.f32 %v3826_v14, %v2642_v62  ;;  %v3848_v19 = vadd.f32 %v3847_v17, %v3846_v13  ;;  %3154 = vmatpush2.bf16.msra.mxu0 %v4360_v15 }
 0x174   :  { %v3828_v20 = vpop.f32.mrf.mxu0  ;;  %v3849_v21 = vpop.f32.mrf.mxu1  ;;  %3155 = vmatprep.subr.bf16.mxu0 %v4574_v50 }
 0x175   :  { %v2722_v22 = vadd.f32 %v3848_v19, %v2682_v18 }
 0x176   :  { %v3850_v25 = vpop.f32.mrf.mxu1 }
 0x177   :  { %3156 = vmatpush2.bf16.msra.mxu0 %v4361_v24 }
 0x178   :  { %3157 = vmatprep.subr.bf16.mxu0 %v4574_v50  ;;  %v4377_v50 = vld [vmem:[#allocation8 + $0x34] ss:$8 sps:$4 sm:$0xff]  }
 0x179   :  { %3285 = vmatprep.subr.bf16.mxu1 %v4377_v50 }
 0x17a   :  { %3286 = vmatpush1.bf16.msra.mxu1 %v4375_v51  ;;  %v3318_v51 = vld [vmem:[#allocation11] sm:$0x3] }
 0x17b   :  { %3158 = vmatpush2.bf16.msra.mxu0 %v4362_v26  ;;  %3287 = vmatprep.subr.bf16.mxu1 %v4380_v52  ;;  %v3189_v52 = vsub.s32 0, %v4637_v29 }
 0x17e   :  { %3160 = vmatmul.mubr.bf16.vlgmr.msra.gmra.mxu0 %v330_v27  ;;  %3288 = vmatpush1.bf16.msra.mxu1 %v4378_v53  ;;  %v3193_v53 = vsub.s32 1, %v4637_v29 }
 0x17f   :  { %3289 = vmatprep.subr.bf16.mxu1 %v4383_v54  ;;  %v3185_v54 = vld [vmem:[#allocation10] sm:$0x3] }
 0x182   :  { %3290 = vmatpush1.bf16.msra.mxu1 %v4381_v34  ;;  %v3319_v34 = vunpack.c.0.s8 %v3318_v51 }
 0x183   :  { %3291 = vmatprep.subr.bf16.mxu1 %v4386_v3 }
 0x186   :  { %3292 = vmatpush1.bf16.msra.mxu1 %v4384_v4 }
 0x18e   :  { %v3868_v28 = vpop.f32.mrf.mxu0 }
 0x190   :  { %v3869_v30 = vpop.f32.mrf.mxu0  ;;  %v3890_v31 = vpop.f32.mrf.mxu1 }
 0x191   :  { %v3870_v32 = vadd.f32 %v3869_v30, %v3868_v28 }
 0x192   :  { %v3871_v33 = vpop.f32.mrf.mxu0  ;;  %v3891_v35 = vpop.f32.mrf.mxu1 }
 0x193   :  { %v2762_v36 = vadd.f32 %v3870_v32, %v2722_v22  ;;  %v3892_v37 = vadd.f32 %v3891_v35, %v3890_v31 }
 0x194   :  { %v3872_v38 = vpop.f32.mrf.mxu0  ;;  %v3893_v39 = vpop.f32.mrf.mxu1 }
 0x195   :  { %v2802_v40 = vadd.f32 %v3892_v37, %v2762_v36 }
 0x196   :  { %v3894_v43 = vpop.f32.mrf.mxu1 }
 0x1ae   :  { %v3912_v55 = vpop.f32.mrf.mxu0 }
 0x1b0   :  { %v3913_v56 = vpop.f32.mrf.mxu0  ;;  %v3934_v57 = vpop.f32.mrf.mxu1 }
 0x1b1   :  { %v3914_v58 = vadd.f32 %v3913_v56, %v3912_v55  ;;  %v3190_v55 = vrot.slane %v3185_v54, %v3189_v52  ;;  %v3194_v56 = vrot.slane %v3185_v54, %v3193_v53 }
 0x1b2   :  { %v3915_v59 = vpop.f32.mrf.mxu0  ;;  %v3935_v60 = vpop.f32.mrf.mxu1 }
 0x1b3   :  { %v2842_v61 = vadd.f32 %v3914_v58, %v2802_v40  ;;  %v3936_v62 = vadd.f32 %v3935_v60, %v3934_v57  ;;  %v3320_v58 = vcvt.s32.f32 %v3319_v34  ;;  %v3381_v59 = vand.u32 127, %v124_v23 }
 0x1b4   :  { %v3916_v63 = vpop.f32.mrf.mxu0  ;;  %v3937_v0 = vpop.f32.mrf.mxu1  ;;  %v4575_v23 = vmov 839922192  }
 0x1b5   :  { %v2882_v1 = vadd.f32 %v3936_v62, %v2842_v61  ;;  %vm3321_vm2 = vcmp.gt.f32.partialorder %v3320_v58, 0.0  ;;  %vm3383_vm3 = vcmp.eq.s32.totalorder %v3381_v59, 0 }
 0x1b6   :  { %v3938_v2 = vpop.f32.mrf.mxu1 }
 0x1ce   :  { %v3956_v5 = vpop.f32.mrf.mxu0 }
 0x1d0   :  { %v3957_v6 = vpop.f32.mrf.mxu0  ;;  %v3978_v7 = vpop.f32.mrf.mxu1 }
 0x1d1   :  { %v3958_v8 = vadd.f32 %v3957_v6, %v3956_v5 }
 0x1d2   :  { %v3959_v9 = vpop.f32.mrf.mxu0  ;;  %v3979_v10 = vpop.f32.mrf.mxu1 }
 0x1d3   :  { %v2922_v11 = vadd.f32 %v3958_v8, %v2882_v1  ;;  %v3980_v12 = vadd.f32 %v3979_v10, %v3978_v7  ;;  %v3338_v9 = vunpack.c.l.s4 %v4575_v23 }
 0x1d4   :  { %v3960_v13 = vpop.f32.mrf.mxu0  ;;  %v3981_v14 = vpop.f32.mrf.mxu1 }
 0x1d5   :  { %v2962_v15 = vadd.f32 %v3980_v12, %v2922_v11  ;;  %v3339_v10 = vunpack.c.0.s8 %v3338_v9 }
 0x1d6   :  { %v3982_v16 = vpop.f32.mrf.mxu1 }
 0x1d7   :  { %v3342_v11 = vsub.s32 %v3339_v10, %v4637_v29 }
 0x1ee   :  { %v4000_v17 = vpop.f32.mrf.mxu0 }
 0x1f0   :  { %v4001_v18 = vpop.f32.mrf.mxu0  ;;  %v4022_v19 = vpop.f32.mrf.mxu1 }
 0x1f1   :  { %v4002_v20 = vadd.f32 %v4001_v18, %v4000_v17 }
 0x1f2   :  { %v4003_v21 = vpop.f32.mrf.mxu0  ;;  %v4023_v22 = vpop.f32.mrf.mxu1 }
 0x1f3   :  { %v3002_v24 = vadd.f32 %v4002_v20, %v2962_v15  ;;  %v4024_v25 = vadd.f32 %v4023_v22, %v4022_v19 }
 0x1f4   :  { %v4004_v26 = vpop.f32.mrf.mxu0  ;;  %v4025_v27 = vpop.f32.mrf.mxu1 }
 0x1f5   :  { %v3042_v28 = vadd.f32 %v4024_v25, %v3002_v24 }
 0x1f6   :  { %v4026_v30 = vpop.f32.mrf.mxu1 }
 0x20e   :  { %v4044_v31 = vpop.f32.mrf.mxu0 }
 0x210   :  { %v4045_v32 = vpop.f32.mrf.mxu0  ;;  %v4066_v33 = vpop.f32.mrf.mxu1 }
 0x211   :  { %v4046_v40 = vadd.f32 %v4045_v32, %v4044_v31 }
 0x212   :  { %v4047_v35 = vpop.f32.mrf.mxu0  ;;  %v4067_v36 = vpop.f32.mrf.mxu1 }
 0x213   :  { %v3082_v41 = vadd.f32 %v4046_v40, %v3042_v28  ;;  %v4068_v42 = vadd.f32 %v4067_v36, %v4066_v33 }
 0x214   :  { %v4048_v37 = vpop.f32.mrf.mxu0  ;;  %v4069_v38 = vpop.f32.mrf.mxu1 }
 0x215   :  { %v3122_v43 = vadd.f32 %v4068_v42, %v3082_v41 }
 0x216   :  { %v4070_v39 = vpop.f32.mrf.mxu1 }
 0x23e   :  { %v3161_v44 = vpop.f32.mrf.mxu0 }
 0x23f   :  { %v3162_v45 = vadd.f32 %v3161_v44, %v3122_v43 }
 0x240   :  { %v3163_v46 = vpop.f32.mrf.mxu0 }
 0x241   :  { %v3167_v47 = vmax.f32 %v3162_v45, 0.0 }
 0x242   :  { %v3164_v48 = vpop.f32.mrf.mxu0 }
 0x243   :  { %v3168_v49 = vpack.c.bf16 %v3167_v47, %v3167_v47 }
 0x244   :  { %v3165_v50 = vpop.f32.mrf.mxu0 }
 0x245   :  { %3310 = vmatmul.mubr.bf16.vlgmr.msra.gmra.mxu1 %v3168_v49 }
 0x305   :  { %v3311_v57 = vpop.f32.mrf.mxu1 }
 0x306   :  { %v3312_v61 = vadd.f32 %v3311_v57, %v3190_v55 }
 0x307   :  { %v3313_v60 = vpop.f32.mrf.mxu1 }
 0x308   :  { %v3314_v62 = vadd.f32 %v3313_v60, %v3194_v56 }
 0x309   :  { %v3315_v63 = vpop.f32.mrf.mxu1 }
 0x30a   :  { %v3324_v0 = vcombine.low %v3312_v61, %v3314_v62 }
 0x30b   :  { %v3316_v1 = vpop.f32.mrf.mxu1 }
 0x30c   :  { %v3326_v2 = vsel %vm3321_vm2, %v3324_v0, -inf }
 0x30d   :  { %v3328_v3 = vcombine.high %v3326_v2, %v3326_v2  ;;  %v3385_v4 = vsel %vm3383_vm3, %v3312_v61, %v3326_v2  ;;  %v3331_v5 = vsel %vm3330_vm4, %v3326_v2, -inf }
 0x30f   :  { %v3332_v6 = vsel %vm3330_vm4, %v3328_v3, -inf  ;;  %v3389_v7 = vcombine.low %v3385_v4, %v3328_v3 }
 0x310   :  { %v3333_v8 = vmax.f32 %v3331_v5, %v3332_v6 }
 0x311   :  { %3719 = vst.sshfl [vmem:[#allocation13] sm:$0x33 pattern:$0x76325410] %v3389_v7 }
 0x312   :  { %3334 = vmax.xlane.f32.xlu0 %v3333_v8 }
 0x39b   :  { %v3335_v12 = vpop.xlane.xlu0 %3334 }
 0x39c   :  { %v3343_v13 = vrot.slane %v3335_v12, %v3342_v11 }
 0x39e   :  { %v3345_v14 = vsub.f32 %v3326_v2, %v3343_v13 }
 0x3a0   :  { %v3346_v15 = vmul.f32 1.442695, %v3345_v14 }
 0x3a2   :  { %4387 = vpow2.f32 %v3346_v15 }
 0x3af   :  { %v4388_v16 = vpop.eup %4387 }
 0x3b0   :  { %v3349_v17 = vcombine.high %v4388_v16, %v4388_v16  ;;  %v3351_v18 = vsel %vm3330_vm4, %v4388_v16, 0.0 }
 0x3b2   :  { %v3352_v19 = vsel %vm3330_vm4, %v3349_v17, 0.0 }
 0x3b3   :  { %v3353_v20 = vadd.f32 %v3352_v19, %v3351_v18 }
 0x3b5   :  { %3354 = vadd.xlane.f32.xlu0 %v3353_v20 }
 0x3b6   :  { %4522 = shalt.err (!%p4519_p6)
}
 0x3b7   :  { %3408 = dma.vmem_to_hbm [thread:$0]  %s3406_s5, 64, %s4694_s6, [#allocation4]  }
 0x3b8   :  { %s4577_s12 = smov [#allocation14]  }
 0x3b9   :  { %s3415_s13 = sshll.u32 %s4577_s12, 4  ;;  %s3416_s13 = int_to_ptr.vmem [resolvable:$true] %s3415_s13 }
 0x3ba   :  { %s4531_s14 = scalar_lea.vmem %s3416_s13, 64  ;;  %p4536_p8 = scmp.lt.s32.totalorder %s3416_s13, %s3416_s13 }
 0x3bb   :  { %p4532_p7 = scmp.ne.s32.totalorder %s3416_s13, %s4531_s14  ;;  %p4537_p9 = scmp.lt.s32.totalorder %s4531_s14, %s4531_s14 }
 0x3bd   :  { %p4538_p10 = por %p4537_p9, %p4536_p8 }
 0x3bf   :  { %p4539_p11 = pnand %p4538_p10, %p4532_p7 }
 0x43e   :  { %v3355_v29 = vpop.xlane.xlu0 %3354 }
 0x43f   :  { %4389 = vrcp.f32 %v3355_v29 }
 0x44c   :  { %v4390_v21 = vpop.eup %4389 }
 0x44d   :  { %v3357_v22 = vmul.f32 %v4390_v21, %v3355_v29 }
 0x44f   :  { %v3358_v24 = vsub.f32 2.0, %v3357_v22 }
 0x451   :  { %v3359_v25 = vmul.f32 %v4390_v21, %v3358_v24 }
 0x453   :  { %v3367_v26 = vrot.slane %v3359_v25, %v3342_v11 }
 0x455   :  { %v3369_v27 = vmul.f32 %v4388_v16, %v3367_v26 }
 0x457   :  { %3718 = vst.sshfl [vmem:[#allocation14] sm:$0x33 pattern:$0x76325410] %v3369_v27 }
 0x458   :  { %4542 = shalt.err (!%p4539_p11)
}
 0x459   :  { %3418 = dma.vmem_to_hbm [thread:$0]  %s3416_s13, 64, %s4695_s7, [#allocation15]  }
 0x45a   :  { %4559 = dma.done.wait [#allocation4], 64  }
 0x45b   :  { %4560 = vsyncadd [#allocation4], 4294967232 }
 0x45c   :  { %4561 = dma.done.wait [#allocation15], 64  }
 0x45d   :  { %4562 = vsyncadd [#allocation15], 4294967232 }
 0x45e   :  { %3425 = vsyncpa [#allocation3], 1 }
 0x45f   :  { %3426 = vsyncpa [#allocation6], 1 }
 0x460   :  { %3427 = vsyncpa [#allocation9], 1 }
 0x461   :  { %3428 = vsyncpa [#allocation12], 1 }
 0x462   :  { %3429 = vsyncpa [#allocation4], 1 }
 0x463   :  { %3430 = vsyncpa [#allocation15], 1 }

// kernel: tpu_custom_call.1
= control target key start
LH: loop header
LB: loop body
LE: loop exit
PB: predicated region body
PF: predicated region fallthrough
CT: control target
= control target key end

     0   :  { %13 = vsyncpa [#allocation3], 0  ;;  %s4688_s0 = inlined_call_operand.hbm [shape: f32[2,4278], index: 0, kind: input, shape index: {}]   ;;  %s4689_s1 = inlined_call_operand.hbm [shape: bf16[4278,128], index: 1, kind: input, shape index: {}]   ;;  %s4690_s2 = inlined_call_operand.hbm [shape: f32[1,128], index: 2, kind: input, shape index: {}]   ;;  %s4691_s3 = inlined_call_operand.hbm [shape: bf16[128,256], index: 3, kind: input, shape index: {}]   ;;  %s4692_s4 = inlined_call_operand.hbm [shape: f32[1,256], index: 4, kind: input, shape index: {}]   ;;  %s4693_s5 = inlined_call_operand.hbm [shape: s8[2,256], index: 5, kind: input, shape index: {}]   ;;  %s4694_s6 = inlined_call_operand.hbm [shape: f32[2,256], index: 6, kind: output, shape index: {0}]   ;;  %s4695_s7 = inlined_call_operand.hbm [shape: f32[2,256], index: 7, kind: output, shape index: {1}]  }
   0x1   :  { %14 = vsyncpa [#allocation6], 0 }
   0x2   :  { %15 = vsyncpa [#allocation9], 0 }
   0x3   :  { %16 = vsyncpa [#allocation12], 0 }
   0x4   :  { %17 = vsyncpa [#allocation4], 0 }
   0x5   :  { %18 = vsyncpa [#allocation15], 0  ;;  %s4563_s24 = smov [#allocation5]  }
   0x6   :  { %s34_s25 = sshll.u32 %s4563_s24, 4  ;;  %s35_s25 = int_to_ptr.vmem [resolvable:$true] %s34_s25 }
   0x7   :  { %s4399_s26 = scalar_lea.vmem %s35_s25, 34240  ;;  %p4404_p1 = scmp.lt.s32.totalorder %s35_s25, %s35_s25 }
   0x8   :  { %p4400_p0 = scmp.ne.s32.totalorder %s35_s25, %s4399_s26  ;;  %p4405_p2 = scmp.lt.s32.totalorder %s4399_s26, %s4399_s26 }
   0xa   :  { %p4406_p3 = por %p4405_p2, %p4404_p1 }
   0xc   :  { %p4407_p4 = pnand %p4406_p3, %p4400_p0 }
   0xe   :  { %4410 = shalt.err (!%p4407_p4)
}
   0xf   :  { %s4564_s27 = smov 64   ;;  %s4565_s28 = smov 4  }
  0x10   :  { %40 = dma.hbm_to_vmem [thread:$0]  %s4689_s1, 34240, %s35_s25, [#allocation6], %s4564_s27, %s4564_s27, %s4565_s28  }
  0x11   :  { %s4566_s8 = smov [#allocation8]  }
  0x12   :  { %s56_s9 = sshll.u32 %s4566_s8, 4  ;;  %s57_s9 = int_to_ptr.vmem [resolvable:$true] %s56_s9 }
  0x13   :  { %s4419_s10 = scalar_lea.vmem %s57_s9, 2048  ;;  %p4424_p6 = scmp.lt.s32.totalorder %s57_s9, %s57_s9 }
  0x14   :  { %p4420_p5 = scmp.ne.s32.totalorder %s57_s9, %s4419_s10  ;;  %p4425_p7 = scmp.lt.s32.totalorder %s4419_s10, %s4419_s10 }
  0x16   :  { %p4426_p8 = por %p4425_p7, %p4424_p6 }
  0x18   :  { %p4427_p9 = pnand %p4426_p8, %p4420_p5 }
  0x1a   :  { %4430 = shalt.err (!%p4427_p9)
}
  0x1b   :  { %s4567_s11 = smov 128   ;;  %s4568_s12 = smov 8  }
  0x1c   :  { %62 = dma.hbm_to_vmem [thread:$0]  %s4691_s3, 2048, %s57_s9, [#allocation9], %s4567_s11, %s4567_s11, %s4568_s12  }
  0x1d   :  { %s4569_s15 = smov [#allocation2]   ;;  %s4570_s17 = smov [#allocation7]  }
  0x1e   :  { %s25_s16 = sshll.u32 %s4569_s15, 4  ;;  %s47_s1 = sshll.u32 %s4570_s17, 4  ;;  %s26_s16 = int_to_ptr.vmem [resolvable:$true] %s25_s16  ;;  %s48_s1 = int_to_ptr.vmem [resolvable:$true] %s47_s1 }
  0x1f   :  { %s4439_s18 = scalar_lea.vmem %s26_s16, 1088  ;;  %p4444_p11 = scmp.lt.s32.totalorder %s26_s16, %s26_s16 }
  0x20   :  { %p4440_p10 = scmp.ne.s32.totalorder %s26_s16, %s4439_s18  ;;  %p4445_p12 = scmp.lt.s32.totalorder %s4439_s18, %s4439_s18 }
  0x22   :  { %p4446_p13 = por %p4445_p12, %p4444_p11 }
  0x24   :  { %p4447_p0 = pnand %p4446_p13, %p4440_p10 }
  0x26   :  { %4450 = shalt.err (!%p4447_p0)
}
  0x27   :  { %28 = dma.hbm_to_vmem [thread:$0]  %s4688_s0, 1088, %s26_s16, [#allocation3]  }
  0x28   :  { %s4459_s21 = scalar_lea.vmem %s48_s1, 16  ;;  %s4463_s3 = scalar_lea.vmem %s48_s1, 32 }
  0x29   :  { %p4460_p1 = scmp.ne.s32.totalorder %s48_s1, %s4459_s21  ;;  %p4464_p2 = scmp.lt.s32.totalorder %s48_s1, %s48_s1 }
  0x2a   :  { %p4465_p3 = scmp.lt.s32.totalorder %s4463_s3, %s4459_s21 }
  0x2c   :  { %p4466_p4 = por %p4465_p3, %p4464_p2 }
  0x2e   :  { %p4467_p5 = pnand %p4466_p4, %p4460_p1 }
  0x30   :  { %4470 = shalt.err (!%p4467_p5)
}
  0x31   :  { %50 = dma.hbm_to_vmem [thread:$0]  %s4690_s2, 16, %s48_s1, [#allocation6]  }
  0x32   :  { %s4571_s24 = smov [#allocation10]   ;;  %s4572_s26 = smov [#allocation11]  }
  0x33   :  { %s69_s25 = sshll.u32 %s4571_s24, 4  ;;  %s79_s27 = sshll.u32 %s4572_s26, 4  ;;  %s70_s25 = int_to_ptr.vmem [resolvable:$true] %s69_s25  ;;  %s80_s27 = int_to_ptr.vmem [resolvable:$true] %s79_s27 }
  0x34   :  { %s4479_s28 = scalar_lea.vmem %s70_s25, 32  ;;  %p4484_p7 = scmp.lt.s32.totalorder %s70_s25, %s70_s25 }
  0x35   :  { %p4480_p6 = scmp.ne.s32.totalorder %s70_s25, %s4479_s28  ;;  %p4485_p8 = scmp.lt.s32.totalorder %s4479_s28, %s4479_s28 }
  0x37   :  { %p4486_p9 = por %p4485_p8, %p4484_p7 }
  0x39   :  { %p4487_p10 = pnand %p4486_p9, %p4480_p6 }
  0x3b   :  { %4490 = shalt.err (!%p4487_p10)
}
  0x3c   :  { %72 = dma.hbm_to_vmem [thread:$0]  %s4692_s4, 32, %s70_s25, [#allocation9]  }
  0x3d   :  { %s4499_s30 = scalar_lea.vmem %s80_s27, 32  ;;  %p4504_p12 = scmp.lt.s32.totalorder %s80_s27, %s80_s27 }
  0x3e   :  { %p4500_p11 = scmp.ne.s32.totalorder %s80_s27, %s4499_s30  ;;  %p4505_p13 = scmp.lt.s32.totalorder %s4499_s30, %s4499_s30 }
  0x40   :  { %p4506_p0 = por %p4505_p13, %p4504_p12 }
  0x42   :  { %p4507_p1 = pnand %p4506_p0, %p4500_p11 }
  0x44   :  { %4510 = shalt.err (!%p4507_p1)
}
  0x45   :  { %82 = dma.hbm_to_vmem [thread:$0]  %s4693_s5, 32, %s80_s27, [#allocation12]  }
  0x46   :  { %4551 = dma.done.wait [#allocation3], 1088  }
  0x47   :  { %4552 = vsyncadd [#allocation3], 4294966208 }
  0x48   :  { %4553 = dma.done.wait [#allocation6], 34256  }
  0x49   :  { %4554 = vsyncadd [#allocation6], 4294933040 }
  0x4a   :  { %4555 = dma.done.wait [#allocation9], 2080  }
  0x4b   :  { %4556 = vsyncadd [#allocation9], 4294965216 }
  0x4c   :  { %4557 = dma.done.wait [#allocation12], 32  }
  0x4d   :  { %4558 = vsyncadd [#allocation12], 4294967264  ;;  %v4087_v0 = vld [vmem:[#allocation5 + $0x78] sm:$0xff]   ;;  %v4091_v4 = vld [vmem:[#allocation5 + $0x70] sm:$0xff]   ;;  %v4573_v21 = vmov 1983009808   ;;  %v124_v23 = vlaneseq }
  0x4e   :  { %v4088_v1 = vld [vmem:[#allocation5 + $0x38] sm:$0xff]   ;;  %3720 = vmatprep.subr.bf16.mxu0 %v4087_v0  ;;  %v4092_v5 = vld [vmem:[#allocation5 + $0x30] sm:$0xff]   ;;  %v4095_v8 = vld [vmem:[#allocation5 + $0x68] sm:$0xff]   ;;  %v122_v22 = vunpack.c.l.s4 %v4573_v21  ;;  %vm2479_vm0 = vcmask 441344   ;;  %vm2483_vm1 = vcmask 1042432   ;;  %vm3330_vm4 = vcmask 1041408  }
  0x4f   :  { %v4089_v2 = vld [vmem:[#allocation5 + $0xf8] sm:$0xff]   ;;  %3721 = vmatpush3.bf16.msra.mxu0 %v4088_v1  ;;  %v4093_v6 = vld [vmem:[#allocation5 + $0xf0] sm:$0xff]   ;;  %v4096_v9 = vld [vmem:[#allocation5 + $0x28] sm:$0xff]   ;;  %v4637_v29 = vshrl.u32 %v124_v23, 7  ;;  %s4576_s4 = smov [#allocation13]  }
  0x50   :  { %v4090_v3 = vld [vmem:[#allocation5 + $0xb8] sm:$0xff]   ;;  %3742 = vmatprep.subr.bf16.mxu1 %v4089_v2  ;;  %3722 = vmatprep.subr.bf16.mxu0 %v4091_v4  ;;  %v4094_v7 = vld [vmem:[#allocation5 + $0xb0] sm:$0xff]   ;;  %v4097_v10 = vld [vmem:[#allocation5 + $0xe8] sm:$0xff]   ;;  %v123_v28 = vunpack.c.0.s8 %v122_v22  ;;  %s3405_s5 = sshll.u32 %s4576_s4, 4  ;;  %s3406_s5 = int_to_ptr.vmem [resolvable:$true] %s3405_s5 }
  0x51   :  { %3743 = vmatpush3.bf16.msra.mxu1 %v4090_v3  ;;  %v4098_v11 = vld [vmem:[#allocation5 + $0xa8] sm:$0xff]   ;;  %v4099_v12 = vld [vmem:[#allocation5 + $0x60] sm:$0xff]   ;;  %v4103_v16 = vld [vmem:[#allocation5 + $0x58] sm:$0xff]   ;;  %s4511_s9 = scalar_lea.vmem %s3406_s5, 64  ;;  %p4516_p3 = scmp.lt.s32.totalorder %s3406_s5, %s3406_s5 }
  0x52   :  { %3744 = vmatprep.subr.bf16.mxu1 %v4093_v6  ;;  %v4100_v13 = vld [vmem:[#allocation5 + $0x20] sm:$0xff]   ;;  %v4104_v17 = vld [vmem:[#allocation5 + $0x18] sm:$0xff]   ;;  %v4107_v20 = vld [vmem:[#allocation5 + $0x50] sm:$0xff]   ;;  %v4640_v34 = vsub.s32 %v123_v28, %v4637_v29  ;;  %p4512_p2 = scmp.ne.s32.totalorder %s3406_s5, %s4511_s9  ;;  %p4517_p4 = scmp.lt.s32.totalorder %s4511_s9, %s4511_s9 }
  0x53   :  { %3723 = vmatpush3.bf16.msra.mxu0 %v4092_v5  ;;  %v4101_v14 = vld [vmem:[#allocation5 + $0xe0] sm:$0xff]   ;;  %v4105_v18 = vld [vmem:[#allocation5 + $0xd8] sm:$0xff]   ;;  %v4108_v24 = vld [vmem:[#allocation5 + $0x10] sm:$0xff]  }
  0x54   :  { %3724 = vmatprep.subr.bf16.mxu0 %v4095_v8  ;;  %v4102_v15 = vld [vmem:[#allocation5 + $0xa0] sm:$0xff]   ;;  %v4106_v19 = vld [vmem:[#allocation5 + $0x98] sm:$0xff]   ;;  %v4109_v25 = vld [vmem:[#allocation5 + $0xd0] sm:$0xff]   ;;  %p4518_p5 = por %p4517_p4, %p4516_p3 }
  0x55   :  { %3745 = vmatpush3.bf16.msra.mxu1 %v4094_v7  ;;  %v4110_v26 = vld [vmem:[#allocation5 + $0x90] sm:$0xff]   ;;  %v4111_v27 = vld [vmem:[#allocation5 + $0x48] sm:$0xff]   ;;  %v4115_v33 = vld [vmem:[#allocation5 + $0x40] sm:$0xff]  }
  0x56   :  { %3746 = vmatprep.subr.bf16.mxu1 %v4097_v10  ;;  %v4112_v30 = vld [vmem:[#allocation5 + $0x8] sm:$0xff]   ;;  %v4116_v35 = vld [vmem:[#allocation5] sm:$0xff]   ;;  %v4119_v41 = vld [vmem:[#allocation5 + $0x178] sm:$0xff]   ;;  %p4519_p6 = pnand %p4518_p5, %p4512_p2 }
  0x57   :  { %3725 = vmatpush3.bf16.msra.mxu0 %v4096_v9  ;;  %v4113_v31 = vld [vmem:[#allocation5 + $0xc8] sm:$0xff]   ;;  %v4117_v36 = vld [vmem:[#allocation5 + $0xc0] sm:$0xff]   ;;  %v4121_v44 = vld [vmem:[#allocation5 + $0x138] sm:$0xff]  }
  0x58   :  { %3726 = vmatprep.subr.bf16.mxu0 %v4099_v12  ;;  %v4114_v32 = vld [vmem:[#allocation5 + $0x88] sm:$0xff]   ;;  %v102_v37 = vld [vmem:[#allocation2] sm:$0xff]  ;;  %v4124_v51 = vld [vmem:[#allocation5 + $0x170] sm:$0xff]  }
  0x59   :  { %3747 = vmatpush3.bf16.msra.mxu1 %v4098_v11  ;;  %v127_v38 = vrot.slane %v102_v37, %v4640_v34  ;;  %v4118_v39 = vld [vmem:[#allocation5 + $0x80] sm:$0xff]   ;;  %v120_v40 = vcombine.high %v102_v37, %v102_v37  ;;  %v4122_v46 = vld [vmem:[#allocation5 + $0x1f8] sm:$0xff]   ;;  %v4125_v53 = vld [vmem:[#allocation5 + $0x130] sm:$0xff]  }
  0x5a   :  { %3748 = vmatprep.subr.bf16.mxu1 %v4101_v14  ;;  %v4123_v49 = vld [vmem:[#allocation5 + $0x1b8] sm:$0xff]   ;;  %v4126_v54 = vld [vmem:[#allocation5 + $0x1f0] sm:$0xff]   ;;  %v4128_v56 = vld [vmem:[#allocation5 + $0x168] sm:$0xff]  }
  0x5b   :  { %3727 = vmatpush3.bf16.msra.mxu0 %v4100_v13  ;;  %v135_v42 = vcombine.high %v127_v38, %v127_v38  ;;  %v134_v43 = vrot.slane %v120_v40, %v4640_v34  ;;  %v298_v45 = vpack.c.bf16 %v127_v38, %v127_v38  ;;  %v4127_v55 = vld [vmem:[#allocation5 + $0x1b0] sm:$0xff]   ;;  %v4129_v57 = vld [vmem:[#allocation5 + $0x128] sm:$0xff]   ;;  %v4132_v60 = vld [vmem:[#allocation5 + $0x160] sm:$0xff]  }
  0x5c   :  { %3728 = vmatprep.subr.bf16.mxu0 %v4103_v16  ;;  %v4130_v58 = vld [vmem:[#allocation5 + $0x1e8] sm:$0xff]   ;;  %v4133_v61 = vld [vmem:[#allocation5 + $0x120] sm:$0xff]   ;;  %v4136_v0 = vld [vmem:[#allocation5 + $0x158] sm:$0xff]  }
  0x5d   :  { %3749 = vmatpush3.bf16.msra.mxu1 %v4102_v15  ;;  %v299_v47 = vpack.c.bf16 %v135_v42, %v135_v42  ;;  %v136_v48 = vcombine.high %v134_v43, %v134_v43  ;;  %v300_v50 = vpack.c.bf16 %v134_v43, %v134_v43  ;;  %v4131_v59 = vld [vmem:[#allocation5 + $0x1a8] sm:$0xff]   ;;  %v4134_v62 = vld [vmem:[#allocation5 + $0x1e0] sm:$0xff]   ;;  %v4137_v1 = vld [vmem:[#allocation5 + $0x118] sm:$0xff]  }
  0x5e   :  { %3750 = vmatprep.subr.bf16.mxu1 %v4105_v18  ;;  %v4135_v63 = vld [vmem:[#allocation5 + $0x1a0] sm:$0xff]   ;;  %v4138_v2 = vld [vmem:[#allocation5 + $0x1d8] sm:$0xff]   ;;  %v4140_v4 = vld [vmem:[#allocation5 + $0x150] sm:$0xff]  }
  0x5f   :  { %3729 = vmatpush3.bf16.msra.mxu0 %v4104_v17  ;;  %2519 = vmatprep.mubr.bf16.mxu0 %v299_v47  ;;  %v301_v52 = vpack.c.bf16 %v136_v48, %v136_v48  ;;  %v4139_v3 = vld [vmem:[#allocation5 + $0x198] sm:$0xff]   ;;  %v4141_v5 = vld [vmem:[#allocation5 + $0x110] sm:$0xff]   ;;  %v4144_v8 = vld [vmem:[#allocation5 + $0x148] sm:$0xff]  }
  0x60   :  { %3730 = vmatprep.subr.bf16.mxu0 %v4107_v20  ;;  %v4142_v6 = vld [vmem:[#allocation5 + $0x1d0] sm:$0xff]   ;;  %v4145_v9 = vld [vmem:[#allocation5 + $0x108] sm:$0xff]   ;;  %v4148_v12 = vld [vmem:[#allocation5 + $0x140] sm:$0xff]  }
  0x61   :  { %3751 = vmatpush3.bf16.msra.mxu1 %v4106_v19  ;;  %2559 = vmatprep.mubr.bf16.mxu1 %v301_v52  ;;  %v4143_v7 = vld [vmem:[#allocation5 + $0x190] sm:$0xff]   ;;  %v4146_v10 = vld [vmem:[#allocation5 + $0x1c8] sm:$0xff]   ;;  %v4149_v13 = vld [vmem:[#allocation5 + $0x100] sm:$0xff]  }
  0x62   :  { %3752 = vmatprep.subr.bf16.mxu1 %v4109_v25  ;;  %v4147_v11 = vld [vmem:[#allocation5 + $0x188] sm:$0xff]   ;;  %v4150_v14 = vld [vmem:[#allocation5 + $0x1c0] sm:$0xff]   ;;  %v4152_v19 = vld [vmem:[#allocation5 + $0x278] sm:$0xff]  }
  0x63   :  { %3731 = vmatpush3.bf16.msra.mxu0 %v4108_v24  ;;  %v103_v15 = vld [vmem:[#allocation2 + $0x8] sm:$0xff]  ;;  %v4154_v22 = vld [vmem:[#allocation5 + $0x238] sm:$0xff]   ;;  %v4176_v52 = vld [vmem:[#allocation5 + $0x290] sm:$0xff]  }
  0x64   :  { %3732 = vmatprep.subr.bf16.mxu0 %v4111_v27  ;;  %v144_v16 = vrot.slane %v103_v15, %v4640_v34  ;;  %v4151_v17 = vld [vmem:[#allocation5 + $0x180] sm:$0xff]   ;;  %v137_v18 = vcombine.high %v103_v15, %v103_v15  ;;  %v4155_v25 = vld [vmem:[#allocation5 + $0x2f8] sm:$0xff]   ;;  %v4161_v37 = vld [vmem:[#allocation5 + $0x268] sm:$0xff]  }
  0x65   :  { %3753 = vmatpush3.bf16.msra.mxu1 %v4110_v26  ;;  %v4156_v28 = vld [vmem:[#allocation5 + $0x2b8] sm:$0xff]   ;;  %v4162_v38 = vld [vmem:[#allocation5 + $0x228] sm:$0xff]   ;;  %v4166_v42 = vld [vmem:[#allocation5 + $0x220] sm:$0xff]  }
  0x66   :  { %3754 = vmatprep.subr.bf16.mxu1 %v4113_v31  ;;  %v152_v20 = vcombine.high %v144_v16, %v144_v16  ;;  %v151_v21 = vrot.slane %v137_v18, %v4640_v34  ;;  %v302_v24 = vpack.c.bf16 %v144_v16, %v144_v16  ;;  %v4157_v31 = vld [vmem:[#allocation5 + $0x270] sm:$0xff]   ;;  %v4164_v40 = vld [vmem:[#allocation5 + $0x2a8] sm:$0xff]   ;;  %v4167_v43 = vld [vmem:[#allocation5 + $0x2e0] sm:$0xff]  }
  0x67   :  { %3733 = vmatpush3.bf16.msra.mxu0 %v4112_v30  ;;  %v4171_v47 = vld [vmem:[#allocation5 + $0x2d8] sm:$0xff]   ;;  %v4194_v15 = vld [vmem:[#allocation5 + $0x368] sm:$0xff]  }
  0x68   :  { %3734 = vmatprep.subr.bf16.mxu0 %v4115_v33  ;;  %v303_v26 = vpack.c.bf16 %v152_v20, %v152_v20  ;;  %v153_v27 = vcombine.high %v151_v21, %v151_v21  ;;  %v304_v30 = vpack.c.bf16 %v151_v21, %v151_v21  ;;  %v4158_v33 = vld [vmem:[#allocation5 + $0x230] sm:$0xff]   ;;  %v4172_v48 = vld [vmem:[#allocation5 + $0x298] sm:$0xff]   ;;  %v4195_v16 = vld [vmem:[#allocation5 + $0x328] sm:$0xff]  }
  0x69   :  { %3755 = vmatpush3.bf16.msra.mxu1 %v4114_v32  ;;  %v4197_v18 = vld [vmem:[#allocation5 + $0x3a8] sm:$0xff]   ;;  %v4199_v20 = vld [vmem:[#allocation5 + $0x320] sm:$0xff]  }
  0x6a   :  { %3756 = vmatprep.subr.bf16.mxu1 %v4117_v36  ;;  %v305_v32 = vpack.c.bf16 %v153_v27, %v153_v27  ;;  %v4160_v36 = vld [vmem:[#allocation5 + $0x2b0] sm:$0xff]   ;;  %v4200_v21 = vld [vmem:[#allocation5 + $0x3e0] sm:$0xff]   ;;  %v4205_v27 = vld [vmem:[#allocation5 + $0x398] sm:$0xff]  }
  0x6b   :  { %3735 = vmatpush3.bf16.msra.mxu0 %v4116_v35  ;;  %v4159_v35 = vld [vmem:[#allocation5 + $0x2f0] sm:$0xff]  }
  0x6c   :  { %3764 = vmatprep.subr.bf16.mxu0 %v4119_v41  ;;  %v4165_v41 = vld [vmem:[#allocation5 + $0x260] sm:$0xff]  }
  0x6d   :  { %3757 = vmatpush3.bf16.msra.mxu1 %v4118_v39  ;;  %v4163_v39 = vld [vmem:[#allocation5 + $0x2e8] sm:$0xff]  }
  0x6e   :  { %3786 = vmatprep.subr.bf16.mxu1 %v4122_v46  ;;  %2520 = vmatmul.mubr.bf16.vlgmr.msra.gmra.mxu0 %v298_v45  ;;  %v4169_v45 = vld [vmem:[#allocation5 + $0x258] sm:$0xff]  }
  0x6f   :  { %3765 = vmatpush3.bf16.msra.mxu0 %v4121_v44  ;;  %2599 = vmatprep.mubr.bf16.mxu0 %v303_v26  ;;  %v4168_v44 = vld [vmem:[#allocation5 + $0x2a0] sm:$0xff]   ;;  %v4170_v46 = vld [vmem:[#allocation5 + $0x218] sm:$0xff]  }
  0x70   :  { %2560 = vmatmul.mubr.bf16.vlgmr.msra.gmra.mxu1 %v300_v50  ;;  %3766 = vmatprep.subr.bf16.mxu0 %v4124_v51  ;;  %v4174_v50 = vld [vmem:[#allocation5 + $0x210] sm:$0xff]   ;;  %v4204_v26 = vld [vmem:[#allocation5 + $0x3d8] sm:$0xff]  }
  0x71   :  { %3787 = vmatpush3.bf16.msra.mxu1 %v4123_v49  ;;  %2639 = vmatprep.mubr.bf16.mxu1 %v305_v32  ;;  %v4173_v49 = vld [vmem:[#allocation5 + $0x250] sm:$0xff]  }
  0x72   :  { %3788 = vmatprep.subr.bf16.mxu1 %v4126_v54  ;;  %v4175_v51 = vld [vmem:[#allocation5 + $0x2d0] sm:$0xff]   ;;  %v4178_v54 = vld [vmem:[#allocation5 + $0x208] sm:$0xff]  }
  0x73   :  { %3767 = vmatpush3.bf16.msra.mxu0 %v4125_v53  ;;  %v4177_v53 = vld [vmem:[#allocation5 + $0x248] sm:$0xff]   ;;  %v4209_v32 = vld [vmem:[#allocation5 + $0x390] sm:$0xff]  }
  0x74   :  { %3768 = vmatprep.subr.bf16.mxu0 %v4128_v56  ;;  %v4180_v56 = vld [vmem:[#allocation5 + $0x288] sm:$0xff]  }
  0x75   :  { %3789 = vmatpush3.bf16.msra.mxu1 %v4127_v55  ;;  %v4179_v55 = vld [vmem:[#allocation5 + $0x2c8] sm:$0xff]  }
  0x76   :  { %3790 = vmatprep.subr.bf16.mxu1 %v4130_v58  ;;  %v4182_v58 = vld [vmem:[#allocation5 + $0x200] sm:$0xff]  }
  0x77   :  { %3769 = vmatpush3.bf16.msra.mxu0 %v4129_v57  ;;  %v4181_v57 = vld [vmem:[#allocation5 + $0x240] sm:$0xff]  }
  0x78   :  { %3770 = vmatprep.subr.bf16.mxu0 %v4132_v60  ;;  %v104_v60 = vld [vmem:[#allocation2 + $0x10] sm:$0xff] }
  0x79   :  { %3791 = vmatpush3.bf16.msra.mxu1 %v4131_v59  ;;  %v4183_v59 = vld [vmem:[#allocation5 + $0x2c0] sm:$0xff]  }
  0x7a   :  { %3792 = vmatprep.subr.bf16.mxu1 %v4134_v62  ;;  %v4184_v62 = vld [vmem:[#allocation5 + $0x280] sm:$0xff]  }
  0x7b   :  { %3771 = vmatpush3.bf16.msra.mxu0 %v4133_v61  ;;  %v161_v61 = vrot.slane %v104_v60, %v4640_v34 }
  0x7c   :  { %3772 = vmatprep.subr.bf16.mxu0 %v4136_v0  ;;  %v4185_v0 = vld [vmem:[#allocation5 + $0x378] sm:$0xff]  }
  0x7d   :  { %3793 = vmatpush3.bf16.msra.mxu1 %v4135_v63  ;;  %v154_v63 = vcombine.high %v104_v60, %v104_v60  ;;  %v4227_v60 = vld [vmem:[#allocation5 + $0x468] sm:$0xff]  }
  0x7e   :  { %3794 = vmatprep.subr.bf16.mxu1 %v4138_v2 }
  0x7f   :  { %3773 = vmatpush3.bf16.msra.mxu0 %v4137_v1  ;;  %v169_v1 = vcombine.high %v161_v61, %v161_v61  ;;  %v168_v2 = vrot.slane %v154_v63, %v4640_v34  ;;  %v4230_v63 = vld [vmem:[#allocation5 + $0x4a8] sm:$0xff]  }
  0x80   :  { %3774 = vmatprep.subr.bf16.mxu0 %v4140_v4  ;;  %v306_v4 = vpack.c.bf16 %v161_v61, %v161_v61  ;;  %v4228_v61 = vld [vmem:[#allocation5 + $0x428] sm:$0xff]  }
  0x81   :  { %3795 = vmatpush3.bf16.msra.mxu1 %v4139_v3  ;;  %v4187_v3 = vld [vmem:[#allocation5 + $0x338] sm:$0xff]  }
  0x82   :  { %3796 = vmatprep.subr.bf16.mxu1 %v4142_v6  ;;  %v307_v6 = vpack.c.bf16 %v169_v1, %v169_v1  ;;  %v4232_v1 = vld [vmem:[#allocation5 + $0x420] sm:$0xff]  }
  0x83   :  { %3775 = vmatpush3.bf16.msra.mxu0 %v4141_v5  ;;  %v4188_v5 = vld [vmem:[#allocation5 + $0x3f8] sm:$0xff]  }
  0x84   :  { %3776 = vmatprep.subr.bf16.mxu0 %v4144_v8  ;;  %v4189_v8 = vld [vmem:[#allocation5 + $0x3b8] sm:$0xff]  }
  0x85   :  { %3797 = vmatpush3.bf16.msra.mxu1 %v4143_v7  ;;  %v170_v7 = vcombine.high %v168_v2, %v168_v2 }
  0x86   :  { %3798 = vmatprep.subr.bf16.mxu1 %v4146_v10  ;;  %v4190_v10 = vld [vmem:[#allocation5 + $0x370] sm:$0xff]  }
  0x87   :  { %3777 = vmatpush3.bf16.msra.mxu0 %v4145_v9  ;;  %v308_v9 = vpack.c.bf16 %v168_v2, %v168_v2  ;;  %v4233_v2 = vld [vmem:[#allocation5 + $0x4e0] sm:$0xff]  }
  0x88   :  { %3778 = vmatprep.subr.bf16.mxu0 %v4148_v12  ;;  %v4191_v12 = vld [vmem:[#allocation5 + $0x330] sm:$0xff]  }
  0x89   :  { %3799 = vmatpush3.bf16.msra.mxu1 %v4147_v11  ;;  %v309_v11 = vpack.c.bf16 %v170_v7, %v170_v7  ;;  %v4238_v7 = vld [vmem:[#allocation5 + $0x498] sm:$0xff]  }
  0x8a   :  { %3800 = vmatprep.subr.bf16.mxu1 %v4150_v14  ;;  %v4193_v14 = vld [vmem:[#allocation5 + $0x3b0] sm:$0xff]  }
  0x8b   :  { %3779 = vmatpush3.bf16.msra.mxu0 %v4149_v13  ;;  %v4192_v13 = vld [vmem:[#allocation5 + $0x3f0] sm:$0xff]  }
  0x8c   :  { %3808 = vmatprep.subr.bf16.mxu0 %v4152_v19  ;;  %v4198_v19 = vld [vmem:[#allocation5 + $0x360] sm:$0xff]  }
  0x8d   :  { %3801 = vmatpush3.bf16.msra.mxu1 %v4151_v17  ;;  %v4196_v17 = vld [vmem:[#allocation5 + $0x3e8] sm:$0xff]  }
  0x8e   :  { %2600 = vmatmul.mubr.bf16.vlgmr.msra.gmra.mxu0 %v302_v24  ;;  %3830 = vmatprep.subr.bf16.mxu1 %v4155_v25  ;;  %v4202_v24 = vld [vmem:[#allocation5 + $0x358] sm:$0xff]  }
  0x8f   :  { %3809 = vmatpush3.bf16.msra.mxu0 %v4154_v22  ;;  %2679 = vmatprep.mubr.bf16.mxu0 %v307_v6  ;;  %v4201_v22 = vld [vmem:[#allocation5 + $0x3a0] sm:$0xff]   ;;  %v4203_v25 = vld [vmem:[#allocation5 + $0x318] sm:$0xff]  }
  0x90   :  { %2640 = vmatmul.mubr.bf16.vlgmr.msra.gmra.mxu1 %v304_v30  ;;  %3810 = vmatprep.subr.bf16.mxu0 %v4157_v31  ;;  %v4207_v30 = vld [vmem:[#allocation5 + $0x310] sm:$0xff]   ;;  %v4237_v6 = vld [vmem:[#allocation5 + $0x4d8] sm:$0xff]  }
  0x91   :  { %3831 = vmatpush3.bf16.msra.mxu1 %v4156_v28  ;;  %2719 = vmatprep.mubr.bf16.mxu1 %v309_v11  ;;  %v4206_v28 = vld [vmem:[#allocation5 + $0x350] sm:$0xff]  }
  0x92   :  { %3832 = vmatprep.subr.bf16.mxu1 %v4159_v35  ;;  %v4208_v31 = vld [vmem:[#allocation5 + $0x3d0] sm:$0xff]   ;;  %v4211_v35 = vld [vmem:[#allocation5 + $0x308] sm:$0xff]  }
  0x93   :  { %3811 = vmatpush3.bf16.msra.mxu0 %v4158_v33  ;;  %v4210_v33 = vld [vmem:[#allocation5 + $0x348] sm:$0xff]   ;;  %v4242_v11 = vld [vmem:[#allocation5 + $0x490] sm:$0xff]  }
  0x94   :  { %3812 = vmatprep.subr.bf16.mxu0 %v4161_v37  ;;  %v4213_v37 = vld [vmem:[#allocation5 + $0x388] sm:$0xff]  }
  0x95   :  { %3833 = vmatpush3.bf16.msra.mxu1 %v4160_v36  ;;  %v4212_v36 = vld [vmem:[#allocation5 + $0x3c8] sm:$0xff]  }
  0x96   :  { %3834 = vmatprep.subr.bf16.mxu1 %v4163_v39  ;;  %v4215_v39 = vld [vmem:[#allocation5 + $0x300] sm:$0xff]  }
  0x97   :  { %3813 = vmatpush3.bf16.msra.mxu0 %v4162_v38  ;;  %v4214_v38 = vld [vmem:[#allocation5 + $0x340] sm:$0xff]  }
  0x98   :  { %3814 = vmatprep.subr.bf16.mxu0 %v4165_v41  ;;  %v105_v41 = vld [vmem:[#allocation2 + $0x18] sm:$0xff] }
  0x99   :  { %3835 = vmatpush3.bf16.msra.mxu1 %v4164_v40  ;;  %v4216_v40 = vld [vmem:[#allocation5 + $0x3c0] sm:$0xff]  }
  0x9a   :  { %3836 = vmatprep.subr.bf16.mxu1 %v4167_v43  ;;  %v4217_v43 = vld [vmem:[#allocation5 + $0x380] sm:$0xff]  }
  0x9b   :  { %3815 = vmatpush3.bf16.msra.mxu0 %v4166_v42  ;;  %v178_v42 = vrot.slane %v105_v41, %v4640_v34 }
  0x9c   :  { %3816 = vmatprep.subr.bf16.mxu0 %v4169_v45  ;;  %v4218_v45 = vld [vmem:[#allocation5 + $0x478] sm:$0xff]  }
  0x9d   :  { %3837 = vmatpush3.bf16.msra.mxu1 %v4168_v44  ;;  %v171_v44 = vcombine.high %v105_v41, %v105_v41  ;;  %v4260_v41 = vld [vmem:[#allocation5 + $0x568] sm:$0xff]  }
  0x9e   :  { %3838 = vmatprep.subr.bf16.mxu1 %v4171_v47 }
  0x9f   :  { %3817 = vmatpush3.bf16.msra.mxu0 %v4170_v46  ;;  %v186_v46 = vcombine.high %v178_v42, %v178_v42  ;;  %v185_v47 = vrot.slane %v171_v44, %v4640_v34  ;;  %v4263_v44 = vld [vmem:[#allocation5 + $0x5a8] sm:$0xff]  }
  0xa0   :  { %3818 = vmatprep.subr.bf16.mxu0 %v4173_v49  ;;  %v310_v49 = vpack.c.bf16 %v178_v42, %v178_v42  ;;  %v4261_v42 = vld [vmem:[#allocation5 + $0x528] sm:$0xff]  }
  0xa1   :  { %3839 = vmatpush3.bf16.msra.mxu1 %v4172_v48  ;;  %v4220_v48 = vld [vmem:[#allocation5 + $0x438] sm:$0xff]  }
  0xa2   :  { %3840 = vmatprep.subr.bf16.mxu1 %v4175_v51  ;;  %v311_v51 = vpack.c.bf16 %v186_v46, %v186_v46  ;;  %v4265_v46 = vld [vmem:[#allocation5 + $0x520] sm:$0xff]  }
  0xa3   :  { %3819 = vmatpush3.bf16.msra.mxu0 %v4174_v50  ;;  %v4221_v50 = vld [vmem:[#allocation5 + $0x4f8] sm:$0xff]  }
  0xa4   :  { %3820 = vmatprep.subr.bf16.mxu0 %v4177_v53  ;;  %v4222_v53 = vld [vmem:[#allocation5 + $0x4b8] sm:$0xff]  }
  0xa5   :  { %3841 = vmatpush3.bf16.msra.mxu1 %v4176_v52  ;;  %v187_v52 = vcombine.high %v185_v47, %v185_v47 }
  0xa6   :  { %3842 = vmatprep.subr.bf16.mxu1 %v4179_v55  ;;  %v4223_v55 = vld [vmem:[#allocation5 + $0x470] sm:$0xff]  }
  0xa7   :  { %3821 = vmatpush3.bf16.msra.mxu0 %v4178_v54  ;;  %v312_v54 = vpack.c.bf16 %v185_v47, %v185_v47  ;;  %v4266_v47 = vld [vmem:[#allocation5 + $0x5e0] sm:$0xff]  }
  0xa8   :  { %3822 = vmatprep.subr.bf16.mxu0 %v4181_v57  ;;  %v4224_v57 = vld [vmem:[#allocation5 + $0x430] sm:$0xff]  }
  0xa9   :  { %3843 = vmatpush3.bf16.msra.mxu1 %v4180_v56  ;;  %v313_v56 = vpack.c.bf16 %v187_v52, %v187_v52  ;;  %v4271_v52 = vld [vmem:[#allocation5 + $0x598] sm:$0xff]  }
  0xaa   :  { %3844 = vmatprep.subr.bf16.mxu1 %v4183_v59  ;;  %v4226_v59 = vld [vmem:[#allocation5 + $0x4b0] sm:$0xff]  }
  0xab   :  { %3823 = vmatpush3.bf16.msra.mxu0 %v4182_v58  ;;  %v4225_v58 = vld [vmem:[#allocation5 + $0x4f0] sm:$0xff]  }
  0xac   :  { %3852 = vmatprep.subr.bf16.mxu0 %v4185_v0  ;;  %v4231_v0 = vld [vmem:[#allocation5 + $0x460] sm:$0xff]  }
  0xad   :  { %3845 = vmatpush3.bf16.msra.mxu1 %v4184_v62  ;;  %v4229_v62 = vld [vmem:[#allocation5 + $0x4e8] sm:$0xff]  }
  0xae   :  { %2680 = vmatmul.mubr.bf16.vlgmr.msra.gmra.mxu0 %v306_v4  ;;  %3874 = vmatprep.subr.bf16.mxu1 %v4188_v5  ;;  %v4235_v4 = vld [vmem:[#allocation5 + $0x458] sm:$0xff]  }
  0xaf   :  { %3853 = vmatpush3.bf16.msra.mxu0 %v4187_v3  ;;  %2759 = vmatprep.mubr.bf16.mxu0 %v311_v51  ;;  %v4234_v3 = vld [vmem:[#allocation5 + $0x4a0] sm:$0xff]   ;;  %v4236_v5 = vld [vmem:[#allocation5 + $0x418] sm:$0xff]  }
  0xb0   :  { %2720 = vmatmul.mubr.bf16.vlgmr.msra.gmra.mxu1 %v308_v9  ;;  %3854 = vmatprep.subr.bf16.mxu0 %v4190_v10  ;;  %v4240_v9 = vld [vmem:[#allocation5 + $0x410] sm:$0xff]   ;;  %v4270_v51 = vld [vmem:[#allocation5 + $0x5d8] sm:$0xff]  }
  0xb1   :  { %3875 = vmatpush3.bf16.msra.mxu1 %v4189_v8  ;;  %2799 = vmatprep.mubr.bf16.mxu1 %v313_v56  ;;  %v4239_v8 = vld [vmem:[#allocation5 + $0x450] sm:$0xff]  }
  0xb2   :  { %3876 = vmatprep.subr.bf16.mxu1 %v4192_v13  ;;  %v4241_v10 = vld [vmem:[#allocation5 + $0x4d0] sm:$0xff]   ;;  %v4244_v13 = vld [vmem:[#allocation5 + $0x408] sm:$0xff]  }
  0xb3   :  { %3855 = vmatpush3.bf16.msra.mxu0 %v4191_v12  ;;  %v4243_v12 = vld [vmem:[#allocation5 + $0x448] sm:$0xff]   ;;  %v4275_v56 = vld [vmem:[#allocation5 + $0x590] sm:$0xff]  }
  0xb4   :  { %3856 = vmatprep.subr.bf16.mxu0 %v4194_v15  ;;  %v4246_v15 = vld [vmem:[#allocation5 + $0x488] sm:$0xff]  }
  0xb5   :  { %3877 = vmatpush3.bf16.msra.mxu1 %v4193_v14  ;;  %v4245_v14 = vld [vmem:[#allocation5 + $0x4c8] sm:$0xff]  }
  0xb6   :  { %3878 = vmatprep.subr.bf16.mxu1 %v4196_v17  ;;  %v4248_v17 = vld [vmem:[#allocation5 + $0x400] sm:$0xff]  }
  0xb7   :  { %3857 = vmatpush3.bf16.msra.mxu0 %v4195_v16  ;;  %v4247_v16 = vld [vmem:[#allocation5 + $0x440] sm:$0xff]  }
  0xb8   :  { %3858 = vmatprep.subr.bf16.mxu0 %v4198_v19  ;;  %v106_v19 = vld [vmem:[#allocation2 + $0x20] sm:$0xff] }
  0xb9   :  { %3879 = vmatpush3.bf16.msra.mxu1 %v4197_v18  ;;  %v4249_v18 = vld [vmem:[#allocation5 + $0x4c0] sm:$0xff]  }
  0xba   :  { %3880 = vmatprep.subr.bf16.mxu1 %v4200_v21  ;;  %v4250_v21 = vld [vmem:[#allocation5 + $0x480] sm:$0xff]  }
  0xbb   :  { %3859 = vmatpush3.bf16.msra.mxu0 %v4199_v20  ;;  %v195_v20 = vrot.slane %v106_v19, %v4640_v34 }
  0xbc   :  { %3860 = vmatprep.subr.bf16.mxu0 %v4202_v24  ;;  %v4251_v24 = vld [vmem:[#allocation5 + $0x578] sm:$0xff]  }
  0xbd   :  { %3881 = vmatpush3.bf16.msra.mxu1 %v4201_v22  ;;  %v188_v22 = vcombine.high %v106_v19, %v106_v19  ;;  %v4293_v19 = vld [vmem:[#allocation5 + $0x668] sm:$0xff]  }
  0xbe   :  { %3882 = vmatprep.subr.bf16.mxu1 %v4204_v26 }
  0xbf   :  { %3861 = vmatpush3.bf16.msra.mxu0 %v4203_v25  ;;  %v203_v25 = vcombine.high %v195_v20, %v195_v20  ;;  %v202_v26 = vrot.slane %v188_v22, %v4640_v34  ;;  %v4296_v22 = vld [vmem:[#allocation5 + $0x6a8] sm:$0xff]  }
  0xc0   :  { %3862 = vmatprep.subr.bf16.mxu0 %v4206_v28  ;;  %v314_v28 = vpack.c.bf16 %v195_v20, %v195_v20  ;;  %v4294_v20 = vld [vmem:[#allocation5 + $0x628] sm:$0xff]  }
  0xc1   :  { %3883 = vmatpush3.bf16.msra.mxu1 %v4205_v27  ;;  %v4253_v27 = vld [vmem:[#allocation5 + $0x538] sm:$0xff]  }
  0xc2   :  { %3884 = vmatprep.subr.bf16.mxu1 %v4208_v31  ;;  %v315_v31 = vpack.c.bf16 %v203_v25, %v203_v25  ;;  %v4298_v25 = vld [vmem:[#allocation5 + $0x620] sm:$0xff]  }
  0xc3   :  { %3863 = vmatpush3.bf16.msra.mxu0 %v4207_v30  ;;  %v4254_v30 = vld [vmem:[#allocation5 + $0x5f8] sm:$0xff]  }
  0xc4   :  { %3864 = vmatprep.subr.bf16.mxu0 %v4210_v33  ;;  %v4255_v33 = vld [vmem:[#allocation5 + $0x5b8] sm:$0xff]  }
  0xc5   :  { %3885 = vmatpush3.bf16.msra.mxu1 %v4209_v32  ;;  %v204_v32 = vcombine.high %v202_v26, %v202_v26 }
  0xc6   :  { %3886 = vmatprep.subr.bf16.mxu1 %v4212_v36  ;;  %v4256_v36 = vld [vmem:[#allocation5 + $0x570] sm:$0xff]  }
  0xc7   :  { %3865 = vmatpush3.bf16.msra.mxu0 %v4211_v35  ;;  %v316_v35 = vpack.c.bf16 %v202_v26, %v202_v26  ;;  %v4299_v26 = vld [vmem:[#allocation5 + $0x6e0] sm:$0xff]  }
  0xc8   :  { %3866 = vmatprep.subr.bf16.mxu0 %v4214_v38  ;;  %v4257_v38 = vld [vmem:[#allocation5 + $0x530] sm:$0xff]  }
  0xc9   :  { %3887 = vmatpush3.bf16.msra.mxu1 %v4213_v37  ;;  %v317_v37 = vpack.c.bf16 %v204_v32, %v204_v32  ;;  %v4304_v32 = vld [vmem:[#allocation5 + $0x698] sm:$0xff]  }
  0xca   :  { %3888 = vmatprep.subr.bf16.mxu1 %v4216_v40  ;;  %v4259_v40 = vld [vmem:[#allocation5 + $0x5b0] sm:$0xff]  }
  0xcb   :  { %3867 = vmatpush3.bf16.msra.mxu0 %v4215_v39  ;;  %v4258_v39 = vld [vmem:[#allocation5 + $0x5f0] sm:$0xff]  }
  0xcc   :  { %3896 = vmatprep.subr.bf16.mxu0 %v4218_v45  ;;  %v4264_v45 = vld [vmem:[#allocation5 + $0x560] sm:$0xff]  }
  0xcd   :  { %3889 = vmatpush3.bf16.msra.mxu1 %v4217_v43  ;;  %v4262_v43 = vld [vmem:[#allocation5 + $0x5e8] sm:$0xff]  }
  0xce   :  { %3918 = vmatprep.subr.bf16.mxu1 %v4221_v50  ;;  %2760 = vmatmul.mubr.bf16.vlgmr.msra.gmra.mxu0 %v310_v49  ;;  %v4268_v49 = vld [vmem:[#allocation5 + $0x558] sm:$0xff]  }
  0xcf   :  { %3897 = vmatpush3.bf16.msra.mxu0 %v4220_v48  ;;  %2839 = vmatprep.mubr.bf16.mxu0 %v315_v31  ;;  %v4267_v48 = vld [vmem:[#allocation5 + $0x5a0] sm:$0xff]   ;;  %v4269_v50 = vld [vmem:[#allocation5 + $0x518] sm:$0xff]  }
  0xd0   :  { %2800 = vmatmul.mubr.bf16.vlgmr.msra.gmra.mxu1 %v312_v54  ;;  %3898 = vmatprep.subr.bf16.mxu0 %v4223_v55  ;;  %v4273_v54 = vld [vmem:[#allocation5 + $0x510] sm:$0xff]   ;;  %v4303_v31 = vld [vmem:[#allocation5 + $0x6d8] sm:$0xff]  }
  0xd1   :  { %3919 = vmatpush3.bf16.msra.mxu1 %v4222_v53  ;;  %2879 = vmatprep.mubr.bf16.mxu1 %v317_v37  ;;  %v4272_v53 = vld [vmem:[#allocation5 + $0x550] sm:$0xff]  }
  0xd2   :  { %3920 = vmatprep.subr.bf16.mxu1 %v4225_v58  ;;  %v4274_v55 = vld [vmem:[#allocation5 + $0x5d0] sm:$0xff]   ;;  %v4277_v58 = vld [vmem:[#allocation5 + $0x508] sm:$0xff]  }
  0xd3   :  { %3899 = vmatpush3.bf16.msra.mxu0 %v4224_v57  ;;  %v4276_v57 = vld [vmem:[#allocation5 + $0x548] sm:$0xff]   ;;  %v4308_v37 = vld [vmem:[#allocation5 + $0x690] sm:$0xff]  }
  0xd4   :  { %3900 = vmatprep.subr.bf16.mxu0 %v4227_v60  ;;  %v4279_v60 = vld [vmem:[#allocation5 + $0x588] sm:$0xff]  }
  0xd5   :  { %3921 = vmatpush3.bf16.msra.mxu1 %v4226_v59  ;;  %v4278_v59 = vld [vmem:[#allocation5 + $0x5c8] sm:$0xff]  }
  0xd6   :  { %3922 = vmatprep.subr.bf16.mxu1 %v4229_v62  ;;  %v4281_v62 = vld [vmem:[#allocation5 + $0x500] sm:$0xff]  }
  0xd7   :  { %3901 = vmatpush3.bf16.msra.mxu0 %v4228_v61  ;;  %v4280_v61 = vld [vmem:[#allocation5 + $0x540] sm:$0xff]  }
  0xd8   :  { %3902 = vmatprep.subr.bf16.mxu0 %v4231_v0  ;;  %v107_v0 = vld [vmem:[#allocation2 + $0x28] sm:$0xff] }
  0xd9   :  { %3923 = vmatpush3.bf16.msra.mxu1 %v4230_v63  ;;  %v4282_v63 = vld [vmem:[#allocation5 + $0x5c0] sm:$0xff]  }
  0xda   :  { %3924 = vmatprep.subr.bf16.mxu1 %v4233_v2  ;;  %v4283_v2 = vld [vmem:[#allocation5 + $0x580] sm:$0xff]  }
  0xdb   :  { %3903 = vmatpush3.bf16.msra.mxu0 %v4232_v1  ;;  %v212_v1 = vrot.slane %v107_v0, %v4640_v34 }
  0xdc   :  { %3904 = vmatprep.subr.bf16.mxu0 %v4235_v4  ;;  %v4284_v4 = vld [vmem:[#allocation5 + $0x678] sm:$0xff]  }
  0xdd   :  { %3925 = vmatpush3.bf16.msra.mxu1 %v4234_v3  ;;  %v205_v3 = vcombine.high %v107_v0, %v107_v0 }
  0xde   :  { %3926 = vmatprep.subr.bf16.mxu1 %v4237_v6 }
  0xdf   :  { %3905 = vmatpush3.bf16.msra.mxu0 %v4236_v5  ;;  %v220_v5 = vcombine.high %v212_v1, %v212_v1  ;;  %v219_v6 = vrot.slane %v205_v3, %v4640_v34  ;;  %v4323_v3 = vld [vmem:[#allocation5 + $0x730] sm:$0xff]  }
  0xe0   :  { %3906 = vmatprep.subr.bf16.mxu0 %v4239_v8  ;;  %v318_v8 = vpack.c.bf16 %v212_v1, %v212_v1  ;;  %v4324_v1 = vld [vmem:[#allocation5 + $0x7f0] sm:$0xff]  }
  0xe1   :  { %3927 = vmatpush3.bf16.msra.mxu1 %v4238_v7  ;;  %v4286_v7 = vld [vmem:[#allocation5 + $0x638] sm:$0xff]  }
  0xe2   :  { %3928 = vmatprep.subr.bf16.mxu1 %v4241_v10  ;;  %v319_v10 = vpack.c.bf16 %v220_v5, %v220_v5 }
  0xe3   :  { %3907 = vmatpush3.bf16.msra.mxu0 %v4240_v9  ;;  %v4287_v9 = vld [vmem:[#allocation5 + $0x6f8] sm:$0xff]  }
  0xe4   :  { %3908 = vmatprep.subr.bf16.mxu0 %v4243_v12  ;;  %v4288_v12 = vld [vmem:[#allocation5 + $0x6b8] sm:$0xff]  }
  0xe5   :  { %3929 = vmatpush3.bf16.msra.mxu1 %v4242_v11  ;;  %v221_v11 = vcombine.high %v219_v6, %v219_v6 }
  0xe6   :  { %3930 = vmatprep.subr.bf16.mxu1 %v4245_v14  ;;  %v4289_v14 = vld [vmem:[#allocation5 + $0x670] sm:$0xff]  }
  0xe7   :  { %3909 = vmatpush3.bf16.msra.mxu0 %v4244_v13  ;;  %v320_v13 = vpack.c.bf16 %v219_v6, %v219_v6  ;;  %v4326_v6 = vld [vmem:[#allocation5 + $0x768] sm:$0xff]  }
  0xe8   :  { %3910 = vmatprep.subr.bf16.mxu0 %v4247_v16  ;;  %v4290_v16 = vld [vmem:[#allocation5 + $0x630] sm:$0xff]  }
  0xe9   :  { %3931 = vmatpush3.bf16.msra.mxu1 %v4246_v15  ;;  %v321_v15 = vpack.c.bf16 %v221_v11, %v221_v11  ;;  %v4328_v11 = vld [vmem:[#allocation5 + $0x7e8] sm:$0xff]  }
  0xea   :  { %3932 = vmatprep.subr.bf16.mxu1 %v4249_v18  ;;  %v4292_v18 = vld [vmem:[#allocation5 + $0x6b0] sm:$0xff]  }
  0xeb   :  { %3911 = vmatpush3.bf16.msra.mxu0 %v4248_v17  ;;  %v4291_v17 = vld [vmem:[#allocation5 + $0x6f0] sm:$0xff]  }
  0xec   :  { %3940 = vmatprep.subr.bf16.mxu0 %v4251_v24  ;;  %v4297_v24 = vld [vmem:[#allocation5 + $0x660] sm:$0xff]  }
  0xed   :  { %3933 = vmatpush3.bf16.msra.mxu1 %v4250_v21  ;;  %v4295_v21 = vld [vmem:[#allocation5 + $0x6e8] sm:$0xff]  }
  0xee   :  { %2840 = vmatmul.mubr.bf16.vlgmr.msra.gmra.mxu0 %v314_v28  ;;  %3962 = vmatprep.subr.bf16.mxu1 %v4254_v30  ;;  %v4301_v28 = vld [vmem:[#allocation5 + $0x658] sm:$0xff]  }
  0xef   :  { %3941 = vmatpush3.bf16.msra.mxu0 %v4253_v27  ;;  %2919 = vmatprep.mubr.bf16.mxu0 %v319_v10  ;;  %v4300_v27 = vld [vmem:[#allocation5 + $0x6a0] sm:$0xff]   ;;  %v4302_v30 = vld [vmem:[#allocation5 + $0x618] sm:$0xff]  }
  0xf0   :  { %2880 = vmatmul.mubr.bf16.vlgmr.msra.gmra.mxu1 %v316_v35  ;;  %3942 = vmatprep.subr.bf16.mxu0 %v4256_v36  ;;  %v4306_v35 = vld [vmem:[#allocation5 + $0x610] sm:$0xff]  }
  0xf1   :  { %3963 = vmatpush3.bf16.msra.mxu1 %v4255_v33  ;;  %2959 = vmatprep.mubr.bf16.mxu1 %v321_v15  ;;  %v4305_v33 = vld [vmem:[#allocation5 + $0x650] sm:$0xff]   ;;  %v4330_v15 = vld [vmem:[#allocation5 + $0x760] sm:$0xff]  }
  0xf2   :  { %3964 = vmatprep.subr.bf16.mxu1 %v4258_v39  ;;  %v4307_v36 = vld [vmem:[#allocation5 + $0x6d0] sm:$0xff]   ;;  %v4310_v39 = vld [vmem:[#allocation5 + $0x608] sm:$0xff]  }
  0xf3   :  { %3943 = vmatpush3.bf16.msra.mxu0 %v4257_v38  ;;  %v4309_v38 = vld [vmem:[#allocation5 + $0x648] sm:$0xff]  }
  0xf4   :  { %3944 = vmatprep.subr.bf16.mxu0 %v4260_v41  ;;  %v4312_v41 = vld [vmem:[#allocation5 + $0x688] sm:$0xff]  }
  0xf5   :  { %3965 = vmatpush3.bf16.msra.mxu1 %v4259_v40  ;;  %v4311_v40 = vld [vmem:[#allocation5 + $0x6c8] sm:$0xff]  }
  0xf6   :  { %3966 = vmatprep.subr.bf16.mxu1 %v4262_v43  ;;  %v4314_v43 = vld [vmem:[#allocation5 + $0x600] sm:$0xff]  }
  0xf7   :  { %3945 = vmatpush3.bf16.msra.mxu0 %v4261_v42  ;;  %v4313_v42 = vld [vmem:[#allocation5 + $0x640] sm:$0xff]  }
  0xf8   :  { %3946 = vmatprep.subr.bf16.mxu0 %v4264_v45  ;;  %v108_v45 = vld [vmem:[#allocation2 + $0x30] sm:$0xff] }
  0xf9   :  { %3967 = vmatpush3.bf16.msra.mxu1 %v4263_v44  ;;  %v4315_v44 = vld [vmem:[#allocation5 + $0x6c0] sm:$0xff]  }
  0xfa   :  { %3968 = vmatprep.subr.bf16.mxu1 %v4266_v47  ;;  %v4316_v47 = vld [vmem:[#allocation5 + $0x680] sm:$0xff]  }
  0xfb   :  { %3947 = vmatpush3.bf16.msra.mxu0 %v4265_v46  ;;  %v229_v46 = vrot.slane %v108_v45, %v4640_v34 }
  0xfc   :  { %3948 = vmatprep.subr.bf16.mxu0 %v4268_v49  ;;  %v4317_v49 = vld [vmem:[#allocation5 + $0x778] sm:$0xff]  }
  0xfd   :  { %3969 = vmatpush3.bf16.msra.mxu1 %v4267_v48  ;;  %v222_v48 = vcombine.high %v108_v45, %v108_v45 }
  0xfe   :  { %3970 = vmatprep.subr.bf16.mxu1 %v4270_v51 }
  0xff   :  { %3949 = vmatpush3.bf16.msra.mxu0 %v4269_v50  ;;  %v237_v50 = vcombine.high %v229_v46, %v229_v46  ;;  %v236_v51 = vrot.slane %v222_v48, %v4640_v34  ;;  %v4351_v48 = vld [vmem:[#allocation5 + $0x838] sm:$0xff]  }
 0x100   :  { %3950 = vmatprep.subr.bf16.mxu0 %v4272_v53  ;;  %v4320_v53 = vld [vmem:[#allocation5 + $0x7f8] sm:$0xff]  }
 0x101   :  { %3971 = vmatpush3.bf16.msra.mxu1 %v4271_v52  ;;  %v322_v52 = vpack.c.bf16 %v229_v46, %v229_v46 }
 0x102   :  { %3972 = vmatprep.subr.bf16.mxu1 %v4274_v55  ;;  %v238_v55 = vcombine.high %v236_v51, %v236_v51 }
 0x103   :  { %3951 = vmatpush3.bf16.msra.mxu0 %v4273_v54  ;;  %v323_v54 = vpack.c.bf16 %v237_v50, %v237_v50  ;;  %v4574_v50 = vmov 0  }
 0x104   :  { %3952 = vmatprep.subr.bf16.mxu0 %v4276_v57 }
 0x105   :  { %3973 = vmatpush3.bf16.msra.mxu1 %v4275_v56  ;;  %v4319_v56 = vld [vmem:[#allocation5 + $0x738] sm:$0xff]  }
 0x106   :  { %3974 = vmatprep.subr.bf16.mxu1 %v4278_v59  ;;  %v324_v59 = vpack.c.bf16 %v236_v51, %v236_v51 }
 0x107   :  { %3953 = vmatpush3.bf16.msra.mxu0 %v4277_v58  ;;  %v3432_v58 = vld [vmem:[#allocation7] ss:$0 sm:$0xff] }
 0x108   :  { %3954 = vmatprep.subr.bf16.mxu0 %v4280_v61  ;;  %v325_v61 = vpack.c.bf16 %v238_v55, %v238_v55  ;;  %v4352_v55 = vld [vmem:[#allocation5 + $0x830] sm:$0xff]  }
 0x109   :  { %3975 = vmatpush3.bf16.msra.mxu1 %v4279_v60  ;;  %v4322_v60 = vld [vmem:[#allocation5 + $0x770] sm:$0xff]  }
 0x10a   :  { %3976 = vmatprep.subr.bf16.mxu1 %v4282_v63 }
 0x10b   :  { %3955 = vmatpush3.bf16.msra.mxu0 %v4281_v62  ;;  %v4321_v62 = vld [vmem:[#allocation5 + $0x7b8] sm:$0xff]  }
 0x10c   :  { %3984 = vmatprep.subr.bf16.mxu0 %v4284_v4 }
 0x10d   :  { %3977 = vmatpush3.bf16.msra.mxu1 %v4283_v2 }
 0x10e   :  { %2920 = vmatmul.mubr.bf16.vlgmr.msra.gmra.mxu0 %v318_v8  ;;  %4006 = vmatprep.subr.bf16.mxu1 %v4287_v9  ;;  %v4325_v9 = vld [vmem:[#allocation5 + $0x7b0] sm:$0xff]  }
 0x10f   :  { %3985 = vmatpush3.bf16.msra.mxu0 %v4286_v7  ;;  %2999 = vmatprep.mubr.bf16.mxu0 %v323_v54 }
 0x110   :  { %2960 = vmatmul.mubr.bf16.vlgmr.msra.gmra.mxu1 %v320_v13  ;;  %3986 = vmatprep.subr.bf16.mxu0 %v4289_v14  ;;  %v4327_v14 = vld [vmem:[#allocation5 + $0x728] sm:$0xff]  }
 0x111   :  { %4007 = vmatpush3.bf16.msra.mxu1 %v4288_v12  ;;  %3039 = vmatprep.mubr.bf16.mxu1 %v325_v61 }
 0x112   :  { %4008 = vmatprep.subr.bf16.mxu1 %v4291_v17  ;;  %v4329_v17 = vld [vmem:[#allocation5 + $0x7a8] sm:$0xff]  }
 0x113   :  { %3987 = vmatpush3.bf16.msra.mxu0 %v4290_v16 }
 0x114   :  { %3988 = vmatprep.subr.bf16.mxu0 %v4293_v19  ;;  %v4331_v19 = vld [vmem:[#allocation5 + $0x720] sm:$0xff]  }
 0x115   :  { %4009 = vmatpush3.bf16.msra.mxu1 %v4292_v18  ;;  %v4332_v18 = vld [vmem:[#allocation5 + $0x7e0] sm:$0xff]  }
 0x116   :  { %4010 = vmatprep.subr.bf16.mxu1 %v4295_v21  ;;  %v4333_v21 = vld [vmem:[#allocation5 + $0x7a0] sm:$0xff]  }
 0x117   :  { %3989 = vmatpush3.bf16.msra.mxu0 %v4294_v20  ;;  %v4334_v20 = vld [vmem:[#allocation5 + $0x758] sm:$0xff]  }
 0x118   :  { %3990 = vmatprep.subr.bf16.mxu0 %v4297_v24  ;;  %v4335_v24 = vld [vmem:[#allocation5 + $0x718] sm:$0xff]  }
 0x119   :  { %4011 = vmatpush3.bf16.msra.mxu1 %v4296_v22  ;;  %v4336_v22 = vld [vmem:[#allocation5 + $0x7d8] sm:$0xff]  }
 0x11a   :  { %4012 = vmatprep.subr.bf16.mxu1 %v4299_v26  ;;  %v4337_v26 = vld [vmem:[#allocation5 + $0x798] sm:$0xff]  }
 0x11b   :  { %3991 = vmatpush3.bf16.msra.mxu0 %v4298_v25  ;;  %v4338_v25 = vld [vmem:[#allocation5 + $0x750] sm:$0xff]  }
 0x11c   :  { %3992 = vmatprep.subr.bf16.mxu0 %v4301_v28  ;;  %v4339_v28 = vld [vmem:[#allocation5 + $0x710] sm:$0xff]  }
 0x11d   :  { %4013 = vmatpush3.bf16.msra.mxu1 %v4300_v27  ;;  %v4340_v27 = vld [vmem:[#allocation5 + $0x7d0] sm:$0xff]  }
 0x11e   :  { %4014 = vmatprep.subr.bf16.mxu1 %v4303_v31  ;;  %v4341_v31 = vld [vmem:[#allocation5 + $0x790] sm:$0xff]  }
 0x11f   :  { %3993 = vmatpush3.bf16.msra.mxu0 %v4302_v30  ;;  %v4342_v30 = vld [vmem:[#allocation5 + $0x748] sm:$0xff]  }
 0x120   :  { %3994 = vmatprep.subr.bf16.mxu0 %v4305_v33  ;;  %v4343_v33 = vld [vmem:[#allocation5 + $0x708] sm:$0xff]  }
 0x121   :  { %4015 = vmatpush3.bf16.msra.mxu1 %v4304_v32  ;;  %v4344_v32 = vld [vmem:[#allocation5 + $0x7c8] sm:$0xff]  }
 0x122   :  { %4016 = vmatprep.subr.bf16.mxu1 %v4307_v36  ;;  %v4345_v36 = vld [vmem:[#allocation5 + $0x788] sm:$0xff]  }
 0x123   :  { %3995 = vmatpush3.bf16.msra.mxu0 %v4306_v35  ;;  %v4346_v35 = vld [vmem:[#allocation5 + $0x740] sm:$0xff]  }
 0x124   :  { %3996 = vmatprep.subr.bf16.mxu0 %v4309_v38  ;;  %v109_v38 = vld [vmem:[#allocation2 + $0x38] sm:$0xff] }
 0x125   :  { %4017 = vmatpush3.bf16.msra.mxu1 %v4308_v37  ;;  %v4348_v37 = vld [vmem:[#allocation5 + $0x7c0] sm:$0xff]  }
 0x126   :  { %4018 = vmatprep.subr.bf16.mxu1 %v4311_v40  ;;  %v246_v40 = vrot.slane %v109_v38, %v4640_v34 }
 0x127   :  { %3997 = vmatpush3.bf16.msra.mxu0 %v4310_v39  ;;  %v4347_v39 = vld [vmem:[#allocation5 + $0x700] sm:$0xff]  }
 0x128   :  { %3998 = vmatprep.subr.bf16.mxu0 %v4313_v42  ;;  %v254_v42 = vcombine.high %v246_v40, %v246_v40  ;;  %v326_v45 = vpack.c.bf16 %v246_v40, %v246_v40 }
 0x129   :  { %4019 = vmatpush3.bf16.msra.mxu1 %v4312_v41  ;;  %v239_v41 = vcombine.high %v109_v38, %v109_v38 }
 0x12a   :  { %4020 = vmatprep.subr.bf16.mxu1 %v4315_v44  ;;  %v327_v46 = vpack.c.bf16 %v254_v42, %v254_v42  ;;  %v4365_v42 = vld [vmem:[#allocation8 + $0x74] ss:$8 sps:$4 sm:$0xff]  }
 0x12b   :  { %3999 = vmatpush3.bf16.msra.mxu0 %v4314_v43  ;;  %v4349_v43 = vld [vmem:[#allocation5 + $0x780] sm:$0xff]   ;;  %v253_v44 = vrot.slane %v239_v41, %v4640_v34  ;;  %v4363_v41 = vld [vmem:[#allocation8 + $0x70] ss:$8 sps:$4 sm:$0xff]  }
 0x12c   :  { %4028 = vmatprep.subr.bf16.mxu0 %v4317_v49 }
 0x12d   :  { %4021 = vmatpush3.bf16.msra.mxu1 %v4316_v47  ;;  %v255_v47 = vcombine.high %v253_v44, %v253_v44  ;;  %v328_v51 = vpack.c.bf16 %v253_v44, %v253_v44  ;;  %v4368_v44 = vld [vmem:[#allocation8 + $0x64] ss:$8 sps:$4 sm:$0xff]  }
 0x12e   :  { %v3736_v57 = vpop.f32.mrf.mxu0  ;;  %4050 = vmatprep.subr.bf16.mxu1 %v4320_v53  ;;  %3000 = vmatmul.mubr.bf16.vlgmr.msra.gmra.mxu0 %v322_v52 }
 0x12f   :  { %4029 = vmatpush3.bf16.msra.mxu0 %v4319_v56  ;;  %3079 = vmatprep.mubr.bf16.mxu0 %v327_v46  ;;  %v329_v52 = vpack.c.bf16 %v255_v47, %v255_v47  ;;  %v4371_v46 = vld [vmem:[#allocation8 + $0x54] ss:$8 sps:$4 sm:$0xff]   ;;  %v4369_v47 = vld [vmem:[#allocation8 + $0x50] ss:$8 sps:$4 sm:$0xff]  }
 0x130   :  { %v3737_v63 = vpop.f32.mrf.mxu0  ;;  %v3758_v0 = vpop.f32.mrf.mxu1  ;;  %3040 = vmatmul.mubr.bf16.vlgmr.msra.gmra.mxu1 %v324_v59  ;;  %4030 = vmatprep.subr.bf16.mxu0 %v4322_v60 }
 0x131   :  { %v3738_v2 = vadd.f32 %v3737_v63, %v3736_v57  ;;  %4051 = vmatpush3.bf16.msra.mxu1 %v4321_v62  ;;  %3119 = vmatprep.mubr.bf16.mxu1 %v329_v52  ;;  %v4353_v63 = vld [vmem:[#allocation5 + $0x828] sm:$0xff]  }
 0x132   :  { %v3739_v4 = vpop.f32.mrf.mxu0  ;;  %v3759_v5 = vpop.f32.mrf.mxu1  ;;  %4052 = vmatprep.subr.bf16.mxu1 %v4324_v1  ;;  %v3431_v1 = vld.sshfl [vmem:[#allocation2 + $0x40] sm:$0x33 pattern:$0x76325410]  ;;  %v4380_v52 = vld [vmem:[#allocation8 + $0x24] ss:$8 sps:$4 sm:$0xff]  }
 0x133   :  { %v2522_v7 = vadd.f32 %v3738_v2, %v3432_v58  ;;  %v3760_v8 = vadd.f32 %v3759_v5, %v3758_v0  ;;  %4031 = vmatpush3.bf16.msra.mxu0 %v4323_v3  ;;  %v4354_v2 = vld [vmem:[#allocation5 + $0x820] sm:$0xff]   ;;  %v263_v3 = vcombine.high %v3431_v1, %v3431_v1  ;;  %v4355_v5 = vld [vmem:[#allocation5 + $0x818] sm:$0xff]  }
 0x134   :  { %v3740_v10 = vpop.f32.mrf.mxu0  ;;  %v3761_v12 = vpop.f32.mrf.mxu1  ;;  %4032 = vmatprep.subr.bf16.mxu0 %v4326_v6  ;;  %v4356_v6 = vld [vmem:[#allocation5 + $0x810] sm:$0xff]  }
 0x135   :  { %v4656_v13 = vadd.f32 %v3760_v8, %v2522_v7  ;;  %4053 = vmatpush3.bf16.msra.mxu1 %v4325_v9  ;;  %v331_v4 = vpack.c.bf16 %v263_v3, %v263_v3  ;;  %v4357_v7 = vld [vmem:[#allocation5 + $0x808] sm:$0xff]   ;;  %v4358_v8 = vld [vmem:[#allocation5 + $0x800] sm:$0xff]   ;;  %v4359_v9 = vld [vmem:[#allocation5 + $0x858] ss:$0 sps:$4 sm:$0x77]  }
 0x136   :  { %v3762_v16 = vpop.f32.mrf.mxu1  ;;  %4054 = vmatprep.subr.bf16.mxu1 %v4328_v11  ;;  %v2485_v11 = vsel %vm2483_vm1, %v4359_v9, 0  ;;  %v4386_v3 = vld [vmem:[#allocation8 + $0x4] ss:$8 sps:$4 sm:$0xff]  }
 0x137   :  { %4033 = vmatpush3.bf16.msra.mxu0 %v4327_v14 }
 0x138   :  { %4034 = vmatprep.subr.bf16.mxu0 %v4330_v15  ;;  %v4360_v15 = vld [vmem:[#allocation5 + $0x850] sm:$0xff]  }
 0x139   :  { %4055 = vmatpush3.bf16.msra.mxu1 %v4329_v17 }
 0x13a   :  { %4056 = vmatprep.subr.bf16.mxu1 %v4332_v18 }
 0x13b   :  { %4035 = vmatpush3.bf16.msra.mxu0 %v4331_v19 }
 0x13c   :  { %4036 = vmatprep.subr.bf16.mxu0 %v4334_v20 }
 0x13d   :  { %4057 = vmatpush3.bf16.msra.mxu1 %v4333_v21 }
 0x13e   :  { %4058 = vmatprep.subr.bf16.mxu1 %v4336_v22 }
 0x13f   :  { %4037 = vmatpush3.bf16.msra.mxu0 %v4335_v24  ;;  %v4361_v24 = vld [vmem:[#allocation5 + $0x848] sm:$0xff]  }
 0x140   :  { %4038 = vmatprep.subr.bf16.mxu0 %v4338_v25 }
 0x141   :  { %4059 = vmatpush3.bf16.msra.mxu1 %v4337_v26  ;;  %v4362_v26 = vld [vmem:[#allocation5 + $0x840] sm:$0xff]  }
 0x142   :  { %4060 = vmatprep.subr.bf16.mxu1 %v4340_v27  ;;  %v330_v27 = vpack.c.bf16 %v3431_v1, %v3431_v1 }
 0x143   :  { %4039 = vmatpush3.bf16.msra.mxu0 %v4339_v28 }
 0x144   :  { %4040 = vmatprep.subr.bf16.mxu0 %v4342_v30 }
 0x145   :  { %4061 = vmatpush3.bf16.msra.mxu1 %v4341_v31 }
 0x146   :  { %4062 = vmatprep.subr.bf16.mxu1 %v4344_v32 }
 0x147   :  { %4041 = vmatpush3.bf16.msra.mxu0 %v4343_v33 }
 0x148   :  { %4042 = vmatprep.subr.bf16.mxu0 %v4346_v35 }
 0x149   :  { %4063 = vmatpush3.bf16.msra.mxu1 %v4345_v36 }
 0x14a   :  { %4064 = vmatprep.subr.bf16.mxu1 %v4348_v37 }
 0x14b   :  { %4043 = vmatpush3.bf16.msra.mxu0 %v4347_v39 }
 0x14c   :  { %3127 = vmatprep.subr.bf16.mxu0 %v4574_v50 }
 0x14d   :  { %4065 = vmatpush3.bf16.msra.mxu1 %v4349_v43 }
 0x14e   :  { %v3780_v49 = vpop.f32.mrf.mxu0  ;;  %3080 = vmatmul.mubr.bf16.vlgmr.msra.gmra.mxu0 %v326_v45  ;;  %3277 = vmatprep.subr.bf16.mxu1 %v4365_v42  ;;  %v4366_v45 = vld [vmem:[#allocation8 + $0x60] ss:$8 sps:$4 sm:$0xff]  }
 0x14f   :  { %3128 = vmatpush1.bf16.msra.mxu0 %v4351_v48  ;;  %3701 = vmatprep.mubr.msk.bf16.mxu0 %vm2479_vm0, %v331_v4  ;;  %v4374_v48 = vld [vmem:[#allocation8 + $0x44] ss:$8 sps:$4 sm:$0xff]   ;;  %v4384_v4 = vld [vmem:[#allocation8] ss:$8 sps:$4 sm:$0xff]  }
 0x150   :  { %v3781_v53 = vpop.f32.mrf.mxu0  ;;  %v3802_v54 = vpop.f32.mrf.mxu1  ;;  %3120 = vmatmul.mubr.bf16.vlgmr.msra.gmra.mxu1 %v328_v51  ;;  %3129 = vmatprep.subr.bf16.mxu0 %v4574_v50  ;;  %v4375_v51 = vld [vmem:[#allocation8 + $0x30] ss:$8 sps:$4 sm:$0xff]  }
 0x151   :  { %v3782_v34 = vadd.f32 %v3781_v53, %v3780_v49  ;;  %3309 = vmatprep.mubr.bf16.mxu1 %v4574_v50  ;;  %3278 = vmatpush1.bf16.msra.mxu1 %v4363_v41  ;;  %v4372_v49 = vld [vmem:[#allocation8 + $0x40] ss:$8 sps:$4 sm:$0xff]  }
 0x152   :  { %v3783_v56 = vpop.f32.mrf.mxu0  ;;  %v3803_v57 = vpop.f32.mrf.mxu1  ;;  %3279 = vmatprep.subr.bf16.mxu1 %v4368_v44  ;;  %v4378_v53 = vld [vmem:[#allocation8 + $0x20] ss:$8 sps:$4 sm:$0xff]  }
 0x153   :  { %v2602_v58 = vadd.f32 %v3782_v34, %v4656_v13  ;;  %v3804_v59 = vadd.f32 %v3803_v57, %v3802_v54  ;;  %3130 = vmatpush1.bf16.msra.mxu0 %v4352_v55  ;;  %v4383_v54 = vld [vmem:[#allocation8 + $0x14] ss:$8 sps:$4 sm:$0xff]   ;;  %v4381_v34 = vld [vmem:[#allocation8 + $0x10] ss:$8 sps:$4 sm:$0xff]  }
 0x154   :  { %v3784_v60 = vpop.f32.mrf.mxu0  ;;  %v3805_v61 = vpop.f32.mrf.mxu1  ;;  %3131 = vmatprep.subr.bf16.mxu0 %v4574_v50 }
 0x155   :  { %v2642_v62 = vadd.f32 %v3804_v59, %v2602_v58  ;;  %3280 = vmatpush1.bf16.msra.mxu1 %v4366_v45 }
 0x156   :  { %v3806_v0 = vpop.f32.mrf.mxu1  ;;  %3281 = vmatprep.subr.bf16.mxu1 %v4371_v46 }
 0x157   :  { %3132 = vmatpush1.bf16.msra.mxu0 %v4353_v63 }
 0x158   :  { %3133 = vmatprep.subr.bf16.mxu0 %v4574_v50 }
 0x159   :  { %3282 = vmatpush1.bf16.msra.mxu1 %v4369_v47 }
 0x15a   :  { %3283 = vmatprep.subr.bf16.mxu1 %v4374_v48 }
 0x15b   :  { %3134 = vmatpush1.bf16.msra.mxu0 %v4354_v2 }
 0x15c   :  { %3135 = vmatprep.subr.bf16.mxu0 %v4574_v50 }
 0x15d   :  { %3284 = vmatpush1.bf16.msra.mxu1 %v4372_v49 }
 0x15f   :  { %3136 = vmatpush1.bf16.msra.mxu0 %v4355_v5 }
 0x160   :  { %3137 = vmatprep.subr.bf16.mxu0 %v4574_v50 }
 0x163   :  { %3138 = vmatpush1.bf16.msra.mxu0 %v4356_v6 }
 0x164   :  { %3139 = vmatprep.subr.bf16.mxu0 %v4574_v50 }
 0x167   :  { %3140 = vmatpush1.bf16.msra.mxu0 %v4357_v7 }
 0x168   :  { %3141 = vmatprep.subr.bf16.mxu0 %v4574_v50 }
 0x16b   :  { %3142 = vmatpush1.bf16.msra.mxu0 %v4358_v8 }
 0x16c   :  { %3151 = vmatprep.subr.bf16.mxu0 %v4574_v50 }
 0x16e   :  { %v3824_v10 = vpop.f32.mrf.mxu0 }
 0x16f   :  { %3152 = vmatpush2.bf16.msra.mxu0 %v2485_v11 }
 0x170   :  { %v3825_v12 = vpop.f32.mrf.mxu0  ;;  %v3846_v13 = vpop.f32.mrf.mxu1  ;;  %3153 = vmatprep.subr.bf16.mxu0 %v4574_v50 }
 0x171   :  { %v3826_v14 = vadd.f32 %v3825_v12, %v3824_v10 }
 0x172   :  { %v3827_v16 = vpop.f32.mrf.mxu0  ;;  %v3847_v17 = vpop.f32.mrf.mxu1 }
 0x173   :  { %v2682_v18 = vadd.f32 %v3826_v14, %v2642_v62  ;;  %v3848_v19 = vadd.f32 %v3847_v17, %v3846_v13  ;;  %3154 = vmatpush2.bf16.msra.mxu0 %v4360_v15 }
 0x174   :  { %v3828_v20 = vpop.f32.mrf.mxu0  ;;  %v3849_v21 = vpop.f32.mrf.mxu1  ;;  %3155 = vmatprep.subr.bf16.mxu0 %v4574_v50 }
 0x175   :  { %v2722_v22 = vadd.f32 %v3848_v19, %v2682_v18 }
 0x176   :  { %v3850_v25 = vpop.f32.mrf.mxu1 }
 0x177   :  { %3156 = vmatpush2.bf16.msra.mxu0 %v4361_v24 }
 0x178   :  { %3157 = vmatprep.subr.bf16.mxu0 %v4574_v50  ;;  %v4377_v50 = vld [vmem:[#allocation8 + $0x34] ss:$8 sps:$4 sm:$0xff]  }
 0x179   :  { %3285 = vmatprep.subr.bf16.mxu1 %v4377_v50 }
 0x17a   :  { %3286 = vmatpush1.bf16.msra.mxu1 %v4375_v51  ;;  %v3318_v51 = vld [vmem:[#allocation11] sm:$0x3] }
 0x17b   :  { %3158 = vmatpush2.bf16.msra.mxu0 %v4362_v26  ;;  %3287 = vmatprep.subr.bf16.mxu1 %v4380_v52  ;;  %v3189_v52 = vsub.s32 0, %v4637_v29 }
 0x17e   :  { %3160 = vmatmul.mubr.bf16.vlgmr.msra.gmra.mxu0 %v330_v27  ;;  %3288 = vmatpush1.bf16.msra.mxu1 %v4378_v53  ;;  %v3193_v53 = vsub.s32 1, %v4637_v29 }
 0x17f   :  { %3289 = vmatprep.subr.bf16.mxu1 %v4383_v54  ;;  %v3185_v54 = vld [vmem:[#allocation10] sm:$0x3] }
 0x182   :  { %3290 = vmatpush1.bf16.msra.mxu1 %v4381_v34  ;;  %v3319_v34 = vunpack.c.0.s8 %v3318_v51 }
 0x183   :  { %3291 = vmatprep.subr.bf16.mxu1 %v4386_v3 }
 0x186   :  { %3292 = vmatpush1.bf16.msra.mxu1 %v4384_v4 }
 0x18e   :  { %v3868_v28 = vpop.f32.mrf.mxu0 }
 0x190   :  { %v3869_v30 = vpop.f32.mrf.mxu0  ;;  %v3890_v31 = vpop.f32.mrf.mxu1 }
 0x191   :  { %v3870_v32 = vadd.f32 %v3869_v30, %v3868_v28 }
 0x192   :  { %v3871_v33 = vpop.f32.mrf.mxu0  ;;  %v3891_v35 = vpop.f32.mrf.mxu1 }
 0x193   :  { %v2762_v36 = vadd.f32 %v3870_v32, %v2722_v22  ;;  %v3892_v37 = vadd.f32 %v3891_v35, %v3890_v31 }
 0x194   :  { %v3872_v38 = vpop.f32.mrf.mxu0  ;;  %v3893_v39 = vpop.f32.mrf.mxu1 }
 0x195   :  { %v2802_v40 = vadd.f32 %v3892_v37, %v2762_v36 }
 0x196   :  { %v3894_v43 = vpop.f32.mrf.mxu1 }
 0x1ae   :  { %v3912_v55 = vpop.f32.mrf.mxu0 }
 0x1b0   :  { %v3913_v56 = vpop.f32.mrf.mxu0  ;;  %v3934_v57 = vpop.f32.mrf.mxu1 }
 0x1b1   :  { %v3914_v58 = vadd.f32 %v3913_v56, %v3912_v55  ;;  %v3190_v55 = vrot.slane %v3185_v54, %v3189_v52  ;;  %v3194_v56 = vrot.slane %v3185_v54, %v3193_v53 }
 0x1b2   :  { %v3915_v59 = vpop.f32.mrf.mxu0  ;;  %v3935_v60 = vpop.f32.mrf.mxu1 }
 0x1b3   :  { %v2842_v61 = vadd.f32 %v3914_v58, %v2802_v40  ;;  %v3936_v62 = vadd.f32 %v3935_v60, %v3934_v57  ;;  %v3320_v58 = vcvt.s32.f32 %v3319_v34  ;;  %v3381_v59 = vand.u32 127, %v124_v23 }
 0x1b4   :  { %v3916_v63 = vpop.f32.mrf.mxu0  ;;  %v3937_v0 = vpop.f32.mrf.mxu1  ;;  %v4575_v23 = vmov 839922192  }
 0x1b5   :  { %v2882_v1 = vadd.f32 %v3936_v62, %v2842_v61  ;;  %vm3321_vm2 = vcmp.gt.f32.partialorder %v3320_v58, 0.0  ;;  %vm3383_vm3 = vcmp.eq.s32.totalorder %v3381_v59, 0 }
 0x1b6   :  { %v3938_v2 = vpop.f32.mrf.mxu1 }
 0x1ce   :  { %v3956_v5 = vpop.f32.mrf.mxu0 }
 0x1d0   :  { %v3957_v6 = vpop.f32.mrf.mxu0  ;;  %v3978_v7 = vpop.f32.mrf.mxu1 }
 0x1d1   :  { %v3958_v8 = vadd.f32 %v3957_v6, %v3956_v5 }
 0x1d2   :  { %v3959_v9 = vpop.f32.mrf.mxu0  ;;  %v3979_v10 = vpop.f32.mrf.mxu1 }
 0x1d3   :  { %v2922_v11 = vadd.f32 %v3958_v8, %v2882_v1  ;;  %v3980_v12 = vadd.f32 %v3979_v10, %v3978_v7  ;;  %v3338_v9 = vunpack.c.l.s4 %v4575_v23 }
 0x1d4   :  { %v3960_v13 = vpop.f32.mrf.mxu0  ;;  %v3981_v14 = vpop.f32.mrf.mxu1 }
 0x1d5   :  { %v2962_v15 = vadd.f32 %v3980_v12, %v2922_v11  ;;  %v3339_v10 = vunpack.c.0.s8 %v3338_v9 }
 0x1d6   :  { %v3982_v16 = vpop.f32.mrf.mxu1 }
 0x1d7   :  { %v3342_v11 = vsub.s32 %v3339_v10, %v4637_v29 }
 0x1ee   :  { %v4000_v17 = vpop.f32.mrf.mxu0 }
 0x1f0   :  { %v4001_v18 = vpop.f32.mrf.mxu0  ;;  %v4022_v19 = vpop.f32.mrf.mxu1 }
 0x1f1   :  { %v4002_v20 = vadd.f32 %v4001_v18, %v4000_v17 }
 0x1f2   :  { %v4003_v21 = vpop.f32.mrf.mxu0  ;;  %v4023_v22 = vpop.f32.mrf.mxu1 }
 0x1f3   :  { %v3002_v24 = vadd.f32 %v4002_v20, %v2962_v15  ;;  %v4024_v25 = vadd.f32 %v4023_v22, %v4022_v19 }
 0x1f4   :  { %v4004_v26 = vpop.f32.mrf.mxu0  ;;  %v4025_v27 = vpop.f32.mrf.mxu1 }
 0x1f5   :  { %v3042_v28 = vadd.f32 %v4024_v25, %v3002_v24 }
 0x1f6   :  { %v4026_v30 = vpop.f32.mrf.mxu1 }
 0x20e   :  { %v4044_v31 = vpop.f32.mrf.mxu0 }
 0x210   :  { %v4045_v32 = vpop.f32.mrf.mxu0  ;;  %v4066_v33 = vpop.f32.mrf.mxu1 }
 0x211   :  { %v4046_v40 = vadd.f32 %v4045_v32, %v4044_v31 }
 0x212   :  { %v4047_v35 = vpop.f32.mrf.mxu0  ;;  %v4067_v36 = vpop.f32.mrf.mxu1 }
 0x213   :  { %v3082_v41 = vadd.f32 %v4046_v40, %v3042_v28  ;;  %v4068_v42 = vadd.f32 %v4067_v36, %v4066_v33 }
 0x214   :  { %v4048_v37 = vpop.f32.mrf.mxu0  ;;  %v4069_v38 = vpop.f32.mrf.mxu1 }
 0x215   :  { %v3122_v43 = vadd.f32 %v4068_v42, %v3082_v41 }
 0x216   :  { %v4070_v39 = vpop.f32.mrf.mxu1 }
 0x23e   :  { %v3161_v44 = vpop.f32.mrf.mxu0 }
 0x23f   :  { %v3162_v45 = vadd.f32 %v3161_v44, %v3122_v43 }
 0x240   :  { %v3163_v46 = vpop.f32.mrf.mxu0 }
 0x241   :  { %v3167_v47 = vmax.f32 %v3162_v45, 0.0 }
 0x242   :  { %v3164_v48 = vpop.f32.mrf.mxu0 }
 0x243   :  { %v3168_v49 = vpack.c.bf16 %v3167_v47, %v3167_v47 }
 0x244   :  { %v3165_v50 = vpop.f32.mrf.mxu0 }
 0x245   :  { %3310 = vmatmul.mubr.bf16.vlgmr.msra.gmra.mxu1 %v3168_v49 }
 0x305   :  { %v3311_v57 = vpop.f32.mrf.mxu1 }
 0x306   :  { %v3312_v61 = vadd.f32 %v3311_v57, %v3190_v55 }
 0x307   :  { %v3313_v60 = vpop.f32.mrf.mxu1 }
 0x308   :  { %v3314_v62 = vadd.f32 %v3313_v60, %v3194_v56 }
 0x309   :  { %v3315_v63 = vpop.f32.mrf.mxu1 }
 0x30a   :  { %v3324_v0 = vcombine.low %v3312_v61, %v3314_v62 }
 0x30b   :  { %v3316_v1 = vpop.f32.mrf.mxu1 }
 0x30c   :  { %v3326_v2 = vsel %vm3321_vm2, %v3324_v0, -inf }
 0x30d   :  { %v3328_v3 = vcombine.high %v3326_v2, %v3326_v2  ;;  %v3385_v4 = vsel %vm3383_vm3, %v3312_v61, %v3326_v2  ;;  %v3331_v5 = vsel %vm3330_vm4, %v3326_v2, -inf }
 0x30f   :  { %v3332_v6 = vsel %vm3330_vm4, %v3328_v3, -inf  ;;  %v3389_v7 = vcombine.low %v3385_v4, %v3328_v3 }
 0x310   :  { %v3333_v8 = vmax.f32 %v3331_v5, %v3332_v6 }
 0x311   :  { %3719 = vst.sshfl [vmem:[#allocation13] sm:$0x33 pattern:$0x76325410] %v3389_v7 }
 0x312   :  { %3334 = vmax.xlane.f32.xlu0 %v3333_v8 }
 0x39b   :  { %v3335_v12 = vpop.xlane.xlu0 %3334 }
 0x39c   :  { %v3343_v13 = vrot.slane %v3335_v12, %v3342_v11 }
 0x39e   :  { %v3345_v14 = vsub.f32 %v3326_v2, %v3343_v13 }
 0x3a0   :  { %v3346_v15 = vmul.f32 1.442695, %v3345_v14 }
 0x3a2   :  { %4387 = vpow2.f32 %v3346_v15 }
 0x3af   :  { %v4388_v16 = vpop.eup %4387 }
 0x3b0   :  { %v3349_v17 = vcombine.high %v4388_v16, %v4388_v16  ;;  %v3351_v18 = vsel %vm3330_vm4, %v4388_v16, 0.0 }
 0x3b2   :  { %v3352_v19 = vsel %vm3330_vm4, %v3349_v17, 0.0 }
 0x3b3   :  { %v3353_v20 = vadd.f32 %v3352_v19, %v3351_v18 }
 0x3b5   :  { %3354 = vadd.xlane.f32.xlu0 %v3353_v20 }
 0x3b6   :  { %4522 = shalt.err (!%p4519_p6)
}
 0x3b7   :  { %3408 = dma.vmem_to_hbm [thread:$0]  %s3406_s5, 64, %s4694_s6, [#allocation4]  }
 0x3b8   :  { %s4577_s12 = smov [#allocation14]  }
 0x3b9   :  { %s3415_s13 = sshll.u32 %s4577_s12, 4  ;;  %s3416_s13 = int_to_ptr.vmem [resolvable:$true] %s3415_s13 }
 0x3ba   :  { %s4531_s14 = scalar_lea.vmem %s3416_s13, 64  ;;  %p4536_p8 = scmp.lt.s32.totalorder %s3416_s13, %s3416_s13 }
 0x3bb   :  { %p4532_p7 = scmp.ne.s32.totalorder %s3416_s13, %s4531_s14  ;;  %p4537_p9 = scmp.lt.s32.totalorder %s4531_s14, %s4531_s14 }
 0x3bd   :  { %p4538_p10 = por %p4537_p9, %p4536_p8 }
 0x3bf   :  { %p4539_p11 = pnand %p4538_p10, %p4532_p7 }
 0x43e   :  { %v3355_v29 = vpop.xlane.xlu0 %3354 }
 0x43f   :  { %4389 = vrcp.f32 %v3355_v29 }
 0x44c   :  { %v4390_v21 = vpop.eup %4389 }
 0x44d   :  { %v3357_v22 = vmul.f32 %v4390_v21, %v3355_v29 }
 0x44f   :  { %v3358_v24 = vsub.f32 2.0, %v3357_v22 }
 0x451   :  { %v3359_v25 = vmul.f32 %v4390_v21, %v3358_v24 }
 0x453   :  { %v3367_v26 = vrot.slane %v3359_v25, %v3342_v11 }
 0x455   :  { %v3369_v27 = vmul.f32 %v4388_v16, %v3367_v26 }
 0x457   :  { %3718 = vst.sshfl [vmem:[#allocation14] sm:$0x33 pattern:$0x76325410] %v3369_v27 }
 0x458   :  { %4542 = shalt.err (!%p4539_p11)
}
 0x459   :  { %3418 = dma.vmem_to_hbm [thread:$0]  %s3416_s13, 64, %s4695_s7, [#allocation15]  }
 0x45a   :  { %4559 = dma.done.wait [#allocation4], 64  }
 0x45b   :  { %4560 = vsyncadd [#allocation4], 4294967232 }
 0x45c   :  { %4561 = dma.done.wait [#allocation15], 64  }
 0x45d   :  { %4562 = vsyncadd [#allocation15], 4294967232 }
 0x45e   :  { %3425 = vsyncpa [#allocation3], 1 }
 0x45f   :  { %3426 = vsyncpa [#allocation6], 1 }
 0x460   :  { %3427 = vsyncpa [#allocation9], 1 }
 0x461   :  { %3428 = vsyncpa [#allocation12], 1 }
 0x462   :  { %3429 = vsyncpa [#allocation4], 1 }
 0x463   :  { %3430 = vsyncpa [#allocation15], 1 }

</bundles_post_ra>
